<compile_context>
chip_gen: v7x
topology: tpu7x:2x2x1
jax: 0.10.0
libtpu: 0.0.40
codegen_flags: <defaults>
</compile_context>

<pallas_src>
import jax
import jax.numpy as jnp
from jax.experimental import pallas as pl
from jax.experimental.pallas import tpu as pltpu

FEAT_DIM = 228   # true feature width (module spec)
FEAT_PAD = 256   # lane-padded feature width used inside the kernel
INT_DIM = 128
Z_DIM = 30       # true latent width
Z_PAD = 128      # lane-padded latent width used inside the kernel
BN_EPS = 1e-5


def _bn_group(h_flat, gt, b, gamma, beta, relu=False):
    """Training-mode BatchNorm1d (biased variance) with per-group statistics.

    h_flat: [gt*b, N] activations (gt independent groups of batch b).
    gamma/beta: [1, N]. Returns [gt*b, N]. Single-pass scale/shift form.
    """
    n = h_flat.shape[-1]
    hg = h_flat.reshape(gt, b, n)
    mean = jnp.mean(hg, axis=1, keepdims=True)                              # [gt,1,N]
    var = jnp.maximum(jnp.mean(hg * hg, axis=1, keepdims=True) - mean * mean, 0.0)
    scale = gamma * jax.lax.rsqrt(var + BN_EPS)                             # [gt,1,N]
    shift = beta - mean * scale
    out = hg * scale + shift
    if relu:
        out = jnp.maximum(out, 0.0)
    return out.reshape(gt * b, n)


def vae_kernel(x_ref, w1_ref, w2_ref, w3_ref, w4_ref, bn_ref, out_ref):
    gt, b, _ = x_ref.shape
    x = x_ref[...].reshape(gt * b, FEAT_PAD)
    bn = bn_ref[...]  # [8, 256]: rows = g1, be1, g2, be2, g3, be3, g4, be4 (zero pad lanes)

    # ---- encode ----
    h1 = jnp.dot(x, w1_ref[...], preferred_element_type=jnp.float32)
    h1 = _bn_group(h1, gt, b, bn[0:1, :INT_DIM], bn[1:2, :INT_DIM], relu=True)

    h2 = jnp.dot(h1, w2_ref[...], preferred_element_type=jnp.float32)
    z = _bn_group(h2, gt, b, bn[2:3, :Z_PAD], bn[3:4, :Z_PAD])  # pad lanes stay exactly 0

    # ---- decode ----
    h3 = jnp.dot(z, w3_ref[...], preferred_element_type=jnp.float32)
    h3 = _bn_group(h3, gt, b, bn[4:5, :INT_DIM], bn[5:6, :INT_DIM], relu=True)

    h4 = jnp.dot(h3, w4_ref[...], preferred_element_type=jnp.float32)
    out = _bn_group(h4, gt, b, bn[6:7, :], bn[7:8, :])           # lane-dense 256-wide store
    out_ref[...] = out.reshape(gt, b, FEAT_PAD)


def _pad_feat(x):
    """Zero-pad the trailing feature axis 228 -> 256 (exact: w1 pad rows are zero)."""
    pad = ((0, 0),) * (x.ndim - 1) + ((0, FEAT_PAD - FEAT_DIM),)
    return jnp.pad(x, pad)


def vae_forward(x, kp):
    """Single fused call. x: [B, 228] f32; BN statistics over the whole batch."""
    batch = x.shape[0]
    xg = _pad_feat(x).reshape(1, batch, FEAT_PAD)
    vmem = pl.BlockSpec(memory_space=pltpu.MemorySpace.VMEM)
    out = pl.pallas_call(
        vae_kernel,
        out_shape=jax.ShapeDtypeStruct((1, batch, FEAT_PAD), jnp.float32),
        in_specs=[vmem] * 6,
        out_specs=vmem,
    )(xg, kp["w1"], kp["w2"], kp["w3"], kp["w4"], kp["bn"])
    return out.reshape(batch, FEAT_PAD)[:, :FEAT_DIM]


def vae_forward_stacked(x, kp, g_tile=4):
    """G independent VAE batches in one call.

    x: [G, B, 228]. Each grid step processes g_tile groups: they are flattened into
    the matmul M dimension (g_tile*B rows per MXU pass) while BN statistics remain
    per-group. Grid axis is "parallel" so v7x's two TensorCores split the steps;
    weights/BN params stay VMEM-resident (constant block index across the grid).
    """
    groups, b, _ = x.shape
    assert groups % g_tile == 0, "groups must be a multiple of g_tile"
    xg = _pad_feat(x)
    act_spec = pl.BlockSpec((g_tile, b, FEAT_PAD), lambda g: (g, 0, 0))
    out = pl.pallas_call(
        vae_kernel,
        out_shape=jax.ShapeDtypeStruct((groups, b, FEAT_PAD), jnp.float32),
        grid=(groups // g_tile,),
        in_specs=[
            act_spec,
            pl.BlockSpec((FEAT_PAD, INT_DIM), lambda g: (0, 0)),
            pl.BlockSpec((INT_DIM, Z_PAD), lambda g: (0, 0)),
            pl.BlockSpec((Z_PAD, INT_DIM), lambda g: (0, 0)),
            pl.BlockSpec((INT_DIM, FEAT_PAD), lambda g: (0, 0)),
            pl.BlockSpec((8, FEAT_PAD), lambda g: (0, 0)),
        ],
        out_specs=act_spec,
        compiler_params=pltpu.CompilerParams(dimension_semantics=("parallel",)),
    )(xg, kp["w1"], kp["w2"], kp["w3"], kp["w4"], kp["bn"])
    return out[..., :FEAT_DIM]


def init_params(key):
    """PyTorch-like init. Linear weights stored as [in, out]; biases are only used by
    the pure-JAX reference (they cancel under training-mode BN, so the kernel drops
    them)."""
    ks = jax.random.split(key, 8)

    def linear(kw, kb, fan_in, fan_out):
        bound = 1.0 / (fan_in ** 0.5)
        w = jax.random.uniform(kw, (fan_in, fan_out), jnp.float32, -bound, bound)
        b = jax.random.uniform(kb, (1, fan_out), jnp.float32, -bound, bound)
        return w, b

    w1, b1 = linear(ks[0], ks[1], FEAT_DIM, INT_DIM)
    w2, b2 = linear(ks[2], ks[3], INT_DIM, Z_DIM)
    w3, b3 = linear(ks[4], ks[5], Z_DIM, INT_DIM)
    w4, b4 = linear(ks[6], ks[7], INT_DIM, FEAT_DIM)

    def bn(dim):
        return jnp.ones((1, dim), jnp.float32), jnp.zeros((1, dim), jnp.float32)

    g1, be1 = bn(INT_DIM)
    g2, be2 = bn(Z_DIM)
    g3, be3 = bn(INT_DIM)
    g4, be4 = bn(FEAT_DIM)

    return dict(
        w1=w1, b1=b1, g1=g1, be1=be1,
        w2=w2, b2=b2, g2=g2, be2=be2,
        w3=w3, b3=b3, g3=g3, be3=be3,
        w4=w4, b4=b4, g4=g4, be4=be4,
    )


def pack_kernel_params(p):
    """Zero-pad weights to lane-aligned shapes and pack the 8 BN vectors into one
    [8, 256] operand. Zero pad rows/cols and zero gamma/beta pad lanes keep the
    result numerically identical to the unpadded computation."""
    def pad2(w, rows, cols):
        return jnp.pad(w, ((0, rows - w.shape[0]), (0, cols - w.shape[1])))

    def padv(v):
        return jnp.pad(v, ((0, 0), (0, FEAT_PAD - v.shape[1])))

    bn = jnp.concatenate(
        [padv(p[k]) for k in ("g1", "be1", "g2", "be2", "g3", "be3", "g4", "be4")],
        axis=0,
    )
    return dict(
        w1=pad2(p["w1"], FEAT_PAD, INT_DIM),   # zero K-rows for padded x lanes
        w2=pad2(p["w2"], INT_DIM, Z_PAD),      # zero N-cols -> padded z lanes = 0
        w3=pad2(p["w3"], Z_PAD, INT_DIM),      # zero K-rows for padded z lanes
        w4=pad2(p["w4"], INT_DIM, FEAT_PAD),   # zero N-cols -> lane-dense output
        bn=bn,
    )


def reference_forward(x, p):
    """Pure-JAX reference matching the PyTorch forward exactly (with biases,
    two-pass biased variance, training-mode BN)."""
    def bn(h, g, b):
        m = jnp.mean(h, axis=0, keepdims=True)
        v = jnp.mean((h - m) ** 2, axis=0, keepdims=True)
        return (h - m) / jnp.sqrt(v + BN_EPS) * g + b

    h1 = jnp.maximum(bn(x @ p["w1"] + p["b1"], p["g1"], p["be1"]), 0.0)
    z = bn(h1 @ p["w2"] + p["b2"], p["g2"], p["be2"])
    h3 = jnp.maximum(bn(z @ p["w3"] + p["b3"], p["g3"], p["be3"]), 0.0)
    return bn(h3 @ p["w4"] + p["b4"], p["g4"], p["be4"])


if __name__ == "__main__":
    key = jax.random.PRNGKey(0)
    k_x, k_p = jax.random.split(key)
    params = init_params(k_p)
    kparams = pack_kernel_params(params)

    # --- single fused call: 256 rows fills a full MXU pass on v6e/v7x ---
    batch = 256
    x = jax.random.normal(k_x, (batch, FEAT_DIM), dtype=jnp.float32)
    out = jax.block_until_ready(vae_forward(x, kparams))
    ref = reference_forward(x, params)
    assert out.shape == (batch, FEAT_DIM)
    assert jnp.allclose(out, ref, atol=2e-4, rtol=2e-4), "single-call mismatch vs reference"

    # --- stacked independent batches: g_tile groups flattened per grid step ---
    # 8 groups / g_tile=4 -> 2 grid steps of 256 matmul rows each (even step count
    # keeps both v7x TensorCores busy via the "parallel" axis).
    groups, group_batch, g_tile = 8, 64, 4
    xg = jax.random.normal(jax.random.fold_in(k_x, 1),
                           (groups, group_batch, FEAT_DIM), dtype=jnp.float32)
    outg = jax.block_until_ready(vae_forward_stacked(xg, kparams, g_tile=g_tile))
    refg = jax.vmap(lambda xb: reference_forward(xb, params))(xg)
    assert outg.shape == (groups, group_batch, FEAT_DIM)
    assert jnp.allclose(outg, refg, atol=2e-4, rtol=2e-4), "stacked-call mismatch vs reference"

    print("KERNEL_OK")
</pallas_src>

<mosaic_0001>
module attributes {stable_mosaic.version = 11 : i64} {
  func.func @vae_kernel(%arg0: memref<1x256x256xf32, #tpu.memory_space<vmem>>, %arg1: memref<256x128xf32, #tpu.memory_space<vmem>>, %arg2: memref<128x128xf32, #tpu.memory_space<vmem>>, %arg3: memref<128x128xf32, #tpu.memory_space<vmem>>, %arg4: memref<128x256xf32, #tpu.memory_space<vmem>>, %arg5: memref<8x256xf32, #tpu.memory_space<vmem>>, %arg6: memref<1x256x256xf32, #tpu.memory_space<vmem>>) attributes {dimension_semantics = [], scalar_prefetch = 0 : i64, scratch_operands = 0 : i64, tpu.core_type = #tpu.core_type<tc>} {
    %c0 = arith.constant 0 : index
    %c0_0 = arith.constant 0 : index
    %c0_1 = arith.constant 0 : index
    %0 = vector.load %arg0[%c0, %c0_0, %c0_1] : memref<1x256x256xf32, #tpu.memory_space<vmem>>, vector<1x256x256xf32>
    %1 = vector.shape_cast %0 : vector<1x256x256xf32> to vector<256x256xf32>
    %c0_2 = arith.constant 0 : index
    %c0_3 = arith.constant 0 : index
    %2 = vector.load %arg5[%c0_2, %c0_3] : memref<8x256xf32, #tpu.memory_space<vmem>>, vector<8x256xf32>
    %c0_4 = arith.constant 0 : index
    %c0_5 = arith.constant 0 : index
    %3 = vector.load %arg1[%c0_4, %c0_5] : memref<256x128xf32, #tpu.memory_space<vmem>>, vector<256x128xf32>
    %cst = arith.constant dense<0.000000e+00> : vector<256x128xf32>
    %4 = tpu.matmul %1, %3, %cst {dimension_numbers = #tpu.dot_dimension_numbers<[1], [0], [0], [1], [0, 0, 1, 1], [], []>} : vector<256x256xf32>, vector<256x128xf32>, vector<256x128xf32> -> vector<256x128xf32>
    %5 = vector.extract_strided_slice %2 {offsets = [0, 0], sizes = [1, 128], strides = [1, 1]} : vector<8x256xf32> to vector<1x128xf32>
    %6 = vector.extract_strided_slice %2 {offsets = [1, 0], sizes = [1, 128], strides = [1, 1]} : vector<8x256xf32> to vector<1x128xf32>
    %7 = vector.shape_cast %4 : vector<256x128xf32> to vector<1x256x128xf32>
    %cst_6 = arith.constant dense<0.000000e+00> : vector<1x128xf32>
    %8 = vector.multi_reduction <add>, %7, %cst_6 [1] : vector<1x256x128xf32> to vector<1x128xf32>
    %9 = vector.shape_cast %8 : vector<1x128xf32> to vector<1x1x128xf32>
    %cst_7 = arith.constant 2.560000e+02 : f32
    %10 = vector.broadcast %cst_7 : f32 to vector<1x1x128xf32>
    %11 = arith.divf %9, %10 : vector<1x1x128xf32>
    %12 = arith.mulf %7, %7 : vector<1x256x128xf32>
    %cst_8 = arith.constant dense<0.000000e+00> : vector<1x128xf32>
    %13 = vector.multi_reduction <add>, %12, %cst_8 [1] : vector<1x256x128xf32> to vector<1x128xf32>
    %14 = vector.shape_cast %13 : vector<1x128xf32> to vector<1x1x128xf32>
    %cst_9 = arith.constant 2.560000e+02 : f32
    %15 = vector.broadcast %cst_9 : f32 to vector<1x1x128xf32>
    %16 = arith.divf %14, %15 : vector<1x1x128xf32>
    %17 = arith.mulf %11, %11 : vector<1x1x128xf32>
    %18 = arith.subf %16, %17 : vector<1x1x128xf32>
    %cst_10 = arith.constant 0.000000e+00 : f32
    %19 = vector.broadcast %cst_10 : f32 to vector<1x1x128xf32>
    %20 = arith.maximumf %18, %19 : vector<1x1x128xf32>
    %cst_11 = arith.constant 9.99999974E-6 : f32
    %21 = vector.broadcast %cst_11 : f32 to vector<1x1x128xf32>
    %22 = arith.addf %20, %21 : vector<1x1x128xf32>
    %23 = math.rsqrt %22 : vector<1x1x128xf32>
    %24 = vector.shape_cast %5 : vector<1x128xf32> to vector<1x1x128xf32>
    %25 = arith.mulf %24, %23 : vector<1x1x128xf32>
    %26 = arith.mulf %11, %25 : vector<1x1x128xf32>
    %27 = vector.shape_cast %6 : vector<1x128xf32> to vector<1x1x128xf32>
    %28 = arith.subf %27, %26 : vector<1x1x128xf32>
    %29 = vector.broadcast %25 : vector<1x1x128xf32> to vector<1x256x128xf32>
    %30 = arith.mulf %7, %29 : vector<1x256x128xf32>
    %31 = vector.broadcast %28 : vector<1x1x128xf32> to vector<1x256x128xf32>
    %32 = arith.addf %30, %31 : vector<1x256x128xf32>
    %cst_12 = arith.constant 0.000000e+00 : f32
    %33 = vector.broadcast %cst_12 : f32 to vector<1x256x128xf32>
    %34 = arith.maximumf %32, %33 : vector<1x256x128xf32>
    %35 = vector.shape_cast %34 : vector<1x256x128xf32> to vector<256x128xf32>
    %c0_13 = arith.constant 0 : index
    %c0_14 = arith.constant 0 : index
    %36 = vector.load %arg2[%c0_13, %c0_14] : memref<128x128xf32, #tpu.memory_space<vmem>>, vector<128x128xf32>
    %cst_15 = arith.constant dense<0.000000e+00> : vector<256x128xf32>
    %37 = tpu.matmul %35, %36, %cst_15 {dimension_numbers = #tpu.dot_dimension_numbers<[1], [0], [0], [1], [0, 0, 1, 1], [], []>} : vector<256x128xf32>, vector<128x128xf32>, vector<256x128xf32> -> vector<256x128xf32>
    %38 = vector.extract_strided_slice %2 {offsets = [2, 0], sizes = [1, 128], strides = [1, 1]} : vector<8x256xf32> to vector<1x128xf32>
    %39 = vector.extract_strided_slice %2 {offsets = [3, 0], sizes = [1, 128], strides = [1, 1]} : vector<8x256xf32> to vector<1x128xf32>
    %40 = vector.shape_cast %37 : vector<256x128xf32> to vector<1x256x128xf32>
    %cst_16 = arith.constant dense<0.000000e+00> : vector<1x128xf32>
    %41 = vector.multi_reduction <add>, %40, %cst_16 [1] : vector<1x256x128xf32> to vector<1x128xf32>
    %42 = vector.shape_cast %41 : vector<1x128xf32> to vector<1x1x128xf32>
    %cst_17 = arith.constant 2.560000e+02 : f32
    %43 = vector.broadcast %cst_17 : f32 to vector<1x1x128xf32>
    %44 = arith.divf %42, %43 : vector<1x1x128xf32>
    %45 = arith.mulf %40, %40 : vector<1x256x128xf32>
    %cst_18 = arith.constant dense<0.000000e+00> : vector<1x128xf32>
    %46 = vector.multi_reduction <add>, %45, %cst_18 [1] : vector<1x256x128xf32> to vector<1x128xf32>
    %47 = vector.shape_cast %46 : vector<1x128xf32> to vector<1x1x128xf32>
    %cst_19 = arith.constant 2.560000e+02 : f32
    %48 = vector.broadcast %cst_19 : f32 to vector<1x1x128xf32>
    %49 = arith.divf %47, %48 : vector<1x1x128xf32>
    %50 = arith.mulf %44, %44 : vector<1x1x128xf32>
    %51 = arith.subf %49, %50 : vector<1x1x128xf32>
    %cst_20 = arith.constant 0.000000e+00 : f32
    %52 = vector.broadcast %cst_20 : f32 to vector<1x1x128xf32>
    %53 = arith.maximumf %51, %52 : vector<1x1x128xf32>
    %cst_21 = arith.constant 9.99999974E-6 : f32
    %54 = vector.broadcast %cst_21 : f32 to vector<1x1x128xf32>
    %55 = arith.addf %53, %54 : vector<1x1x128xf32>
    %56 = math.rsqrt %55 : vector<1x1x128xf32>
    %57 = vector.shape_cast %38 : vector<1x128xf32> to vector<1x1x128xf32>
    %58 = arith.mulf %57, %56 : vector<1x1x128xf32>
    %59 = arith.mulf %44, %58 : vector<1x1x128xf32>
    %60 = vector.shape_cast %39 : vector<1x128xf32> to vector<1x1x128xf32>
    %61 = arith.subf %60, %59 : vector<1x1x128xf32>
    %62 = vector.broadcast %58 : vector<1x1x128xf32> to vector<1x256x128xf32>
    %63 = arith.mulf %40, %62 : vector<1x256x128xf32>
    %64 = vector.broadcast %61 : vector<1x1x128xf32> to vector<1x256x128xf32>
    %65 = arith.addf %63, %64 : vector<1x256x128xf32>
    %66 = vector.shape_cast %65 : vector<1x256x128xf32> to vector<256x128xf32>
    %c0_22 = arith.constant 0 : index
    %c0_23 = arith.constant 0 : index
    %67 = vector.load %arg3[%c0_22, %c0_23] : memref<128x128xf32, #tpu.memory_space<vmem>>, vector<128x128xf32>
    %cst_24 = arith.constant dense<0.000000e+00> : vector<256x128xf32>
    %68 = tpu.matmul %66, %67, %cst_24 {dimension_numbers = #tpu.dot_dimension_numbers<[1], [0], [0], [1], [0, 0, 1, 1], [], []>} : vector<256x128xf32>, vector<128x128xf32>, vector<256x128xf32> -> vector<256x128xf32>
    %69 = vector.extract_strided_slice %2 {offsets = [4, 0], sizes = [1, 128], strides = [1, 1]} : vector<8x256xf32> to vector<1x128xf32>
    %70 = vector.extract_strided_slice %2 {offsets = [5, 0], sizes = [1, 128], strides = [1, 1]} : vector<8x256xf32> to vector<1x128xf32>
    %71 = vector.shape_cast %68 : vector<256x128xf32> to vector<1x256x128xf32>
    %cst_25 = arith.constant dense<0.000000e+00> : vector<1x128xf32>
    %72 = vector.multi_reduction <add>, %71, %cst_25 [1] : vector<1x256x128xf32> to vector<1x128xf32>
    %73 = vector.shape_cast %72 : vector<1x128xf32> to vector<1x1x128xf32>
    %cst_26 = arith.constant 2.560000e+02 : f32
    %74 = vector.broadcast %cst_26 : f32 to vector<1x1x128xf32>
    %75 = arith.divf %73, %74 : vector<1x1x128xf32>
    %76 = arith.mulf %71, %71 : vector<1x256x128xf32>
    %cst_27 = arith.constant dense<0.000000e+00> : vector<1x128xf32>
    %77 = vector.multi_reduction <add>, %76, %cst_27 [1] : vector<1x256x128xf32> to vector<1x128xf32>
    %78 = vector.shape_cast %77 : vector<1x128xf32> to vector<1x1x128xf32>
    %cst_28 = arith.constant 2.560000e+02 : f32
    %79 = vector.broadcast %cst_28 : f32 to vector<1x1x128xf32>
    %80 = arith.divf %78, %79 : vector<1x1x128xf32>
    %81 = arith.mulf %75, %75 : vector<1x1x128xf32>
    %82 = arith.subf %80, %81 : vector<1x1x128xf32>
    %cst_29 = arith.constant 0.000000e+00 : f32
    %83 = vector.broadcast %cst_29 : f32 to vector<1x1x128xf32>
    %84 = arith.maximumf %82, %83 : vector<1x1x128xf32>
    %cst_30 = arith.constant 9.99999974E-6 : f32
    %85 = vector.broadcast %cst_30 : f32 to vector<1x1x128xf32>
    %86 = arith.addf %84, %85 : vector<1x1x128xf32>
    %87 = math.rsqrt %86 : vector<1x1x128xf32>
    %88 = vector.shape_cast %69 : vector<1x128xf32> to vector<1x1x128xf32>
    %89 = arith.mulf %88, %87 : vector<1x1x128xf32>
    %90 = arith.mulf %75, %89 : vector<1x1x128xf32>
    %91 = vector.shape_cast %70 : vector<1x128xf32> to vector<1x1x128xf32>
    %92 = arith.subf %91, %90 : vector<1x1x128xf32>
    %93 = vector.broadcast %89 : vector<1x1x128xf32> to vector<1x256x128xf32>
    %94 = arith.mulf %71, %93 : vector<1x256x128xf32>
    %95 = vector.broadcast %92 : vector<1x1x128xf32> to vector<1x256x128xf32>
    %96 = arith.addf %94, %95 : vector<1x256x128xf32>
    %cst_31 = arith.constant 0.000000e+00 : f32
    %97 = vector.broadcast %cst_31 : f32 to vector<1x256x128xf32>
    %98 = arith.maximumf %96, %97 : vector<1x256x128xf32>
    %99 = vector.shape_cast %98 : vector<1x256x128xf32> to vector<256x128xf32>
    %c0_32 = arith.constant 0 : index
    %c0_33 = arith.constant 0 : index
    %100 = vector.load %arg4[%c0_32, %c0_33] : memref<128x256xf32, #tpu.memory_space<vmem>>, vector<128x256xf32>
    %cst_34 = arith.constant dense<0.000000e+00> : vector<256x256xf32>
    %101 = tpu.matmul %99, %100, %cst_34 {dimension_numbers = #tpu.dot_dimension_numbers<[1], [0], [0], [1], [0, 0, 1, 1], [], []>} : vector<256x128xf32>, vector<128x256xf32>, vector<256x256xf32> -> vector<256x256xf32>
    %102 = vector.extract_strided_slice %2 {offsets = [6, 0], sizes = [1, 256], strides = [1, 1]} : vector<8x256xf32> to vector<1x256xf32>
    %103 = vector.extract_strided_slice %2 {offsets = [7, 0], sizes = [1, 256], strides = [1, 1]} : vector<8x256xf32> to vector<1x256xf32>
    %104 = vector.shape_cast %101 : vector<256x256xf32> to vector<1x256x256xf32>
    %cst_35 = arith.constant dense<0.000000e+00> : vector<1x256xf32>
    %105 = vector.multi_reduction <add>, %104, %cst_35 [1] : vector<1x256x256xf32> to vector<1x256xf32>
    %106 = vector.shape_cast %105 : vector<1x256xf32> to vector<1x1x256xf32>
    %cst_36 = arith.constant 2.560000e+02 : f32
    %107 = vector.broadcast %cst_36 : f32 to vector<1x1x256xf32>
    %108 = arith.divf %106, %107 : vector<1x1x256xf32>
    %109 = arith.mulf %104, %104 : vector<1x256x256xf32>
    %cst_37 = arith.constant dense<0.000000e+00> : vector<1x256xf32>
    %110 = vector.multi_reduction <add>, %109, %cst_37 [1] : vector<1x256x256xf32> to vector<1x256xf32>
    %111 = vector.shape_cast %110 : vector<1x256xf32> to vector<1x1x256xf32>
    %cst_38 = arith.constant 2.560000e+02 : f32
    %112 = vector.broadcast %cst_38 : f32 to vector<1x1x256xf32>
    %113 = arith.divf %111, %112 : vector<1x1x256xf32>
    %114 = arith.mulf %108, %108 : vector<1x1x256xf32>
    %115 = arith.subf %113, %114 : vector<1x1x256xf32>
    %cst_39 = arith.constant 0.000000e+00 : f32
    %116 = vector.broadcast %cst_39 : f32 to vector<1x1x256xf32>
    %117 = arith.maximumf %115, %116 : vector<1x1x256xf32>
    %cst_40 = arith.constant 9.99999974E-6 : f32
    %118 = vector.broadcast %cst_40 : f32 to vector<1x1x256xf32>
    %119 = arith.addf %117, %118 : vector<1x1x256xf32>
    %120 = math.rsqrt %119 : vector<1x1x256xf32>
    %121 = vector.shape_cast %102 : vector<1x256xf32> to vector<1x1x256xf32>
    %122 = arith.mulf %121, %120 : vector<1x1x256xf32>
    %123 = arith.mulf %108, %122 : vector<1x1x256xf32>
    %124 = vector.shape_cast %103 : vector<1x256xf32> to vector<1x1x256xf32>
    %125 = arith.subf %124, %123 : vector<1x1x256xf32>
    %126 = vector.broadcast %122 : vector<1x1x256xf32> to vector<1x256x256xf32>
    %127 = arith.mulf %104, %126 : vector<1x256x256xf32>
    %128 = vector.broadcast %125 : vector<1x1x256xf32> to vector<1x256x256xf32>
    %129 = arith.addf %127, %128 : vector<1x256x256xf32>
    %130 = vector.shape_cast %129 : vector<1x256x256xf32> to vector<256x256xf32>
    %131 = vector.shape_cast %130 : vector<256x256xf32> to vector<1x256x256xf32>
    %c0_41 = arith.constant 0 : index
    %c0_42 = arith.constant 0 : index
    %c0_43 = arith.constant 0 : index
    %132 = vector.load %arg6[%c0_41, %c0_42, %c0_43] : memref<1x256x256xf32, #tpu.memory_space<vmem>>, vector<1x256x256xf32>
    tpu.vector_store %arg6[%c0_41, %c0_42, %c0_43], %131 {strides = array<i32>} : memref<1x256x256xf32, #tpu.memory_space<vmem>>, vector<1x256x256xf32>,
    return
  }
}

</mosaic_0001>

<bundles_post_ra>
// kernel: tpu_custom_call.1
= control target key start
LH: loop header
LB: loop body
LE: loop exit
PB: predicated region body
PF: predicated region fallthrough
CT: control target
= control target key end

     0   :  { %11 = vsyncpa [#allocation3], 0  ;;  %s4391_s0 = inlined_call_operand.hbm [shape: f32[1,256,256], index: 0, kind: input, shape index: {}]   ;;  %s4392_s1 = inlined_call_operand.hbm [shape: f32[256,128], index: 1, kind: input, shape index: {}]   ;;  %s4393_s2 = inlined_call_operand.hbm [shape: f32[128,128], index: 2, kind: input, shape index: {}]   ;;  %s4394_s3 = inlined_call_operand.hbm [shape: f32[128,128], index: 3, kind: input, shape index: {}]   ;;  %s4395_s4 = inlined_call_operand.hbm [shape: f32[128,256], index: 4, kind: input, shape index: {}]   ;;  %s4396_s5 = inlined_call_operand.vmem [shape: f32[8,256], index: 5, kind: input, shape index: {}]   ;;  %s4397_s6 = inlined_call_operand.hbm [shape: f32[1,256,256], index: 6, kind: output, shape index: {}]  }
   0x1   :  { %12 = vsyncpa [#allocation6], 0 }
   0x2   :  { %13 = vsyncpa [#allocation9], 0 }
   0x3   :  { %14 = vsyncpa [#allocation4], 0  ;;  %s2868_s21 = smov [#allocation5]   ;;  %s2728_s25 = scalar_lea.hbm %s4392_s1, 4096 }
   0x4   :  { %s32_s22 = sshll.u32 %s2868_s21, 4  ;;  %p2729_p0 = scmp.ne.s32.totalorder %s4392_s1, %s2728_s25  ;;  %s33_s22 = int_to_ptr.vmem [resolvable:$true] %s32_s22 }
   0x5   :  { %p2732_p1 = scmp.lt.u32.totalorder %s2728_s25, %s4392_s1 }
   0x7   :  { %p2734_p2 = pnand %p2732_p1, %p2729_p0 }
   0x9   :  { %2737 = shalt.err (!%p2734_p2)
}
   0xa   :  { %s2738_s30 = scalar_lea.vmem %s33_s22, 4096  ;;  %p2743_p4 = scmp.lt.s32.totalorder %s33_s22, %s33_s22 }
   0xb   :  { %p2739_p3 = scmp.ne.s32.totalorder %s33_s22, %s2738_s30  ;;  %p2744_p5 = scmp.lt.s32.totalorder %s2738_s30, %s2738_s30 }
   0xd   :  { %p2745_p6 = por %p2744_p5, %p2743_p4 }
   0xf   :  { %p2746_p7 = pnand %p2745_p6, %p2739_p3 }
  0x11   :  { %2749 = shalt.err (!%p2746_p7)
}
  0x12   :  { %s2869_s7 = smov 128   ;;  %s2870_s8 = smov 8  }
  0x13   :  { %38 = dma.hbm_to_vmem [thread:$0]  %s4392_s1, 4096, %s33_s22, [#allocation6], %s2869_s7, %s2869_s7, %s2870_s8  }
  0x14   :  { %s2871_s11 = smov [#allocation8]   ;;  %s2872_s13 = smov [#allocation2]  }
  0x15   :  { %s56_s12 = sshll.u32 %s2871_s11, 4  ;;  %s20_s14 = sshll.u32 %s2872_s13, 4  ;;  %s57_s12 = int_to_ptr.vmem [resolvable:$true] %s56_s12  ;;  %s21_s14 = int_to_ptr.vmem [resolvable:$true] %s20_s14 }
  0x16   :  { %s2750_s17 = scalar_lea.hbm %s4394_s3, 2048 }
  0x17   :  { %p2751_p8 = scmp.ne.s32.totalorder %s4394_s3, %s2750_s17  ;;  %p2754_p9 = scmp.lt.u32.totalorder %s2750_s17, %s4394_s3 }
  0x19   :  { %p2756_p10 = pnand %p2754_p9, %p2751_p8 }
  0x1b   :  { %2759 = shalt.err (!%p2756_p10)
}
  0x1c   :  { %s2760_s1 = scalar_lea.vmem %s57_s12, 2048  ;;  %p2765_p12 = scmp.lt.s32.totalorder %s57_s12, %s57_s12 }
  0x1d   :  { %p2761_p11 = scmp.ne.s32.totalorder %s57_s12, %s2760_s1  ;;  %p2766_p13 = scmp.lt.s32.totalorder %s2760_s1, %s2760_s1 }
  0x1f   :  { %p2767_p0 = por %p2766_p13, %p2765_p12 }
  0x21   :  { %p2768_p1 = pnand %p2767_p0, %p2761_p11 }
  0x23   :  { %2771 = shalt.err (!%p2768_p1)
}
  0x24   :  { %62 = dma.hbm_to_vmem [thread:$0]  %s4394_s3, 2048, %s57_s12, [#allocation9], %s2869_s7, %s2869_s7, %s2870_s8  }
  0x25   :  { %s2772_s26 = scalar_lea.hbm %s4391_s0, 8192 }
  0x26   :  { %p2773_p2 = scmp.ne.s32.totalorder %s4391_s0, %s2772_s26  ;;  %p2776_p3 = scmp.lt.u32.totalorder %s2772_s26, %s4391_s0 }
  0x28   :  { %p2778_p4 = pnand %p2776_p3, %p2773_p2 }
  0x2a   :  { %2781 = shalt.err (!%p2778_p4)
}
  0x2b   :  { %s2782_s9 = scalar_lea.vmem %s21_s14, 8192  ;;  %p2787_p6 = scmp.lt.s32.totalorder %s21_s14, %s21_s14 }
  0x2c   :  { %p2783_p5 = scmp.ne.s32.totalorder %s21_s14, %s2782_s9  ;;  %p2788_p7 = scmp.lt.s32.totalorder %s2782_s9, %s2782_s9 }
  0x2e   :  { %p2789_p8 = por %p2788_p7, %p2787_p6 }
  0x30   :  { %p2790_p9 = pnand %p2789_p8, %p2783_p5 }
  0x32   :  { %2793 = shalt.err (!%p2790_p9)
}
  0x33   :  { %s2873_s3 = smov 256   ;;  %s2874_s10 = smov 16  }
  0x34   :  { %26 = dma.hbm_to_vmem [thread:$0]  %s4391_s0, 8192, %s21_s14, [#allocation3], %s2873_s3, %s2873_s3, %s2874_s10  }
  0x35   :  { %s2875_s13 = smov [#allocation7]   ;;  %s2876_s16 = smov [#allocation10]  }
  0x36   :  { %s44_s15 = sshll.u32 %s2875_s13, 4  ;;  %s68_s17 = sshll.u32 %s2876_s16, 4  ;;  %s45_s15 = int_to_ptr.vmem [resolvable:$true] %s44_s15  ;;  %s69_s17 = int_to_ptr.vmem [resolvable:$true] %s68_s17 }
  0x37   :  { %s2794_s20 = scalar_lea.hbm %s4393_s2, 2048 }
  0x38   :  { %p2795_p10 = scmp.ne.s32.totalorder %s4393_s2, %s2794_s20  ;;  %p2798_p11 = scmp.lt.u32.totalorder %s2794_s20, %s4393_s2 }
  0x3a   :  { %p2800_p12 = pnand %p2798_p11, %p2795_p10 }
  0x3c   :  { %2803 = shalt.err (!%p2800_p12)
}
  0x3d   :  { %s2804_s0 = scalar_lea.vmem %s45_s15, 2048  ;;  %p2809_p0 = scmp.lt.s32.totalorder %s45_s15, %s45_s15 }
  0x3e   :  { %p2805_p13 = scmp.ne.s32.totalorder %s45_s15, %s2804_s0  ;;  %p2810_p1 = scmp.lt.s32.totalorder %s2804_s0, %s2804_s0 }
  0x40   :  { %p2811_p2 = por %p2810_p1, %p2809_p0 }
  0x42   :  { %p2812_p3 = pnand %p2811_p2, %p2805_p13 }
  0x44   :  { %2815 = shalt.err (!%p2812_p3)
}
  0x45   :  { %50 = dma.hbm_to_vmem [thread:$0]  %s4393_s2, 2048, %s45_s15, [#allocation6], %s2869_s7, %s2869_s7, %s2870_s8  }
  0x46   :  { %s2816_s27 = scalar_lea.hbm %s4395_s4, 4096 }
  0x47   :  { %p2817_p4 = scmp.ne.s32.totalorder %s4395_s4, %s2816_s27  ;;  %p2820_p5 = scmp.lt.u32.totalorder %s2816_s27, %s4395_s4 }
  0x49   :  { %p2822_p6 = pnand %p2820_p5, %p2817_p4 }
  0x4b   :  { %2825 = shalt.err (!%p2822_p6)
}
  0x4c   :  { %s2826_s11 = scalar_lea.vmem %s69_s17, 4096  ;;  %p2831_p8 = scmp.lt.s32.totalorder %s69_s17, %s69_s17 }
  0x4d   :  { %p2827_p7 = scmp.ne.s32.totalorder %s69_s17, %s2826_s11  ;;  %p2832_p9 = scmp.lt.s32.totalorder %s2826_s11, %s2826_s11 }
  0x4f   :  { %p2833_p10 = por %p2832_p9, %p2831_p8 }
  0x51   :  { %p2834_p11 = pnand %p2833_p10, %p2827_p7 }
  0x53   :  { %2837 = shalt.err (!%p2834_p11)
}
  0x54   :  { %74 = dma.hbm_to_vmem [thread:$0]  %s4395_s4, 4096, %s69_s17, [#allocation9], %s2873_s3, %s2873_s3, %s2874_s10  }
  0x55   :  { %2860 = dma.done.wait [#allocation3], 8192  }
  0x56   :  { %2861 = vsyncadd [#allocation3], 4294959104 }
  0x57   :  { %2862 = dma.done.wait [#allocation6], 6144  }
  0x58   :  { %2863 = vsyncadd [#allocation6], 4294961152 }
  0x59   :  { %2864 = dma.done.wait [#allocation9], 6144  }
  0x5a   :  { %2865 = vsyncadd [#allocation9], 4294961152  ;;  %v2877_v0 = vmov 0.0|0.0   ;;  %v158_v1 = vld [vmem:[#allocation5] sm:$0xff]  ;;  %v159_v2 = vld [vmem:[#allocation5 + $0x8] sm:$0xff] }
  0x5b   :  { %2545 = vmatprep.subr.bf16.mxu0 %v2877_v0  ;;  %v160_v3 = vld [vmem:[#allocation5 + $0x10] sm:$0xff]  ;;  %v2546_v4 = vpack.c.bf16 %v159_v2, %v158_v1  ;;  %v161_v5 = vld [vmem:[#allocation5 + $0x18] sm:$0xff]  ;;  %v162_v7 = vld [vmem:[#allocation5 + $0x20] sm:$0xff] }
  0x5c   :  { %v2549_v6 = vpack.c.bf16 %v161_v5, %v160_v3  ;;  %v163_v8 = vld [vmem:[#allocation5 + $0x28] sm:$0xff]  ;;  %v164_v10 = vld [vmem:[#allocation5 + $0x30] sm:$0xff]  ;;  %v165_v11 = vld [vmem:[#allocation5 + $0x38] sm:$0xff] }
  0x5d   :  { %2547 = vmatpush1.bf16.msra.mxu0 %v2546_v4  ;;  %v2552_v9 = vpack.c.bf16 %v163_v8, %v162_v7  ;;  %v93_v12 = vld [vmem:[#allocation2 + $0x8] sm:$0xff]  ;;  %v2555_v13 = vpack.c.bf16 %v165_v11, %v164_v10  ;;  %v166_v14 = vld [vmem:[#allocation5 + $0x40] sm:$0xff]  ;;  %v168_v17 = vld [vmem:[#allocation5 + $0x50] sm:$0xff] }
  0x5e   :  { %2548 = vmatprep.subr.bf16.mxu0 %v2877_v0  ;;  %254 = vmatprep.mubr.f32.mxu0 %v93_v12  ;;  %v167_v15 = vld [vmem:[#allocation5 + $0x48] sm:$0xff]  ;;  %v169_v18 = vld [vmem:[#allocation5 + $0x58] sm:$0xff]  ;;  %v170_v20 = vld [vmem:[#allocation5 + $0x60] sm:$0xff] }
  0x5f   :  { %v2558_v16 = vpack.c.bf16 %v167_v15, %v166_v14  ;;  %v2561_v19 = vpack.c.bf16 %v169_v18, %v168_v17  ;;  %v171_v21 = vld [vmem:[#allocation5 + $0x68] sm:$0xff]  ;;  %v172_v23 = vld [vmem:[#allocation5 + $0x70] sm:$0xff]  ;;  %v173_v24 = vld [vmem:[#allocation5 + $0x78] sm:$0xff] }
  0x60   :  { %v2564_v22 = vpack.c.bf16 %v171_v21, %v170_v20  ;;  %v2567_v25 = vpack.c.bf16 %v173_v24, %v172_v23  ;;  %v174_v26 = vld [vmem:[#allocation5 + $0x80] sm:$0xff]  ;;  %v175_v27 = vld [vmem:[#allocation5 + $0x88] sm:$0xff]  ;;  %v176_v29 = vld [vmem:[#allocation5 + $0x90] sm:$0xff] }
  0x61   :  { %2550 = vmatpush1.bf16.msra.mxu0 %v2549_v6  ;;  %v2570_v28 = vpack.c.bf16 %v175_v27, %v174_v26  ;;  %v177_v30 = vld [vmem:[#allocation5 + $0x98] sm:$0xff]  ;;  %v178_v32 = vld [vmem:[#allocation5 + $0xa0] sm:$0xff]  ;;  %v179_v33 = vld [vmem:[#allocation5 + $0xa8] sm:$0xff] }
  0x62   :  { %2551 = vmatprep.subr.bf16.mxu0 %v2877_v0  ;;  %v2573_v31 = vpack.c.bf16 %v177_v30, %v176_v29  ;;  %v2576_v34 = vpack.c.bf16 %v179_v33, %v178_v32  ;;  %v180_v35 = vld [vmem:[#allocation5 + $0xb0] sm:$0xff]  ;;  %v181_v36 = vld [vmem:[#allocation5 + $0xb8] sm:$0xff]  ;;  %v182_v38 = vld [vmem:[#allocation5 + $0xc0] sm:$0xff] }
  0x63   :  { %v2579_v37 = vpack.c.bf16 %v181_v36, %v180_v35  ;;  %v183_v39 = vld [vmem:[#allocation5 + $0xc8] sm:$0xff]  ;;  %v184_v41 = vld [vmem:[#allocation5 + $0xd0] sm:$0xff]  ;;  %v185_v42 = vld [vmem:[#allocation5 + $0xd8] sm:$0xff] }
  0x64   :  { %v2582_v40 = vpack.c.bf16 %v183_v39, %v182_v38  ;;  %v2585_v43 = vpack.c.bf16 %v185_v42, %v184_v41  ;;  %v186_v44 = vld [vmem:[#allocation5 + $0xe0] sm:$0xff]  ;;  %v187_v45 = vld [vmem:[#allocation5 + $0xe8] sm:$0xff]  ;;  %v188_v47 = vld [vmem:[#allocation5 + $0xf0] sm:$0xff] }
  0x65   :  { %2553 = vmatpush1.bf16.msra.mxu0 %v2552_v9  ;;  %v2588_v46 = vpack.c.bf16 %v187_v45, %v186_v44  ;;  %v189_v48 = vld [vmem:[#allocation5 + $0xf8] sm:$0xff]  ;;  %v92_v50 = vld [vmem:[#allocation2] sm:$0xff]  ;;  %v94_v52 = vld [vmem:[#allocation2 + $0x10] sm:$0xff] }
  0x66   :  { %2554 = vmatprep.subr.bf16.mxu0 %v2877_v0  ;;  %v2591_v49 = vpack.c.bf16 %v189_v48, %v188_v47  ;;  %v95_v51 = vld [vmem:[#allocation2 + $0x18] sm:$0xff]  ;;  %v97_v53 = vld [vmem:[#allocation2 + $0x28] sm:$0xff]  ;;  %v96_v54 = vld [vmem:[#allocation2 + $0x20] sm:$0xff] }
  0x67   :  { %v99_v55 = vld [vmem:[#allocation2 + $0x38] sm:$0xff]  ;;  %v98_v56 = vld [vmem:[#allocation2 + $0x30] sm:$0xff]  ;;  %v101_v57 = vld [vmem:[#allocation2 + $0x48] sm:$0xff] }
  0x68   :  { %v100_v58 = vld [vmem:[#allocation2 + $0x40] sm:$0xff]  ;;  %v103_v59 = vld [vmem:[#allocation2 + $0x58] sm:$0xff]  ;;  %v102_v60 = vld [vmem:[#allocation2 + $0x50] sm:$0xff] }
  0x69   :  { %2556 = vmatpush1.bf16.msra.mxu0 %v2555_v13  ;;  %v105_v61 = vld [vmem:[#allocation2 + $0x68] sm:$0xff]  ;;  %v104_v62 = vld [vmem:[#allocation2 + $0x60] sm:$0xff]  ;;  %v107_v63 = vld [vmem:[#allocation2 + $0x78] sm:$0xff] }
  0x6a   :  { %2557 = vmatprep.subr.bf16.mxu0 %v2877_v0  ;;  %v109_v1 = vld [vmem:[#allocation2 + $0x88] sm:$0xff]  ;;  %v108_v2 = vld [vmem:[#allocation2 + $0x80] sm:$0xff]  ;;  %v111_v3 = vld [vmem:[#allocation2 + $0x98] sm:$0xff] }
  0x6b   :  { %v110_v4 = vld [vmem:[#allocation2 + $0x90] sm:$0xff]  ;;  %v113_v5 = vld [vmem:[#allocation2 + $0xa8] sm:$0xff]  ;;  %v112_v6 = vld [vmem:[#allocation2 + $0xa0] sm:$0xff] }
  0x6c   :  { %v115_v7 = vld [vmem:[#allocation2 + $0xb8] sm:$0xff]  ;;  %v114_v8 = vld [vmem:[#allocation2 + $0xb0] sm:$0xff]  ;;  %v117_v9 = vld [vmem:[#allocation2 + $0xc8] sm:$0xff] }
  0x6d   :  { %2559 = vmatpush1.bf16.msra.mxu0 %v2558_v16  ;;  %v116_v10 = vld [vmem:[#allocation2 + $0xc0] sm:$0xff]  ;;  %v119_v11 = vld [vmem:[#allocation2 + $0xd8] sm:$0xff]  ;;  %v118_v12 = vld [vmem:[#allocation2 + $0xd0] sm:$0xff] }
  0x6e   :  { %2560 = vmatprep.subr.bf16.mxu0 %v2877_v0  ;;  %v121_v13 = vld [vmem:[#allocation2 + $0xe8] sm:$0xff]  ;;  %v120_v14 = vld [vmem:[#allocation2 + $0xe0] sm:$0xff]  ;;  %v123_v15 = vld [vmem:[#allocation2 + $0xf8] sm:$0xff] }
  0x6f   :  { %v122_v16 = vld [vmem:[#allocation2 + $0xf0] sm:$0xff]  ;;  %v125_v17 = vld [vmem:[#allocation2 + $0x108] sm:$0xff]  ;;  %v124_v18 = vld [vmem:[#allocation2 + $0x100] sm:$0xff] }
  0x70   :  { %v126_v20 = vld [vmem:[#allocation2 + $0x110] sm:$0xff]  ;;  %v129_v21 = vld [vmem:[#allocation2 + $0x128] sm:$0xff]  ;;  %v131_v23 = vld [vmem:[#allocation2 + $0x138] sm:$0xff] }
  0x71   :  { %2562 = vmatpush1.bf16.msra.mxu0 %v2561_v19  ;;  %v127_v19 = vld [vmem:[#allocation2 + $0x118] sm:$0xff]  ;;  %v130_v24 = vld [vmem:[#allocation2 + $0x130] sm:$0xff]  ;;  %v132_v26 = vld [vmem:[#allocation2 + $0x140] sm:$0xff] }
  0x72   :  { %2563 = vmatprep.subr.bf16.mxu0 %v2877_v0  ;;  %v135_v27 = vld [vmem:[#allocation2 + $0x158] sm:$0xff]  ;;  %v137_v29 = vld [vmem:[#allocation2 + $0x168] sm:$0xff]  ;;  %v136_v30 = vld [vmem:[#allocation2 + $0x160] sm:$0xff] }
  0x73   :  { %v138_v32 = vld [vmem:[#allocation2 + $0x170] sm:$0xff]  ;;  %v141_v33 = vld [vmem:[#allocation2 + $0x188] sm:$0xff]  ;;  %v143_v35 = vld [vmem:[#allocation2 + $0x198] sm:$0xff] }
  0x74   :  { %v142_v36 = vld [vmem:[#allocation2 + $0x190] sm:$0xff]  ;;  %v144_v38 = vld [vmem:[#allocation2 + $0x1a0] sm:$0xff]  ;;  %v147_v39 = vld [vmem:[#allocation2 + $0x1b8] sm:$0xff] }
  0x75   :  { %2565 = vmatpush1.bf16.msra.mxu0 %v2564_v22  ;;  %v128_v22 = vld [vmem:[#allocation2 + $0x120] sm:$0xff]  ;;  %v149_v41 = vld [vmem:[#allocation2 + $0x1c8] sm:$0xff]  ;;  %v150_v44 = vld [vmem:[#allocation2 + $0x1d0] sm:$0xff] }
  0x76   :  { %2566 = vmatprep.subr.bf16.mxu0 %v2877_v0  ;;  %v148_v42 = vld [vmem:[#allocation2 + $0x1c0] sm:$0xff]  ;;  %v153_v45 = vld [vmem:[#allocation2 + $0x1e8] sm:$0xff]  ;;  %v155_v47 = vld [vmem:[#allocation2 + $0x1f8] sm:$0xff] }
  0x77   :  { %v154_v48 = vld [vmem:[#allocation2 + $0x1f0] sm:$0xff] }
  0x79   :  { %2568 = vmatpush1.bf16.msra.mxu0 %v2567_v25  ;;  %v133_v25 = vld [vmem:[#allocation2 + $0x148] sm:$0xff] }
  0x7a   :  { %2569 = vmatprep.subr.bf16.mxu0 %v2877_v0 }
  0x7d   :  { %2571 = vmatpush1.bf16.msra.mxu0 %v2570_v28  ;;  %v134_v28 = vld [vmem:[#allocation2 + $0x150] sm:$0xff] }
  0x7e   :  { %2572 = vmatprep.subr.bf16.mxu0 %v2877_v0 }
  0x81   :  { %2574 = vmatpush1.bf16.msra.mxu0 %v2573_v31  ;;  %v139_v31 = vld [vmem:[#allocation2 + $0x178] sm:$0xff] }
  0x82   :  { %2575 = vmatprep.subr.bf16.mxu0 %v2877_v0 }
  0x85   :  { %2577 = vmatpush1.bf16.msra.mxu0 %v2576_v34  ;;  %v140_v34 = vld [vmem:[#allocation2 + $0x180] sm:$0xff] }
  0x86   :  { %2578 = vmatprep.subr.bf16.mxu0 %v2877_v0 }
  0x89   :  { %2580 = vmatpush1.bf16.msra.mxu0 %v2579_v37  ;;  %v145_v37 = vld [vmem:[#allocation2 + $0x1a8] sm:$0xff] }
  0x8a   :  { %2581 = vmatprep.subr.bf16.mxu0 %v2877_v0 }
  0x8d   :  { %2583 = vmatpush1.bf16.msra.mxu0 %v2582_v40  ;;  %v146_v40 = vld [vmem:[#allocation2 + $0x1b0] sm:$0xff] }
  0x8e   :  { %2584 = vmatprep.subr.bf16.mxu0 %v2877_v0 }
  0x91   :  { %2586 = vmatpush1.bf16.msra.mxu0 %v2585_v43  ;;  %v151_v43 = vld [vmem:[#allocation2 + $0x1d8] sm:$0xff] }
  0x92   :  { %2587 = vmatprep.subr.bf16.mxu0 %v2877_v0 }
  0x95   :  { %2589 = vmatpush1.bf16.msra.mxu0 %v2588_v46  ;;  %v152_v46 = vld [vmem:[#allocation2 + $0x1e0] sm:$0xff] }
  0x96   :  { %2590 = vmatprep.subr.bf16.mxu0 %v2877_v0  ;;  %v106_v0 = vld [vmem:[#allocation2 + $0x70] sm:$0xff] }
  0x99   :  { %2592 = vmatpush1.bf16.msra.mxu0 %v2591_v49 }
  0x9c   :  { %255 = vmatmul.mubr.f32.vlgmr.msra.gmra.mrb[0].mxu0 %v92_v50 }
  0x9d   :  { %259 = vmatprep.mubr.f32.mxu0 %v95_v51 }
  0xa0   :  { %260 = vmatmul.mubr.f32.gmra.mrb[2].mxu0 %v94_v52 }
  0xa1   :  { %264 = vmatprep.mubr.f32.mxu0 %v97_v53 }
  0xa4   :  { %265 = vmatmul.mubr.f32.gmra.mrb[4].mxu0 %v96_v54 }
  0xa5   :  { %269 = vmatprep.mubr.f32.mxu0 %v99_v55 }
  0xa8   :  { %270 = vmatmul.mubr.f32.gmra.mrb[6].mxu0 %v98_v56 }
  0xa9   :  { %274 = vmatprep.mubr.f32.mxu0 %v101_v57 }
  0xac   :  { %275 = vmatmul.mubr.f32.gmra.mrb[8].mxu0 %v100_v58 }
  0xad   :  { %279 = vmatprep.mubr.f32.mxu0 %v103_v59 }
  0xb0   :  { %280 = vmatmul.mubr.f32.gmra.mrb[10].mxu0 %v102_v60 }
  0xb1   :  { %284 = vmatprep.mubr.f32.mxu0 %v105_v61 }
  0xb4   :  { %285 = vmatmul.mubr.f32.gmra.mrb[12].mxu0 %v104_v62 }
  0xb5   :  { %289 = vmatprep.mubr.f32.mxu0 %v107_v63 }
  0xb8   :  { %290 = vmatmul.mubr.f32.gmra.mrb[14].mxu0 %v106_v0 }
  0xb9   :  { %294 = vmatprep.mubr.f32.mxu0 %v109_v1 }
  0xbc   :  { %295 = vmatmul.mubr.f32.gmra.mrb[16].mxu0 %v108_v2 }
  0xbd   :  { %299 = vmatprep.mubr.f32.mxu0 %v111_v3 }
  0xc0   :  { %300 = vmatmul.mubr.f32.gmra.mrb[18].mxu0 %v110_v4 }
  0xc1   :  { %304 = vmatprep.mubr.f32.mxu0 %v113_v5 }
  0xc4   :  { %305 = vmatmul.mubr.f32.gmra.mrb[20].mxu0 %v112_v6 }
  0xc5   :  { %309 = vmatprep.mubr.f32.mxu0 %v115_v7 }
  0xc8   :  { %310 = vmatmul.mubr.f32.gmra.mrb[22].mxu0 %v114_v8 }
  0xc9   :  { %314 = vmatprep.mubr.f32.mxu0 %v117_v9  ;;  %v639_v9 = vld [vmem:[#allocation7] sm:$0xff] }
  0xcc   :  { %315 = vmatmul.mubr.f32.gmra.mrb[24].mxu0 %v116_v10  ;;  %v640_v10 = vld [vmem:[#allocation7 + $0x8] sm:$0xff] }
  0xcd   :  { %319 = vmatprep.mubr.f32.mxu0 %v119_v11 }
  0xd0   :  { %320 = vmatmul.mubr.f32.gmra.mrb[26].mxu0 %v118_v12 }
  0xd1   :  { %324 = vmatprep.mubr.f32.mxu0 %v121_v13 }
  0xd4   :  { %325 = vmatmul.mubr.f32.gmra.mrb[28].mxu0 %v120_v14  ;;  %v2593_v14 = vpack.c.bf16 %v640_v10, %v639_v9 }
  0xd5   :  { %329 = vmatprep.mubr.f32.mxu0 %v123_v15 }
  0xd6   :  { %2594 = vmatprep.subr.bf16.mxu1 %v2593_v14 }
  0xd7   :  { %2596 = vmatpush3.bf16.msra.mxu1 %v2593_v14 }
  0xd8   :  { %330 = vmatmul.mubr.f32.gmra.mrb[30].mxu0 %v122_v16 }
  0xd9   :  { %334 = vmatprep.mubr.f32.mxu0 %v125_v17  ;;  %v641_v17 = vld [vmem:[#allocation7 + $0x10] sm:$0xff] }
  0xdc   :  { %335 = vmatmul.mubr.f32.gmra.mrb[32].mxu0 %v124_v18  ;;  %v642_v18 = vld [vmem:[#allocation7 + $0x18] sm:$0xff] }
  0xdd   :  { %339 = vmatprep.mubr.f32.mxu0 %v127_v19 }
  0xe0   :  { %340 = vmatmul.mubr.f32.gmra.mrb[34].mxu0 %v126_v20 }
  0xe1   :  { %344 = vmatprep.mubr.f32.mxu0 %v129_v21 }
  0xe4   :  { %345 = vmatmul.mubr.f32.gmra.mrb[36].mxu0 %v128_v22  ;;  %v2597_v22 = vpack.c.bf16 %v642_v18, %v641_v17 }
  0xe5   :  { %349 = vmatprep.mubr.f32.mxu0 %v131_v23 }
  0xe6   :  { %2598 = vmatprep.subr.bf16.mxu1 %v2597_v22 }
  0xe7   :  { %2600 = vmatpush3.bf16.msra.mxu1 %v2597_v22 }
  0xe8   :  { %350 = vmatmul.mubr.f32.gmra.mrb[38].mxu0 %v130_v24 }
  0xe9   :  { %354 = vmatprep.mubr.f32.mxu0 %v133_v25  ;;  %v643_v25 = vld [vmem:[#allocation7 + $0x20] sm:$0xff] }
  0xec   :  { %355 = vmatmul.mubr.f32.gmra.mrb[40].mxu0 %v132_v26  ;;  %v644_v26 = vld [vmem:[#allocation7 + $0x28] sm:$0xff] }
  0xed   :  { %359 = vmatprep.mubr.f32.mxu0 %v135_v27 }
  0xf0   :  { %360 = vmatmul.mubr.f32.gmra.mrb[42].mxu0 %v134_v28 }
  0xf1   :  { %364 = vmatprep.mubr.f32.mxu0 %v137_v29 }
  0xf4   :  { %365 = vmatmul.mubr.f32.gmra.mrb[44].mxu0 %v136_v30  ;;  %v2601_v30 = vpack.c.bf16 %v644_v26, %v643_v25 }
  0xf5   :  { %369 = vmatprep.mubr.f32.mxu0 %v139_v31 }
  0xf6   :  { %2602 = vmatprep.subr.bf16.mxu1 %v2601_v30 }
  0xf7   :  { %2604 = vmatpush3.bf16.msra.mxu1 %v2601_v30 }
  0xf8   :  { %370 = vmatmul.mubr.f32.gmra.mrb[46].mxu0 %v138_v32 }
  0xf9   :  { %374 = vmatprep.mubr.f32.mxu0 %v141_v33  ;;  %v645_v33 = vld [vmem:[#allocation7 + $0x30] sm:$0xff] }
  0xfc   :  { %375 = vmatmul.mubr.f32.gmra.mrb[48].mxu0 %v140_v34  ;;  %v646_v34 = vld [vmem:[#allocation7 + $0x38] sm:$0xff] }
  0xfd   :  { %379 = vmatprep.mubr.f32.mxu0 %v143_v35 }
 0x100   :  { %380 = vmatmul.mubr.f32.gmra.mrb[50].mxu0 %v142_v36 }
 0x101   :  { %384 = vmatprep.mubr.f32.mxu0 %v145_v37 }
 0x104   :  { %385 = vmatmul.mubr.f32.gmra.mrb[52].mxu0 %v144_v38  ;;  %v2605_v38 = vpack.c.bf16 %v646_v34, %v645_v33 }
 0x105   :  { %389 = vmatprep.mubr.f32.mxu0 %v147_v39 }
 0x106   :  { %2606 = vmatprep.subr.bf16.mxu1 %v2605_v38 }
 0x107   :  { %2608 = vmatpush3.bf16.msra.mxu1 %v2605_v38 }
 0x108   :  { %390 = vmatmul.mubr.f32.gmra.mrb[54].mxu0 %v146_v40 }
 0x109   :  { %394 = vmatprep.mubr.f32.mxu0 %v149_v41  ;;  %v647_v41 = vld [vmem:[#allocation7 + $0x40] sm:$0xff] }
 0x10c   :  { %395 = vmatmul.mubr.f32.gmra.mrb[56].mxu0 %v148_v42  ;;  %v648_v42 = vld [vmem:[#allocation7 + $0x48] sm:$0xff] }
 0x10d   :  { %399 = vmatprep.mubr.f32.mxu0 %v151_v43 }
 0x110   :  { %400 = vmatmul.mubr.f32.gmra.mrb[58].mxu0 %v150_v44 }
 0x111   :  { %404 = vmatprep.mubr.f32.mxu0 %v153_v45 }
 0x114   :  { %405 = vmatmul.mubr.f32.gmra.mrb[60].mxu0 %v152_v46  ;;  %v2609_v46 = vpack.c.bf16 %v648_v42, %v647_v41 }
 0x115   :  { %409 = vmatprep.mubr.f32.mxu0 %v155_v47 }
 0x116   :  { %2610 = vmatprep.subr.bf16.mxu1 %v2609_v46 }
 0x117   :  { %2612 = vmatpush3.bf16.msra.mxu1 %v2609_v46 }
 0x118   :  { %410 = vmatmul.mubr.f32.gmra.mrb[62].mxu0 %v154_v48 }
 0x16f   :  { %v3006_v49 = vpop.f32.mrb[0].mxu0 }
 0x170   :  { %v258_v50 = vpop.f32.mrb[1].mxu0  ;;  %v454_v52 = vmul.f32 %v3006_v49, %v3006_v49 }
 0x171   :  { %v649_v50 = vld [vmem:[#allocation7 + $0x50] sm:$0xff] }
 0x173   :  { %v3008_v51 = vpop.f32.mrb[2].mxu0 }
 0x174   :  { %v415_v53 = vadd.f32 %v3008_v51, %v3006_v49  ;;  %v455_v54 = vmul.f32 %v3008_v51, %v3008_v51  ;;  %v263_v55 = vpop.f32.mrb[3].mxu0 }
 0x176   :  { %v486_v56 = vadd.f32 %v455_v54, %v454_v52  ;;  %v650_v52 = vld [vmem:[#allocation7 + $0x58] sm:$0xff] }
 0x177   :  { %v3016_v57 = vpop.f32.mrb[4].mxu0 }
 0x178   :  { %v416_v58 = vadd.f32 %v415_v53, %v3016_v57  ;;  %v456_v59 = vmul.f32 %v3016_v57, %v3016_v57  ;;  %v268_v60 = vpop.f32.mrb[5].mxu0 }
 0x179   :  { %v651_v60 = vld [vmem:[#allocation7 + $0x60] sm:$0xff] }
 0x17a   :  { %v487_v61 = vadd.f32 %v486_v56, %v456_v59  ;;  %v2613_v56 = vpack.c.bf16 %v650_v52, %v649_v50 }
 0x17b   :  { %v3021_v62 = vpop.f32.mrb[6].mxu0 }
 0x17c   :  { %v417_v63 = vadd.f32 %v416_v58, %v3021_v62  ;;  %v457_v0 = vmul.f32 %v3021_v62, %v3021_v62  ;;  %v273_v1 = vpop.f32.mrb[7].mxu0  ;;  %2614 = vmatprep.subr.bf16.mxu1 %v2613_v56 }
 0x17d   :  { %2616 = vmatpush3.bf16.msra.mxu1 %v2613_v56 }
 0x17e   :  { %v488_v2 = vadd.f32 %v487_v61, %v457_v0  ;;  %v652_v61 = vld [vmem:[#allocation7 + $0x68] sm:$0xff] }
 0x17f   :  { %v3026_v3 = vpop.f32.mrb[8].mxu0 }
 0x180   :  { %v418_v4 = vadd.f32 %v417_v63, %v3026_v3  ;;  %v458_v5 = vmul.f32 %v3026_v3, %v3026_v3  ;;  %v278_v6 = vpop.f32.mrb[9].mxu0  ;;  %v653_v63 = vld [vmem:[#allocation7 + $0x70] sm:$0xff] }
 0x182   :  { %v489_v7 = vadd.f32 %v488_v2, %v458_v5  ;;  %v654_v5 = vld [vmem:[#allocation7 + $0x78] sm:$0xff] }
 0x183   :  { %v3031_v8 = vpop.f32.mrb[10].mxu0  ;;  %v2621_v6 = vpack.c.bf16 %v654_v5, %v653_v63 }
 0x184   :  { %v419_v11 = vadd.f32 %v418_v4, %v3031_v8  ;;  %v459_v12 = vmul.f32 %v3031_v8, %v3031_v8  ;;  %v283_v13 = vpop.f32.mrb[11].mxu0  ;;  %v2617_v4 = vpack.c.bf16 %v652_v61, %v651_v60 }
 0x186   :  { %v490_v15 = vadd.f32 %v489_v7, %v459_v12  ;;  %2618 = vmatprep.subr.bf16.mxu1 %v2617_v4 }
 0x187   :  { %v3036_v16 = vpop.f32.mrb[12].mxu0  ;;  %2620 = vmatpush3.bf16.msra.mxu1 %v2617_v4 }
 0x188   :  { %v420_v19 = vadd.f32 %v419_v11, %v3036_v16  ;;  %v460_v20 = vmul.f32 %v3036_v16, %v3036_v16  ;;  %v288_v21 = vpop.f32.mrb[13].mxu0  ;;  %2622 = vmatprep.subr.bf16.mxu1 %v2621_v6 }
 0x18a   :  { %v491_v23 = vadd.f32 %v490_v15, %v460_v20 }
 0x18b   :  { %v3041_v24 = vpop.f32.mrb[14].mxu0  ;;  %2624 = vmatpush3.bf16.msra.mxu1 %v2621_v6 }
 0x18c   :  { %v421_v27 = vadd.f32 %v420_v19, %v3041_v24  ;;  %v461_v28 = vmul.f32 %v3041_v24, %v3041_v24  ;;  %v293_v29 = vpop.f32.mrb[15].mxu0 }
 0x18e   :  { %v492_v31 = vadd.f32 %v491_v23, %v461_v28 }
 0x18f   :  { %v3046_v32 = vpop.f32.mrb[16].mxu0 }
 0x190   :  { %v422_v35 = vadd.f32 %v421_v27, %v3046_v32  ;;  %v462_v36 = vmul.f32 %v3046_v32, %v3046_v32  ;;  %v298_v37 = vpop.f32.mrb[17].mxu0 }
 0x192   :  { %v493_v39 = vadd.f32 %v492_v31, %v462_v36 }
 0x193   :  { %v3051_v40 = vpop.f32.mrb[18].mxu0 }
 0x194   :  { %v423_v43 = vadd.f32 %v422_v35, %v3051_v40  ;;  %v463_v44 = vmul.f32 %v3051_v40, %v3051_v40  ;;  %v303_v45 = vpop.f32.mrb[19].mxu0 }
 0x196   :  { %v494_v47 = vadd.f32 %v493_v39, %v463_v44 }
 0x197   :  { %v3056_v48 = vpop.f32.mrb[20].mxu0 }
 0x198   :  { %v424_v53 = vadd.f32 %v423_v43, %v3056_v48  ;;  %v464_v54 = vmul.f32 %v3056_v48, %v3056_v48  ;;  %v308_v55 = vpop.f32.mrb[21].mxu0 }
 0x19a   :  { %v495_v58 = vadd.f32 %v494_v47, %v464_v54 }
 0x19b   :  { %v3061_v59 = vpop.f32.mrb[22].mxu0 }
 0x19c   :  { %v425_v0 = vadd.f32 %v424_v53, %v3061_v59  ;;  %v465_v1 = vmul.f32 %v3061_v59, %v3061_v59  ;;  %v313_v2 = vpop.f32.mrb[23].mxu0 }
 0x19e   :  { %v496_v7 = vadd.f32 %v495_v58, %v465_v1 }
 0x19f   :  { %v3066_v9 = vpop.f32.mrb[24].mxu0 }
 0x1a0   :  { %v426_v10 = vadd.f32 %v425_v0, %v3066_v9  ;;  %v466_v11 = vmul.f32 %v3066_v9, %v3066_v9  ;;  %v318_v12 = vpop.f32.mrb[25].mxu0 }
 0x1a2   :  { %v497_v13 = vadd.f32 %v496_v7, %v466_v11 }
 0x1a3   :  { %v3071_v14 = vpop.f32.mrb[26].mxu0 }
 0x1a4   :  { %v427_v15 = vadd.f32 %v426_v10, %v3071_v14  ;;  %v467_v17 = vmul.f32 %v3071_v14, %v3071_v14  ;;  %v323_v18 = vpop.f32.mrb[27].mxu0 }
 0x1a6   :  { %v498_v19 = vadd.f32 %v497_v13, %v467_v17 }
 0x1a7   :  { %v3076_v20 = vpop.f32.mrb[28].mxu0 }
 0x1a8   :  { %v428_v21 = vadd.f32 %v427_v15, %v3076_v20  ;;  %v468_v22 = vmul.f32 %v3076_v20, %v3076_v20  ;;  %v328_v23 = vpop.f32.mrb[29].mxu0 }
 0x1aa   :  { %v499_v25 = vadd.f32 %v498_v19, %v468_v22 }
 0x1ab   :  { %v3081_v26 = vpop.f32.mrb[30].mxu0 }
 0x1ac   :  { %v429_v27 = vadd.f32 %v428_v21, %v3081_v26  ;;  %v469_v28 = vmul.f32 %v3081_v26, %v3081_v26  ;;  %v333_v29 = vpop.f32.mrb[31].mxu0 }
 0x1ae   :  { %v500_v30 = vadd.f32 %v499_v25, %v469_v28 }
 0x1af   :  { %v3086_v31 = vpop.f32.mrb[32].mxu0 }
 0x1b0   :  { %v430_v33 = vadd.f32 %v429_v27, %v3086_v31  ;;  %v470_v34 = vmul.f32 %v3086_v31, %v3086_v31  ;;  %v338_v35 = vpop.f32.mrb[33].mxu0 }
 0x1b2   :  { %v501_v36 = vadd.f32 %v500_v30, %v470_v34 }
 0x1b3   :  { %v3091_v37 = vpop.f32.mrb[34].mxu0 }
 0x1b4   :  { %v431_v38 = vadd.f32 %v430_v33, %v3091_v37  ;;  %v471_v39 = vmul.f32 %v3091_v37, %v3091_v37  ;;  %v343_v41 = vpop.f32.mrb[35].mxu0 }
 0x1b6   :  { %v502_v42 = vadd.f32 %v501_v36, %v471_v39 }
 0x1b7   :  { %v3096_v43 = vpop.f32.mrb[36].mxu0 }
 0x1b8   :  { %v432_v44 = vadd.f32 %v431_v38, %v3096_v43  ;;  %v472_v45 = vmul.f32 %v3096_v43, %v3096_v43  ;;  %v348_v46 = vpop.f32.mrb[37].mxu0 }
 0x1ba   :  { %v503_v47 = vadd.f32 %v502_v42, %v472_v45 }
 0x1bb   :  { %v3101_v50 = vpop.f32.mrb[38].mxu0 }
 0x1bc   :  { %v433_v52 = vadd.f32 %v432_v44, %v3101_v50  ;;  %v473_v53 = vmul.f32 %v3101_v50, %v3101_v50  ;;  %v353_v54 = vpop.f32.mrb[39].mxu0 }
 0x1be   :  { %v504_v55 = vadd.f32 %v503_v47, %v473_v53 }
 0x1bf   :  { %v3106_v56 = vpop.f32.mrb[40].mxu0 }
 0x1c0   :  { %v434_v58 = vadd.f32 %v433_v52, %v3106_v56  ;;  %v474_v60 = vmul.f32 %v3106_v56, %v3106_v56  ;;  %v358_v61 = vpop.f32.mrb[41].mxu0 }
 0x1c2   :  { %v505_v63 = vadd.f32 %v504_v55, %v474_v60 }
 0x1c3   :  { %v3111_v0 = vpop.f32.mrb[42].mxu0 }
 0x1c4   :  { %v435_v1 = vadd.f32 %v434_v58, %v3111_v0  ;;  %v475_v2 = vmul.f32 %v3111_v0, %v3111_v0  ;;  %v363_v4 = vpop.f32.mrb[43].mxu0 }
 0x1c6   :  { %v506_v5 = vadd.f32 %v505_v63, %v475_v2 }
 0x1c7   :  { %v3116_v6 = vpop.f32.mrb[44].mxu0 }
 0x1c8   :  { %v436_v7 = vadd.f32 %v435_v1, %v3116_v6  ;;  %v476_v10 = vmul.f32 %v3116_v6, %v3116_v6  ;;  %v368_v11 = vpop.f32.mrb[45].mxu0 }
 0x1ca   :  { %v507_v12 = vadd.f32 %v506_v5, %v476_v10 }
 0x1cb   :  { %v3121_v13 = vpop.f32.mrb[46].mxu0 }
 0x1cc   :  { %v437_v15 = vadd.f32 %v436_v7, %v3121_v13  ;;  %v477_v17 = vmul.f32 %v3121_v13, %v3121_v13  ;;  %v373_v18 = vpop.f32.mrb[47].mxu0 }
 0x1ce   :  { %v508_v19 = vadd.f32 %v507_v12, %v477_v17 }
 0x1cf   :  { %v3126_v21 = vpop.f32.mrb[48].mxu0 }
 0x1d0   :  { %v438_v22 = vadd.f32 %v437_v15, %v3126_v21  ;;  %v478_v23 = vmul.f32 %v3126_v21, %v3126_v21  ;;  %v378_v25 = vpop.f32.mrb[49].mxu0 }
 0x1d2   :  { %v509_v27 = vadd.f32 %v508_v19, %v478_v23 }
 0x1d3   :  { %v3131_v28 = vpop.f32.mrb[50].mxu0 }
 0x1d4   :  { %v439_v29 = vadd.f32 %v438_v22, %v3131_v28  ;;  %v479_v30 = vmul.f32 %v3131_v28, %v3131_v28  ;;  %v383_v33 = vpop.f32.mrb[51].mxu0 }
 0x1d6   :  { %v510_v34 = vadd.f32 %v509_v27, %v479_v30 }
 0x1d7   :  { %v3136_v35 = vpop.f32.mrb[52].mxu0 }
 0x1d8   :  { %v440_v36 = vadd.f32 %v439_v29, %v3136_v35  ;;  %v480_v38 = vmul.f32 %v3136_v35, %v3136_v35  ;;  %v388_v39 = vpop.f32.mrb[53].mxu0 }
 0x1da   :  { %v511_v41 = vadd.f32 %v510_v34, %v480_v38 }
 0x1db   :  { %v3141_v42 = vpop.f32.mrb[54].mxu0 }
 0x1dc   :  { %v441_v44 = vadd.f32 %v440_v36, %v3141_v42  ;;  %v481_v45 = vmul.f32 %v3141_v42, %v3141_v42  ;;  %v393_v46 = vpop.f32.mrb[55].mxu0 }
 0x1de   :  { %v512_v47 = vadd.f32 %v511_v41, %v481_v45 }
 0x1df   :  { %v3146_v52 = vpop.f32.mrb[56].mxu0 }
 0x1e0   :  { %v442_v53 = vadd.f32 %v441_v44, %v3146_v52  ;;  %v482_v54 = vmul.f32 %v3146_v52, %v3146_v52  ;;  %v398_v55 = vpop.f32.mrb[57].mxu0 }
 0x1e1   :  { %v535_v55 = vlaneseq }
 0x1e2   :  { %v513_v58 = vadd.f32 %v512_v47, %v482_v54 }
 0x1e3   :  { %v3151_v60 = vpop.f32.mrb[58].mxu0 }
 0x1e4   :  { %v443_v61 = vadd.f32 %v442_v53, %v3151_v60  ;;  %v483_v63 = vmul.f32 %v3151_v60, %v3151_v60  ;;  %v403_v1 = vpop.f32.mrb[59].mxu0 }
 0x1e6   :  { %v514_v2 = vadd.f32 %v513_v58, %v483_v63  ;;  %v3161_v58 = vshrl.u32 %v535_v55, 7 }
 0x1e7   :  { %v3156_v4 = vpop.f32.mrb[60].mxu0 }
 0x1e8   :  { %v444_v5 = vadd.f32 %v443_v61, %v3156_v4  ;;  %v484_v7 = vmul.f32 %v3156_v4, %v3156_v4  ;;  %v408_v10 = vpop.f32.mrb[61].mxu0  ;;  %v3166_v61 = vld [vmem:[%s4396_s5] sm:$0xff]  ;;  %v537_v63 = vsub.s32 0, %v3161_v58 }
 0x1e9   :  { %v573_v10 = vsub.s32 1, %v3161_v58 }
 0x1ea   :  { %v515_v11 = vadd.f32 %v514_v2, %v484_v7 }
 0x1eb   :  { %v411_v12 = vpop.f32.mrb[62].mxu0 }
 0x1ec   :  { %v445_v15 = vadd.f32 %v444_v5, %v411_v12  ;;  %v485_v17 = vmul.f32 %v411_v12, %v411_v12  ;;  %v413_v18 = vpop.f32.mrb[63].mxu0 }
 0x1ee   :  { %v446_v19 = vrot.slane %v445_v15, 4  ;;  %v516_v22 = vadd.f32 %v515_v11, %v485_v17 }
 0x1f0   :  { %v447_v23 = vadd.f32 %v446_v19, %v445_v15  ;;  %v517_v25 = vrot.slane %v516_v22, 4 }
 0x1f2   :  { %v448_v27 = vrot.slane %v447_v23, 2  ;;  %v518_v29 = vadd.f32 %v517_v25, %v516_v22 }
 0x1f4   :  { %v449_v30 = vadd.f32 %v448_v27, %v447_v23  ;;  %v519_v33 = vrot.slane %v518_v29, 2 }
 0x1f6   :  { %v450_v34 = vrot.slane %v449_v30, 1  ;;  %v520_v36 = vadd.f32 %v519_v33, %v518_v29 }
 0x1f8   :  { %v451_v38 = vadd.f32 %v450_v34, %v449_v30  ;;  %v521_v39 = vrot.slane %v520_v36, 1 }
 0x1fa   :  { %v453_v41 = vmul.f32 0.00390625, %v451_v38  ;;  %v522_v44 = vadd.f32 %v521_v39, %v520_v36 }
 0x1fc   :  { %v523_v45 = vmul.f32 0.00390625, %v522_v44  ;;  %v524_v46 = vmul.f32 %v453_v41, %v453_v41 }
 0x1fe   :  { %v525_v47 = vsub.f32 %v523_v45, %v524_v46 }
 0x200   :  { %v526_v53 = vmax.f32 %v525_v47, 0.0 }
 0x202   :  { %v527_v54 = vadd.f32 1e-05, %v526_v53 }
 0x204   :  { %2717 = vrsqrt.f32 %v527_v54 }
 0x20e   :  { %v2718_v1 = vpop.eup %2717 }
 0x20f   :  { %v529_v2 = vmul.f32 %v2718_v1, %v3166_v61 }
 0x211   :  { %v530_v5 = vmul.f32 %v529_v2, %v453_v41  ;;  %v538_v7 = vrot.slane %v529_v2, %v537_v63 }
 0x213   :  { %v532_v11 = vrot.slane %v530_v5, 7  ;;  %v3171_v15 = vmul.f32 %v538_v7, %v411_v12  ;;  %v540_v17 = vmul.f32 %v538_v7, %v3008_v51  ;;  %v541_v18 = vmul.f32 %v538_v7, %v3016_v57 }
 0x214   :  { %v542_v19 = vmul.f32 %v538_v7, %v3021_v62  ;;  %v543_v22 = vmul.f32 %v538_v7, %v3026_v3  ;;  %v544_v23 = vmul.f32 %v538_v7, %v3031_v8  ;;  %v545_v25 = vmul.f32 %v538_v7, %v3036_v16 }
 0x215   :  { %v534_v27 = vsub.f32 %v3166_v61, %v532_v11  ;;  %v546_v29 = vmul.f32 %v538_v7, %v3041_v24  ;;  %v547_v30 = vmul.f32 %v538_v7, %v3046_v32  ;;  %v548_v12 = vmul.f32 %v538_v7, %v3051_v40 }
 0x216   :  { %v549_v51 = vmul.f32 %v538_v7, %v3056_v48  ;;  %v550_v57 = vmul.f32 %v538_v7, %v3061_v59  ;;  %v551_v62 = vmul.f32 %v538_v7, %v3066_v9  ;;  %v552_v3 = vmul.f32 %v538_v7, %v3071_v14 }
 0x217   :  { %v574_v33 = vrot.slane %v534_v27, %v573_v10  ;;  %v553_v8 = vmul.f32 %v538_v7, %v3076_v20  ;;  %v554_v16 = vmul.f32 %v538_v7, %v3081_v26  ;;  %v555_v34 = vmul.f32 %v538_v7, %v3086_v31 }
 0x218   :  { %v556_v24 = vmul.f32 %v538_v7, %v3091_v37  ;;  %v557_v32 = vmul.f32 %v538_v7, %v3096_v43  ;;  %v558_v40 = vmul.f32 %v538_v7, %v3101_v50  ;;  %v559_v48 = vmul.f32 %v538_v7, %v3106_v56 }
 0x219   :  { %v560_v59 = vmul.f32 %v538_v7, %v3111_v0  ;;  %v561_v9 = vmul.f32 %v538_v7, %v3116_v6  ;;  %v562_v14 = vmul.f32 %v538_v7, %v3121_v13  ;;  %v563_v20 = vmul.f32 %v538_v7, %v3126_v21 }
 0x21a   :  { %v564_v26 = vmul.f32 %v538_v7, %v3131_v28  ;;  %v565_v31 = vmul.f32 %v538_v7, %v3136_v35  ;;  %v566_v37 = vmul.f32 %v538_v7, %v3141_v42  ;;  %v567_v43 = vmul.f32 %v538_v7, %v3146_v52 }
 0x21b   :  { %v568_v50 = vmul.f32 %v538_v7, %v3151_v60  ;;  %v569_v56 = vmul.f32 %v538_v7, %v3156_v4  ;;  %v539_v0 = vmul.f32 %v538_v7, %v3006_v49  ;;  %v576_v36 = vadd.f32 %v574_v33, %v540_v17 }
 0x21c   :  { %v577_v6 = vadd.f32 %v574_v33, %v541_v18  ;;  %v578_v38 = vadd.f32 %v574_v33, %v542_v19  ;;  %v579_v13 = vadd.f32 %v574_v33, %v543_v22  ;;  %v580_v39 = vadd.f32 %v574_v33, %v544_v23 }
 0x21d   :  { %v575_v21 = vadd.f32 %v574_v33, %v539_v0  ;;  %v581_v41 = vadd.f32 %v574_v33, %v545_v25  ;;  %v582_v28 = vadd.f32 %v574_v33, %v546_v29  ;;  %v608_v44 = vmax.f32 %v576_v36, 0.0 }
 0x21e   :  { %v583_v45 = vadd.f32 %v574_v33, %v547_v30  ;;  %v584_v42 = vadd.f32 %v574_v33, %v548_v12  ;;  %v585_v46 = vadd.f32 %v574_v33, %v549_v51  ;;  %v586_v52 = vadd.f32 %v574_v33, %v550_v57 }
 0x21f   :  { %v607_v35 = vmax.f32 %v575_v21, 0.0  ;;  %v587_v47 = vadd.f32 %v574_v33, %v551_v62  ;;  %v609_v60 = vmax.f32 %v577_v6, 0.0  ;;  %v588_v4 = vadd.f32 %v574_v33, %v552_v3  ;;  %v1073_v21 = vld [vmem:[#allocation8 + $0x10] sm:$0xff] }
 0x220   :  { %v589_v53 = vadd.f32 %v574_v33, %v553_v8  ;;  %v590_v49 = vadd.f32 %v574_v33, %v554_v16  ;;  %v610_v54 = vmax.f32 %v578_v38, 0.0  ;;  %v591_v55 = vadd.f32 %v574_v33, %v555_v34  ;;  %v1071_v38 = vld [vmem:[#allocation8] sm:$0xff] }
 0x221   :  { %2417 = vmatprep.mubr.f32.mxu1 %v607_v35  ;;  %v592_v63 = vadd.f32 %v574_v33, %v556_v24  ;;  %v593_v1 = vadd.f32 %v574_v33, %v557_v32  ;;  %v594_v2 = vadd.f32 %v574_v33, %v558_v40  ;;  %v595_v5 = vadd.f32 %v574_v33, %v559_v48  ;;  %v1076_v35 = vld [vmem:[#allocation8 + $0x28] sm:$0xff] }
 0x222   :  { %2418 = vmatmul.mubr.f32.vlgmr.msra.gmra.mrb[0].mxu1 %v608_v44  ;;  %v611_v7 = vmax.f32 %v579_v13, 0.0  ;;  %v596_v10 = vadd.f32 %v574_v33, %v560_v59  ;;  %v597_v11 = vadd.f32 %v574_v33, %v561_v9  ;;  %v598_v17 = vadd.f32 %v574_v33, %v562_v14  ;;  %v1072_v13 = vld [vmem:[#allocation8 + $0x8] sm:$0xff]  ;;  %v1075_v44 = vld [vmem:[#allocation8 + $0x20] sm:$0xff] }
 0x223   :  { %2420 = vmatprep.mubr.f32.mxu1 %v609_v60  ;;  %v612_v18 = vmax.f32 %v580_v39, 0.0  ;;  %v599_v19 = vadd.f32 %v574_v33, %v563_v20  ;;  %v600_v22 = vadd.f32 %v574_v33, %v564_v26  ;;  %v601_v23 = vadd.f32 %v574_v33, %v565_v31  ;;  %v1080_v60 = vld [vmem:[#allocation8 + $0x48] sm:$0xff] }
 0x224   :  { %v602_v25 = vadd.f32 %v574_v33, %v566_v37  ;;  %v603_v27 = vadd.f32 %v574_v33, %v567_v43  ;;  %v613_v29 = vmax.f32 %v581_v41, 0.0  ;;  %v604_v30 = vadd.f32 %v574_v33, %v568_v50  ;;  %v1074_v41 = vld [vmem:[#allocation8 + $0x18] sm:$0xff] }
 0x225   :  { %v605_v12 = vadd.f32 %v574_v33, %v569_v56  ;;  %v606_v51 = vadd.f32 %v574_v33, %v3171_v15  ;;  %v614_v57 = vmax.f32 %v582_v28, 0.0  ;;  %v615_v62 = vmax.f32 %v583_v45, 0.0 }
 0x226   :  { %2421 = vmatmul.mubr.f32.gmra.mrb[2].mxu1 %v610_v54  ;;  %v616_v3 = vmax.f32 %v584_v42, 0.0  ;;  %v617_v8 = vmax.f32 %v585_v46, 0.0  ;;  %v618_v16 = vmax.f32 %v586_v52, 0.0  ;;  %v619_v34 = vmax.f32 %v587_v47, 0.0  ;;  %v1077_v42 = vld [vmem:[#allocation8 + $0x30] sm:$0xff]  ;;  %v1078_v46 = vld [vmem:[#allocation8 + $0x38] sm:$0xff] }
 0x227   :  { %2423 = vmatprep.mubr.f32.mxu1 %v611_v7  ;;  %v620_v24 = vmax.f32 %v588_v4, 0.0  ;;  %v621_v32 = vmax.f32 %v589_v53, 0.0  ;;  %v622_v40 = vmax.f32 %v590_v49, 0.0  ;;  %v623_v15 = vmax.f32 %v591_v55, 0.0  ;;  %v1079_v47 = vld [vmem:[#allocation8 + $0x40] sm:$0xff]  ;;  %v1081_v53 = vld [vmem:[#allocation8 + $0x50] sm:$0xff] }
 0x228   :  { %v624_v33 = vmax.f32 %v592_v63, 0.0  ;;  %v625_v48 = vmax.f32 %v593_v1, 0.0  ;;  %v626_v59 = vmax.f32 %v594_v2, 0.0  ;;  %v627_v9 = vmax.f32 %v595_v5, 0.0  ;;  %v1082_v49 = vld [vmem:[#allocation8 + $0x58] sm:$0xff]  ;;  %v1083_v55 = vld [vmem:[#allocation8 + $0x60] sm:$0xff] }
 0x229   :  { %v628_v14 = vmax.f32 %v596_v10, 0.0  ;;  %v629_v20 = vmax.f32 %v597_v11, 0.0  ;;  %v630_v26 = vmax.f32 %v598_v17, 0.0  ;;  %v631_v31 = vmax.f32 %v599_v19, 0.0  ;;  %v1084_v63 = vld [vmem:[#allocation8 + $0x68] sm:$0xff]  ;;  %v1085_v1 = vld [vmem:[#allocation8 + $0x70] sm:$0xff] }
 0x22a   :  { %2424 = vmatmul.mubr.f32.gmra.mrb[4].mxu1 %v612_v18  ;;  %v632_v37 = vmax.f32 %v600_v22, 0.0  ;;  %v633_v43 = vmax.f32 %v601_v23, 0.0  ;;  %v634_v50 = vmax.f32 %v602_v25, 0.0  ;;  %v635_v56 = vmax.f32 %v603_v27, 0.0  ;;  %v1086_v5 = vld [vmem:[#allocation8 + $0x78] sm:$0xff] }
 0x22b   :  { %2426 = vmatprep.mubr.f32.mxu1 %v613_v29  ;;  %v636_v0 = vmax.f32 %v604_v30, 0.0  ;;  %v637_v36 = vmax.f32 %v605_v12, 0.0  ;;  %v638_v6 = vmax.f32 %v606_v51, 0.0  ;;  %v2625_v39 = vpack.c.bf16 %v1072_v13, %v1071_v38 }
 0x22c   :  { %v2629_v28 = vpack.c.bf16 %v1074_v41, %v1073_v21  ;;  %v2633_v45 = vpack.c.bf16 %v1076_v35, %v1075_v44  ;;  %v2637_v52 = vpack.c.bf16 %v1078_v46, %v1077_v42  ;;  %v2641_v4 = vpack.c.bf16 %v1080_v60, %v1079_v47 }
 0x22d   :  { %2626 = vmatprep.subr.bf16.mxu1 %v2625_v39  ;;  %v2645_v54 = vpack.c.bf16 %v1082_v49, %v1081_v53  ;;  %v2649_v2 = vpack.c.bf16 %v1084_v63, %v1083_v55  ;;  %v2653_v7 = vpack.c.bf16 %v1086_v5, %v1085_v1 }
 0x22e   :  { %2427 = vmatmul.mubr.f32.gmra.mrb[6].mxu1 %v614_v57 }
 0x22f   :  { %2429 = vmatprep.mubr.f32.mxu1 %v615_v62  ;;  %2628 = vmatpush3.bf16.msra.mxu1 %v2625_v39 }
 0x230   :  { %2630 = vmatprep.subr.bf16.mxu1 %v2629_v28 }
 0x232   :  { %2430 = vmatmul.mubr.f32.gmra.mrb[8].mxu1 %v616_v3 }
 0x233   :  { %2432 = vmatprep.mubr.f32.mxu1 %v617_v8  ;;  %2632 = vmatpush3.bf16.msra.mxu1 %v2629_v28 }
 0x234   :  { %2634 = vmatprep.subr.bf16.mxu1 %v2633_v45 }
 0x236   :  { %2433 = vmatmul.mubr.f32.gmra.mrb[10].mxu1 %v618_v16 }
 0x237   :  { %2435 = vmatprep.mubr.f32.mxu1 %v619_v34  ;;  %2636 = vmatpush3.bf16.msra.mxu1 %v2633_v45 }
 0x238   :  { %2638 = vmatprep.subr.bf16.mxu1 %v2637_v52 }
 0x23a   :  { %2436 = vmatmul.mubr.f32.gmra.mrb[12].mxu1 %v620_v24 }
 0x23b   :  { %2438 = vmatprep.mubr.f32.mxu1 %v621_v32  ;;  %2640 = vmatpush3.bf16.msra.mxu1 %v2637_v52 }
 0x23c   :  { %2642 = vmatprep.subr.bf16.mxu1 %v2641_v4 }
 0x23e   :  { %2439 = vmatmul.mubr.f32.gmra.mrb[14].mxu1 %v622_v40 }
 0x23f   :  { %2441 = vmatprep.mubr.f32.mxu1 %v623_v15  ;;  %2644 = vmatpush3.bf16.msra.mxu1 %v2641_v4 }
 0x240   :  { %2646 = vmatprep.subr.bf16.mxu1 %v2645_v54 }
 0x242   :  { %2442 = vmatmul.mubr.f32.gmra.mrb[16].mxu1 %v624_v33 }
 0x243   :  { %2444 = vmatprep.mubr.f32.mxu1 %v625_v48  ;;  %2648 = vmatpush3.bf16.msra.mxu1 %v2645_v54 }
 0x244   :  { %2650 = vmatprep.subr.bf16.mxu1 %v2649_v2 }
 0x246   :  { %2445 = vmatmul.mubr.f32.gmra.mrb[18].mxu1 %v626_v59 }
 0x247   :  { %2447 = vmatprep.mubr.f32.mxu1 %v627_v9  ;;  %2652 = vmatpush3.bf16.msra.mxu1 %v2649_v2 }
 0x248   :  { %2654 = vmatprep.subr.bf16.mxu1 %v2653_v7 }
 0x24a   :  { %2448 = vmatmul.mubr.f32.gmra.mrb[20].mxu1 %v628_v14 }
 0x24b   :  { %2450 = vmatprep.mubr.f32.mxu1 %v629_v20  ;;  %2656 = vmatpush3.bf16.msra.mxu1 %v2653_v7 }
 0x24e   :  { %2451 = vmatmul.mubr.f32.gmra.mrb[22].mxu1 %v630_v26 }
 0x24f   :  { %2453 = vmatprep.mubr.f32.mxu1 %v631_v31 }
 0x252   :  { %2454 = vmatmul.mubr.f32.gmra.mrb[24].mxu1 %v632_v37 }
 0x253   :  { %2456 = vmatprep.mubr.f32.mxu1 %v633_v43 }
 0x256   :  { %2457 = vmatmul.mubr.f32.gmra.mrb[26].mxu1 %v634_v50 }
 0x257   :  { %2459 = vmatprep.mubr.f32.mxu1 %v635_v56 }
 0x25a   :  { %2460 = vmatmul.mubr.f32.gmra.mrb[28].mxu1 %v636_v0 }
 0x25b   :  { %2462 = vmatprep.mubr.f32.mxu1 %v637_v36 }
 0x25e   :  { %2463 = vmatmul.mubr.f32.gmra.mrb[30].mxu1 %v638_v6 }
 0x2f5   :  { %v3206_v10 = vpop.f32.mrb[0].mxu1 }
 0x2f6   :  { %v919_v11 = vmul.f32 %v3206_v10, %v3206_v10  ;;  %v3210_v17 = vpop.f32.mrb[1].mxu1 }
 0x2f7   :  { %v880_v18 = vadd.f32 %v3206_v10, %v3210_v17  ;;  %v918_v19 = vmul.f32 %v3210_v17, %v3210_v17 }
 0x2f9   :  { %v950_v22 = vadd.f32 %v919_v11, %v918_v19  ;;  %v3216_v23 = vpop.f32.mrb[2].mxu1 }
 0x2fa   :  { %v3218_v25 = vpop.f32.mrb[3].mxu1  ;;  %v921_v30 = vmul.f32 %v3216_v23, %v3216_v23 }
 0x2fb   :  { %v881_v27 = vadd.f32 %v880_v18, %v3218_v25  ;;  %v920_v29 = vmul.f32 %v3218_v25, %v3218_v25 }
 0x2fd   :  { %v951_v12 = vadd.f32 %v950_v22, %v920_v29  ;;  %v3225_v51 = vpop.f32.mrb[4].mxu1  ;;  %v882_v57 = vadd.f32 %v3216_v23, %v881_v27 }
 0x2fe   :  { %v3228_v62 = vpop.f32.mrb[5].mxu1  ;;  %v923_v34 = vmul.f32 %v3225_v51, %v3225_v51 }
 0x2ff   :  { %v883_v3 = vadd.f32 %v882_v57, %v3228_v62  ;;  %v922_v8 = vmul.f32 %v3228_v62, %v3228_v62  ;;  %v952_v16 = vadd.f32 %v951_v12, %v921_v30 }
 0x301   :  { %v953_v24 = vadd.f32 %v952_v16, %v922_v8  ;;  %v3235_v32 = vpop.f32.mrb[6].mxu1  ;;  %v884_v40 = vadd.f32 %v3225_v51, %v883_v3 }
 0x302   :  { %v3238_v15 = vpop.f32.mrb[7].mxu1  ;;  %v925_v9 = vmul.f32 %v3235_v32, %v3235_v32 }
 0x303   :  { %v885_v33 = vadd.f32 %v884_v40, %v3238_v15  ;;  %v924_v48 = vmul.f32 %v3238_v15, %v3238_v15  ;;  %v954_v59 = vadd.f32 %v953_v24, %v923_v34 }
 0x305   :  { %v955_v14 = vadd.f32 %v954_v59, %v924_v48  ;;  %v3245_v20 = vpop.f32.mrb[8].mxu1  ;;  %v886_v26 = vadd.f32 %v3235_v32, %v885_v33 }
 0x306   :  { %v3248_v31 = vpop.f32.mrb[9].mxu1  ;;  %v927_v56 = vmul.f32 %v3245_v20, %v3245_v20 }
 0x307   :  { %v887_v37 = vadd.f32 %v886_v26, %v3248_v31  ;;  %v926_v43 = vmul.f32 %v3248_v31, %v3248_v31  ;;  %v956_v50 = vadd.f32 %v955_v14, %v925_v9 }
 0x309   :  { %v957_v0 = vadd.f32 %v956_v50, %v926_v43  ;;  %v3255_v36 = vpop.f32.mrb[10].mxu1  ;;  %v888_v6 = vadd.f32 %v3245_v20, %v887_v37 }
 0x30a   :  { %v3258_v38 = vpop.f32.mrb[11].mxu1  ;;  %v929_v41 = vmul.f32 %v3255_v36, %v3255_v36 }
 0x30b   :  { %v889_v13 = vadd.f32 %v888_v6, %v3258_v38  ;;  %v928_v39 = vmul.f32 %v3258_v38, %v3258_v38  ;;  %v958_v21 = vadd.f32 %v957_v0, %v927_v56 }
 0x30d   :  { %v959_v28 = vadd.f32 %v958_v21, %v928_v39  ;;  %v3265_v44 = vpop.f32.mrb[12].mxu1  ;;  %v890_v35 = vadd.f32 %v3255_v36, %v889_v13  ;;  %v1536_v39 = vld [vmem:[#allocation10 + $0x8] sm:$0xff]  ;;  %v1538_v21 = vld [vmem:[#allocation10 + $0x18] sm:$0xff] }
 0x30e   :  { %v3268_v45 = vpop.f32.mrb[13].mxu1  ;;  %v931_v47 = vmul.f32 %v3265_v44, %v3265_v44 }
 0x30f   :  { %v891_v42 = vadd.f32 %v890_v35, %v3268_v45  ;;  %v930_v46 = vmul.f32 %v3268_v45, %v3268_v45  ;;  %v960_v52 = vadd.f32 %v959_v28, %v929_v41  ;;  %v1535_v41 = vld [vmem:[#allocation10] sm:$0xff] }
 0x311   :  { %v961_v60 = vadd.f32 %v960_v52, %v930_v46  ;;  %v3275_v4 = vpop.f32.mrb[14].mxu1  ;;  %v892_v53 = vadd.f32 %v3265_v44, %v891_v42  ;;  %v2657_v52 = vpack.c.bf16 %v1538_v21, %v1536_v39 }
 0x312   :  { %v3278_v49 = vpop.f32.mrb[15].mxu1  ;;  %v933_v1 = vmul.f32 %v3275_v4, %v3275_v4 }
 0x313   :  { %v893_v54 = vadd.f32 %v892_v53, %v3278_v49  ;;  %v932_v55 = vmul.f32 %v3278_v49, %v3278_v49  ;;  %v962_v63 = vadd.f32 %v961_v60, %v931_v47  ;;  %v1537_v47 = vld [vmem:[#allocation10 + $0x10] sm:$0xff]  ;;  %2658 = vmatprep.subr.bf16.mxu0 %v2657_v52  ;;  %2689 = vmatprep.subr.bf16.mxu1 %v2657_v52 }
 0x314   :  { %v3330_v53 = vpack.c.bf16 %v1537_v47, %v1535_v41 }
 0x315   :  { %v963_v2 = vadd.f32 %v962_v63, %v932_v55  ;;  %v3285_v5 = vpop.f32.mrb[16].mxu1  ;;  %v894_v7 = vadd.f32 %v3275_v4, %v893_v54 }
 0x316   :  { %v3288_v11 = vpop.f32.mrb[17].mxu1  ;;  %v935_v27 = vmul.f32 %v3285_v5, %v3285_v5  ;;  %2660 = vmatpush1.bf16.msra.mxu0 %v3330_v53 }
 0x317   :  { %v895_v18 = vadd.f32 %v894_v7, %v3288_v11  ;;  %v934_v19 = vmul.f32 %v3288_v11, %v3288_v11  ;;  %v964_v22 = vadd.f32 %v963_v2, %v933_v1 }
 0x319   :  { %v965_v29 = vadd.f32 %v964_v22, %v934_v19  ;;  %v3295_v30 = vpop.f32.mrb[18].mxu1  ;;  %v896_v12 = vadd.f32 %v3285_v5, %v895_v18 }
 0x31a   :  { %v3298_v57 = vpop.f32.mrb[19].mxu1  ;;  %v937_v34 = vmul.f32 %v3295_v30, %v3295_v30 }
 0x31b   :  { %v897_v3 = vadd.f32 %v896_v12, %v3298_v57  ;;  %v936_v8 = vmul.f32 %v3298_v57, %v3298_v57  ;;  %v966_v16 = vadd.f32 %v965_v29, %v935_v27 }
 0x31d   :  { %v967_v24 = vadd.f32 %v966_v16, %v936_v8  ;;  %v3305_v40 = vpop.f32.mrb[20].mxu1  ;;  %v898_v33 = vadd.f32 %v3295_v30, %v897_v3 }
 0x31e   :  { %v3308_v48 = vpop.f32.mrb[21].mxu1  ;;  %v939_v26 = vmul.f32 %v3305_v40, %v3305_v40 }
 0x31f   :  { %v899_v59 = vadd.f32 %v898_v33, %v3308_v48  ;;  %v938_v9 = vmul.f32 %v3308_v48, %v3308_v48  ;;  %v968_v14 = vadd.f32 %v967_v24, %v937_v34 }
 0x321   :  { %v969_v37 = vadd.f32 %v968_v14, %v938_v9  ;;  %v3315_v43 = vpop.f32.mrb[22].mxu1  ;;  %v900_v50 = vadd.f32 %v3305_v40, %v899_v59 }
 0x322   :  { %v3318_v56 = vpop.f32.mrb[23].mxu1  ;;  %v941_v28 = vmul.f32 %v3315_v43, %v3315_v43 }
 0x323   :  { %v901_v0 = vadd.f32 %v900_v50, %v3318_v56  ;;  %v940_v6 = vmul.f32 %v3318_v56, %v3318_v56  ;;  %v970_v13 = vadd.f32 %v969_v37, %v939_v26 }
 0x325   :  { %v971_v35 = vadd.f32 %v970_v13, %v940_v6  ;;  %v3325_v42 = vpop.f32.mrb[24].mxu1  ;;  %v902_v46 = vadd.f32 %v3315_v43, %v901_v0 }
 0x326   :  { %v3328_v60 = vpop.f32.mrb[25].mxu1  ;;  %v943_v1 = vmul.f32 %v3325_v42, %v3325_v42 }
 0x327   :  { %v903_v54 = vadd.f32 %v902_v46, %v3328_v60  ;;  %v942_v55 = vmul.f32 %v3328_v60, %v3328_v60  ;;  %v972_v63 = vadd.f32 %v971_v35, %v941_v28 }
 0x329   :  { %v973_v2 = vadd.f32 %v972_v63, %v942_v55  ;;  %v3338_v7 = vpop.f32.mrb[26].mxu1  ;;  %v904_v18 = vadd.f32 %v3325_v42, %v903_v54 }
 0x32a   :  { %v3341_v19 = vpop.f32.mrb[27].mxu1  ;;  %v945_v12 = vmul.f32 %v3338_v7, %v3338_v7 }
 0x32b   :  { %v905_v22 = vadd.f32 %v904_v18, %v3341_v19  ;;  %v944_v27 = vmul.f32 %v3341_v19, %v3341_v19  ;;  %v974_v29 = vadd.f32 %v973_v2, %v943_v1 }
 0x32d   :  { %v975_v3 = vadd.f32 %v974_v29, %v944_v27  ;;  %v3348_v8 = vpop.f32.mrb[28].mxu1  ;;  %v906_v16 = vadd.f32 %v3338_v7, %v905_v22 }
 0x32e   :  { %v3351_v34 = vpop.f32.mrb[29].mxu1  ;;  %v947_v9 = vmul.f32 %v3348_v8, %v3348_v8 }
 0x32f   :  { %v907_v24 = vadd.f32 %v906_v16, %v3351_v34  ;;  %v946_v33 = vmul.f32 %v3351_v34, %v3351_v34  ;;  %v976_v59 = vadd.f32 %v975_v3, %v945_v12 }
 0x331   :  { %v977_v14 = vadd.f32 %v976_v59, %v946_v33  ;;  %v3358_v26 = vpop.f32.mrb[30].mxu1  ;;  %v908_v37 = vadd.f32 %v3348_v8, %v907_v24  ;;  %v1001_v59 = vsub.s32 2, %v3161_v58 }
 0x332   :  { %v871_v50 = vpop.f32.mrb[31].mxu1  ;;  %v949_v39 = vmul.f32 %v3358_v26, %v3358_v26 }
 0x333   :  { %v909_v0 = vadd.f32 %v908_v37, %v871_v50  ;;  %v948_v6 = vmul.f32 %v871_v50, %v871_v50  ;;  %v978_v13 = vadd.f32 %v977_v14, %v947_v9 }
 0x335   :  { %v910_v21 = vadd.f32 %v3358_v26, %v909_v0  ;;  %v979_v41 = vadd.f32 %v978_v13, %v948_v6  ;;  %v1037_v6 = vsub.s32 3, %v3161_v58 }
 0x337   :  { %v911_v28 = vrot.slane %v910_v21, 4  ;;  %v980_v35 = vadd.f32 %v979_v41, %v949_v39 }
 0x339   :  { %v912_v46 = vadd.f32 %v911_v28, %v910_v21  ;;  %v981_v52 = vrot.slane %v980_v35, 4 }
 0x33b   :  { %v913_v47 = vrot.slane %v912_v46, 2  ;;  %v982_v54 = vadd.f32 %v981_v52, %v980_v35 }
 0x33d   :  { %v914_v55 = vadd.f32 %v913_v47, %v912_v46  ;;  %v983_v63 = vrot.slane %v982_v54, 2 }
 0x33f   :  { %v915_v1 = vrot.slane %v914_v55, 1  ;;  %v984_v2 = vadd.f32 %v983_v63, %v982_v54 }
 0x341   :  { %v916_v18 = vadd.f32 %v915_v1, %v914_v55  ;;  %v985_v22 = vrot.slane %v984_v2, 1 }
 0x343   :  { %v917_v27 = vmul.f32 0.00390625, %v916_v18  ;;  %v986_v29 = vadd.f32 %v985_v22, %v984_v2 }
 0x345   :  { %v987_v12 = vmul.f32 0.00390625, %v986_v29  ;;  %v988_v3 = vmul.f32 %v917_v27, %v917_v27 }
 0x347   :  { %v989_v16 = vsub.f32 %v987_v12, %v988_v3 }
 0x349   :  { %v990_v24 = vmax.f32 %v989_v16, 0.0 }
 0x34b   :  { %v991_v33 = vadd.f32 1e-05, %v990_v24 }
 0x34d   :  { %2719 = vrsqrt.f32 %v991_v33 }
 0x357   :  { %v2720_v9 = vpop.eup %2719 }
 0x358   :  { %v993_v14 = vmul.f32 %v2720_v9, %v3166_v61 }
 0x35a   :  { %v994_v37 = vmul.f32 %v993_v14, %v917_v27  ;;  %v1002_v0 = vrot.slane %v993_v14, %v1001_v59 }
 0x35c   :  { %v996_v13 = vrot.slane %v994_v37, 7  ;;  %v3367_v39 = vmul.f32 %v1002_v0, %v871_v50  ;;  %v1003_v21 = vmul.f32 %v1002_v0, %v3210_v17  ;;  %v1004_v41 = vmul.f32 %v3206_v10, %v1002_v0 }
 0x35d   :  { %v1005_v28 = vmul.f32 %v1002_v0, %v3218_v25  ;;  %v1006_v35 = vmul.f32 %v3216_v23, %v1002_v0  ;;  %v1007_v46 = vmul.f32 %v1002_v0, %v3228_v62  ;;  %v1008_v52 = vmul.f32 %v3225_v51, %v1002_v0 }
 0x35e   :  { %v998_v47 = vsub.f32 %v3166_v61, %v996_v13  ;;  %v1009_v54 = vmul.f32 %v1002_v0, %v3238_v15  ;;  %v1010_v55 = vmul.f32 %v3235_v32, %v1002_v0  ;;  %v1011_v50 = vmul.f32 %v1002_v0, %v3248_v31 }
 0x35f   :  { %v1012_v17 = vmul.f32 %v3245_v20, %v1002_v0  ;;  %v1013_v10 = vmul.f32 %v1002_v0, %v3258_v38  ;;  %v1014_v25 = vmul.f32 %v3255_v36, %v1002_v0  ;;  %v1015_v23 = vmul.f32 %v1002_v0, %v3268_v45 }
 0x360   :  { %v1038_v63 = vrot.slane %v998_v47, %v1037_v6  ;;  %v1016_v62 = vmul.f32 %v3265_v44, %v1002_v0  ;;  %v1017_v51 = vmul.f32 %v1002_v0, %v3278_v49  ;;  %v1018_v61 = vmul.f32 %v3275_v4, %v1002_v0  ;;  %v1541_v47 = vld [vmem:[#allocation10 + $0x30] sm:$0xff] }
 0x361   :  { %v1019_v15 = vmul.f32 %v1002_v0, %v3288_v11  ;;  %v1020_v32 = vmul.f32 %v3285_v5, %v1002_v0  ;;  %v1021_v31 = vmul.f32 %v1002_v0, %v3298_v57  ;;  %v1022_v20 = vmul.f32 %v3295_v30, %v1002_v0 }
 0x362   :  { %v1023_v38 = vmul.f32 %v1002_v0, %v3308_v48  ;;  %v1024_v36 = vmul.f32 %v3305_v40, %v1002_v0  ;;  %v1025_v45 = vmul.f32 %v1002_v0, %v3318_v56  ;;  %v1026_v44 = vmul.f32 %v3315_v43, %v1002_v0 }
 0x363   :  { %v1027_v49 = vmul.f32 %v1002_v0, %v3328_v60  ;;  %v1028_v4 = vmul.f32 %v3325_v42, %v1002_v0  ;;  %v1029_v11 = vmul.f32 %v1002_v0, %v3341_v19  ;;  %v1030_v5 = vmul.f32 %v3338_v7, %v1002_v0 }
 0x364   :  { %v1031_v57 = vmul.f32 %v1002_v0, %v3351_v34  ;;  %v1032_v30 = vmul.f32 %v3348_v8, %v1002_v0  ;;  %v1034_v48 = vmul.f32 %v3358_v26, %v1002_v0  ;;  %v1040_v1 = vadd.f32 %v1038_v63, %v1004_v41 }
 0x365   :  { %v1039_v40 = vadd.f32 %v1038_v63, %v1003_v21  ;;  %v1041_v2 = vadd.f32 %v1038_v63, %v1005_v28  ;;  %v1042_v56 = vadd.f32 %v1038_v63, %v1006_v35  ;;  %v1043_v18 = vadd.f32 %v1038_v63, %v1007_v46 }
 0x366   :  { %v1044_v43 = vadd.f32 %v1038_v63, %v1008_v52  ;;  %v1045_v22 = vadd.f32 %v1038_v63, %v1009_v54  ;;  %v1046_v60 = vadd.f32 %v1038_v63, %v1010_v55  ;;  %v1047_v27 = vadd.f32 %v1038_v63, %v1011_v50  ;;  %v1539_v52 = vld [vmem:[#allocation10 + $0x20] sm:$0xff]  ;;  %v1544_v55 = vld [vmem:[#allocation10 + $0x48] sm:$0xff]  ;;  %v1546_v50 = vld [vmem:[#allocation10 + $0x58] sm:$0xff] }
 0x367   :  { %2497 = vmatprep.mubr.f32.mxu1 %v1039_v40  ;;  %v1048_v42 = vadd.f32 %v1038_v63, %v1012_v17  ;;  %v1049_v19 = vadd.f32 %v1038_v63, %v1013_v10  ;;  %v1050_v29 = vadd.f32 %v1038_v63, %v1014_v25  ;;  %v1051_v7 = vadd.f32 %v1038_v63, %v1015_v23  ;;  %v1543_v10 = vld [vmem:[#allocation10 + $0x40] sm:$0xff]  ;;  %v1545_v25 = vld [vmem:[#allocation10 + $0x50] sm:$0xff] }
 0x368   :  { %2498 = vmatmul.mubr.f32.vlgmr.msra.gmra.mrb[32].mxu1 %v1040_v1  ;;  %v1052_v34 = vadd.f32 %v1038_v63, %v1016_v62  ;;  %v1053_v12 = vadd.f32 %v1038_v63, %v1017_v51  ;;  %v1054_v8 = vadd.f32 %v1038_v63, %v1018_v61  ;;  %v1055_v3 = vadd.f32 %v1038_v63, %v1019_v15  ;;  %v1550_v62 = vld [vmem:[#allocation10 + $0x78] sm:$0xff]  ;;  %v1547_v61 = vld [vmem:[#allocation10 + $0x60] sm:$0xff]  ;;  %v1549_v15 = vld [vmem:[#allocation10 + $0x70] sm:$0xff] }
 0x369   :  { %2500 = vmatprep.mubr.f32.mxu1 %v1041_v2  ;;  %v1056_v26 = vadd.f32 %v1038_v63, %v1020_v32  ;;  %v1057_v16 = vadd.f32 %v1038_v63, %v1021_v31  ;;  %v1058_v24 = vadd.f32 %v1038_v63, %v1022_v20  ;;  %v1059_v33 = vadd.f32 %v1038_v63, %v1023_v38  ;;  %v1552_v31 = vld [vmem:[#allocation10 + $0x88] sm:$0xff]  ;;  %v1554_v20 = vld [vmem:[#allocation10 + $0x98] sm:$0xff]  ;;  %v1559_v2 = vld [vmem:[#allocation10 + $0xc0] sm:$0xff] }
 0x36a   :  { %v1060_v59 = vadd.f32 %v1038_v63, %v1024_v36  ;;  %v1061_v9 = vadd.f32 %v1038_v63, %v1025_v45  ;;  %v1062_v14 = vadd.f32 %v1038_v63, %v1026_v44  ;;  %v1063_v37 = vadd.f32 %v1038_v63, %v1027_v49  ;;  %2697 = vmatpush1.bf16.msra.mxu1 %v3330_v53  ;;  %v1540_v53 = vld [vmem:[#allocation10 + $0x28] sm:$0xff]  ;;  %v1551_v36 = vld [vmem:[#allocation10 + $0x80] sm:$0xff]  ;;  %v1553_v45 = vld [vmem:[#allocation10 + $0x90] sm:$0xff] }
 0x36b   :  { %v1064_v0 = vadd.f32 %v1038_v63, %v1028_v4  ;;  %v1065_v6 = vadd.f32 %v1038_v63, %v1029_v11  ;;  %v1066_v13 = vadd.f32 %v1038_v63, %v1030_v5  ;;  %v1067_v21 = vadd.f32 %v1038_v63, %v1031_v57  ;;  %v1556_v49 = vld [vmem:[#allocation10 + $0xa8] sm:$0xff]  ;;  %v1558_v4 = vld [vmem:[#allocation10 + $0xb8] sm:$0xff]  ;;  %v1555_v5 = vld [vmem:[#allocation10 + $0xa0] sm:$0xff] }
 0x36c   :  { %2501 = vmatmul.mubr.f32.gmra.mrb[34].mxu1 %v1042_v56  ;;  %v1068_v41 = vadd.f32 %v1038_v63, %v1032_v30  ;;  %v1069_v28 = vadd.f32 %v1038_v63, %v3367_v39  ;;  %v1070_v35 = vadd.f32 %v1038_v63, %v1034_v48  ;;  %v1542_v39 = vld [vmem:[#allocation10 + $0x38] sm:$0xff]  ;;  %v2663_v54 = vpack.c.bf16 %v1541_v47, %v1539_v52  ;;  %v1548_v63 = vld [vmem:[#allocation10 + $0x68] sm:$0xff]  ;;  %v1557_v57 = vld [vmem:[#allocation10 + $0xb0] sm:$0xff] }
 0x36d   :  { %2503 = vmatprep.mubr.f32.mxu1 %v1043_v18  ;;  %v2661_v46 = vpack.c.bf16 %v1542_v39, %v1540_v53  ;;  %v2665_v17 = vpack.c.bf16 %v1546_v50, %v1544_v55  ;;  %v2667_v23 = vpack.c.bf16 %v1545_v25, %v1543_v10  ;;  %v2669_v51 = vpack.c.bf16 %v1550_v62, %v1548_v63  ;;  %v1560_v48 = vld [vmem:[#allocation10 + $0xc8] sm:$0xff]  ;;  %v1562_v1 = vld [vmem:[#allocation10 + $0xd8] sm:$0xff]  ;;  %v1561_v56 = vld [vmem:[#allocation10 + $0xd0] sm:$0xff] }
 0x36e   :  { %v2671_v32 = vpack.c.bf16 %v1549_v15, %v1547_v61  ;;  %v2673_v38 = vpack.c.bf16 %v1554_v20, %v1552_v31  ;;  %v2675_v44 = vpack.c.bf16 %v1553_v45, %v1551_v36  ;;  %v2677_v11 = vpack.c.bf16 %v1558_v4, %v1556_v49 }
 0x36f   :  { %2662 = vmatprep.subr.bf16.mxu0 %v2661_v46  ;;  %2690 = vmatprep.subr.bf16.mxu1 %v2661_v46  ;;  %v2679_v30 = vpack.c.bf16 %v1557_v57, %v1555_v5  ;;  %v2681_v40 = vpack.c.bf16 %v1562_v1, %v1560_v48  ;;  %v2683_v18 = vpack.c.bf16 %v1561_v56, %v1559_v2 }
 0x370   :  { %2504 = vmatmul.mubr.f32.gmra.mrb[36].mxu1 %v1044_v43  ;;  %2664 = vmatpush1.bf16.msra.mxu0 %v2663_v54  ;;  %v1564_v43 = vld [vmem:[#allocation10 + $0xe8] sm:$0xff] }
 0x371   :  { %2506 = vmatprep.mubr.f32.mxu1 %v1045_v22  ;;  %2698 = vmatpush1.bf16.msra.mxu1 %v2663_v54  ;;  %v1566_v22 = vld [vmem:[#allocation10 + $0xf8] sm:$0xff] }
 0x372   :  { %2666 = vmatprep.subr.bf16.mxu0 %v2665_v17  ;;  %2691 = vmatprep.subr.bf16.mxu1 %v2665_v17 }
 0x374   :  { %2507 = vmatmul.mubr.f32.gmra.mrb[38].mxu1 %v1046_v60  ;;  %2668 = vmatpush1.bf16.msra.mxu0 %v2667_v23  ;;  %v1563_v60 = vld [vmem:[#allocation10 + $0xe0] sm:$0xff] }
 0x375   :  { %2509 = vmatprep.mubr.f32.mxu1 %v1047_v27  ;;  %2699 = vmatpush1.bf16.msra.mxu1 %v2667_v23  ;;  %v2685_v27 = vpack.c.bf16 %v1566_v22, %v1564_v43 }
 0x376   :  { %2670 = vmatprep.subr.bf16.mxu0 %v2669_v51  ;;  %2692 = vmatprep.subr.bf16.mxu1 %v2669_v51 }
 0x378   :  { %2510 = vmatmul.mubr.f32.gmra.mrb[40].mxu1 %v1048_v42  ;;  %2672 = vmatpush1.bf16.msra.mxu0 %v2671_v32  ;;  %v1565_v42 = vld [vmem:[#allocation10 + $0xf0] sm:$0xff] }
 0x379   :  { %2512 = vmatprep.mubr.f32.mxu1 %v1049_v19  ;;  %2700 = vmatpush1.bf16.msra.mxu1 %v2671_v32  ;;  %v2687_v19 = vpack.c.bf16 %v1565_v42, %v1563_v60 }
 0x37a   :  { %2674 = vmatprep.subr.bf16.mxu0 %v2673_v38  ;;  %2693 = vmatprep.subr.bf16.mxu1 %v2673_v38 }
 0x37c   :  { %2513 = vmatmul.mubr.f32.gmra.mrb[42].mxu1 %v1050_v29  ;;  %2676 = vmatpush1.bf16.msra.mxu0 %v2675_v44  ;;  %v2878_v29 = vmov 0.0  }
 0x37d   :  { %2515 = vmatprep.mubr.f32.mxu1 %v1051_v7  ;;  %2701 = vmatpush1.bf16.msra.mxu1 %v2675_v44 }
 0x37e   :  { %2678 = vmatprep.subr.bf16.mxu0 %v2677_v11  ;;  %2694 = vmatprep.subr.bf16.mxu1 %v2677_v11 }
 0x37f   :  { %1631 = vmatprep.mubr.f32.mxu0 %v2878_v29 }
 0x380   :  { %2516 = vmatmul.mubr.f32.gmra.mrb[44].mxu1 %v1052_v34  ;;  %2680 = vmatpush1.bf16.msra.mxu0 %v2679_v30 }
 0x381   :  { %2518 = vmatprep.mubr.f32.mxu1 %v1053_v12  ;;  %2702 = vmatpush1.bf16.msra.mxu1 %v2679_v30 }
 0x382   :  { %2682 = vmatprep.subr.bf16.mxu0 %v2681_v40  ;;  %2695 = vmatprep.subr.bf16.mxu1 %v2681_v40 }
 0x384   :  { %2519 = vmatmul.mubr.f32.gmra.mrb[46].mxu1 %v1054_v8  ;;  %2684 = vmatpush1.bf16.msra.mxu0 %v2683_v18 }
 0x385   :  { %2521 = vmatprep.mubr.f32.mxu1 %v1055_v3  ;;  %2703 = vmatpush1.bf16.msra.mxu1 %v2683_v18 }
 0x386   :  { %2686 = vmatprep.subr.bf16.mxu0 %v2685_v27  ;;  %2696 = vmatprep.subr.bf16.mxu1 %v2685_v27 }
 0x388   :  { %2522 = vmatmul.mubr.f32.gmra.mrb[48].mxu1 %v1056_v26  ;;  %2688 = vmatpush1.bf16.msra.mxu0 %v2687_v19 }
 0x389   :  { %2524 = vmatprep.mubr.f32.mxu1 %v1057_v16  ;;  %2704 = vmatpush1.bf16.msra.mxu1 %v2687_v19 }
 0x38c   :  { %2525 = vmatmul.mubr.f32.gmra.mrb[50].mxu1 %v1058_v24 }
 0x38d   :  { %2527 = vmatprep.mubr.f32.mxu1 %v1059_v33 }
 0x390   :  { %2528 = vmatmul.mubr.f32.gmra.mrb[52].mxu1 %v1060_v59 }
 0x391   :  { %2530 = vmatprep.mubr.f32.mxu1 %v1061_v9 }
 0x394   :  { %2531 = vmatmul.mubr.f32.gmra.mrb[54].mxu1 %v1062_v14 }
 0x395   :  { %2533 = vmatprep.mubr.f32.mxu1 %v1063_v37 }
 0x398   :  { %2534 = vmatmul.mubr.f32.gmra.mrb[56].mxu1 %v1064_v0 }
 0x399   :  { %2536 = vmatprep.mubr.f32.mxu1 %v1065_v6 }
 0x39c   :  { %2537 = vmatmul.mubr.f32.gmra.mrb[58].mxu1 %v1066_v13 }
 0x39d   :  { %2539 = vmatprep.mubr.f32.mxu1 %v1067_v21 }
 0x3a0   :  { %2540 = vmatmul.mubr.f32.gmra.mrb[60].mxu1 %v1068_v41 }
 0x3a1   :  { %2542 = vmatprep.mubr.f32.mxu1 %v1069_v28 }
 0x3a4   :  { %2543 = vmatmul.mubr.f32.gmra.mrb[62].mxu1 %v1070_v35 }
 0x3a5   :  { %1703 = vmatprep.mubr.f32.mxu1 %v2878_v29 }
 0x43b   :  { %v3405_v7 = vpop.f32.mrb[32].mxu1 }
 0x43c   :  { %v1351_v34 = vmul.f32 %v3405_v7, %v3405_v7  ;;  %v3409_v12 = vpop.f32.mrb[33].mxu1 }
 0x43d   :  { %v1312_v8 = vadd.f32 %v3405_v7, %v3409_v12  ;;  %v1350_v3 = vmul.f32 %v3409_v12, %v3409_v12 }
 0x43f   :  { %v1382_v26 = vadd.f32 %v1351_v34, %v1350_v3  ;;  %v3415_v16 = vpop.f32.mrb[34].mxu1 }
 0x440   :  { %v3417_v24 = vpop.f32.mrb[35].mxu1  ;;  %v1353_v9 = vmul.f32 %v3415_v16, %v3415_v16 }
 0x441   :  { %v1313_v33 = vadd.f32 %v1312_v8, %v3417_v24  ;;  %v1352_v59 = vmul.f32 %v3417_v24, %v3417_v24 }
 0x443   :  { %v1383_v14 = vadd.f32 %v1382_v26, %v1352_v59  ;;  %v3424_v37 = vpop.f32.mrb[36].mxu1  ;;  %v1314_v0 = vadd.f32 %v3415_v16, %v1313_v33 }
 0x444   :  { %v3427_v6 = vpop.f32.mrb[37].mxu1  ;;  %v1355_v28 = vmul.f32 %v3424_v37, %v3424_v37 }
 0x445   :  { %v1315_v13 = vadd.f32 %v1314_v0, %v3427_v6  ;;  %v1354_v21 = vmul.f32 %v3427_v6, %v3427_v6  ;;  %v1384_v41 = vadd.f32 %v1383_v14, %v1353_v9 }
 0x447   :  { %v1385_v35 = vadd.f32 %v1384_v41, %v1354_v21  ;;  %v3434_v53 = vpop.f32.mrb[38].mxu1  ;;  %v1316_v39 = vadd.f32 %v3424_v37, %v1315_v13 }
 0x448   :  { %v3437_v46 = vpop.f32.mrb[39].mxu1  ;;  %v1357_v55 = vmul.f32 %v3434_v53, %v3434_v53 }
 0x449   :  { %v1317_v52 = vadd.f32 %v1316_v39, %v3437_v46  ;;  %v1356_v47 = vmul.f32 %v3437_v46, %v3437_v46  ;;  %v1386_v54 = vadd.f32 %v1385_v35, %v1355_v28 }
 0x44b   :  { %v1387_v50 = vadd.f32 %v1386_v54, %v1356_v47  ;;  %v3444_v17 = vpop.f32.mrb[40].mxu1  ;;  %v1318_v10 = vadd.f32 %v3434_v53, %v1317_v52 }
 0x44c   :  { %v3447_v25 = vpop.f32.mrb[41].mxu1  ;;  %v1359_v51 = vmul.f32 %v3444_v17, %v3444_v17 }
 0x44d   :  { %v1319_v23 = vadd.f32 %v1318_v10, %v3447_v25  ;;  %v1358_v63 = vmul.f32 %v3447_v25, %v3447_v25  ;;  %v1388_v62 = vadd.f32 %v1387_v50, %v1357_v55 }
 0x44f   :  { %v1389_v61 = vadd.f32 %v1388_v62, %v1358_v63  ;;  %v3454_v15 = vpop.f32.mrb[42].mxu1  ;;  %v1320_v32 = vadd.f32 %v3444_v17, %v1319_v23 }
 0x450   :  { %v3457_v31 = vpop.f32.mrb[43].mxu1  ;;  %v1361_v45 = vmul.f32 %v3454_v15, %v3454_v15 }
 0x451   :  { %v1321_v20 = vadd.f32 %v1320_v32, %v3457_v31  ;;  %v1360_v38 = vmul.f32 %v3457_v31, %v3457_v31  ;;  %v1390_v36 = vadd.f32 %v1389_v61, %v1359_v51 }
 0x453   :  { %v1391_v44 = vadd.f32 %v1390_v36, %v1360_v38  ;;  %v3464_v49 = vpop.f32.mrb[44].mxu1  ;;  %v1322_v4 = vadd.f32 %v3454_v15, %v1321_v20 }
 0x454   :  { %v3467_v11 = vpop.f32.mrb[45].mxu1  ;;  %v1363_v48 = vmul.f32 %v3464_v49, %v3464_v49 }
 0x455   :  { %v1323_v5 = vadd.f32 %v1322_v4, %v3467_v11  ;;  %v1362_v57 = vmul.f32 %v3467_v11, %v3467_v11  ;;  %v1392_v30 = vadd.f32 %v1391_v44, %v1361_v45 }
 0x457   :  { %v1393_v1 = vadd.f32 %v1392_v30, %v1362_v57  ;;  %v3474_v40 = vpop.f32.mrb[46].mxu1  ;;  %v1324_v2 = vadd.f32 %v3464_v49, %v1323_v5 }
 0x458   :  { %v3477_v56 = vpop.f32.mrb[47].mxu1  ;;  %v1365_v60 = vmul.f32 %v3474_v40, %v3474_v40 }
 0x459   :  { %v1325_v18 = vadd.f32 %v1324_v2, %v3477_v56  ;;  %v1364_v43 = vmul.f32 %v3477_v56, %v3477_v56  ;;  %v1394_v22 = vadd.f32 %v1393_v1, %v1363_v48 }
 0x45b   :  { %v1395_v27 = vadd.f32 %v1394_v22, %v1364_v43  ;;  %v3484_v42 = vpop.f32.mrb[48].mxu1  ;;  %v1326_v19 = vadd.f32 %v3474_v40, %v1325_v18 }
 0x45c   :  { %v3487_v34 = vpop.f32.mrb[49].mxu1  ;;  %v1367_v33 = vmul.f32 %v3484_v42, %v3484_v42 }
 0x45d   :  { %v1327_v8 = vadd.f32 %v1326_v19, %v3487_v34  ;;  %v1366_v3 = vmul.f32 %v3487_v34, %v3487_v34  ;;  %v1396_v26 = vadd.f32 %v1395_v27, %v1365_v60 }
 0x45f   :  { %v1397_v59 = vadd.f32 %v1396_v26, %v1366_v3  ;;  %v3494_v9 = vpop.f32.mrb[50].mxu1  ;;  %v1328_v14 = vadd.f32 %v3484_v42, %v1327_v8 }
 0x460   :  { %v3497_v0 = vpop.f32.mrb[51].mxu1  ;;  %v1369_v28 = vmul.f32 %v3494_v9, %v3494_v9 }
 0x461   :  { %v1329_v13 = vadd.f32 %v1328_v14, %v3497_v0  ;;  %v1368_v21 = vmul.f32 %v3497_v0, %v3497_v0  ;;  %v1398_v41 = vadd.f32 %v1397_v59, %v1367_v33 }
 0x463   :  { %v1399_v35 = vadd.f32 %v1398_v41, %v1368_v21  ;;  %v3504_v39 = vpop.f32.mrb[52].mxu1  ;;  %v1330_v52 = vadd.f32 %v3494_v9, %v1329_v13 }
 0x464   :  { %v3507_v47 = vpop.f32.mrb[53].mxu1  ;;  %v1371_v10 = vmul.f32 %v3504_v39, %v3504_v39 }
 0x465   :  { %v1331_v54 = vadd.f32 %v1330_v52, %v3507_v47  ;;  %v1370_v55 = vmul.f32 %v3507_v47, %v3507_v47  ;;  %v1400_v50 = vadd.f32 %v1399_v35, %v1369_v28 }
 0x467   :  { %v1401_v23 = vadd.f32 %v1400_v50, %v1370_v55  ;;  %v3514_v63 = vpop.f32.mrb[54].mxu1  ;;  %v1332_v62 = vadd.f32 %v3504_v39, %v1331_v54 }
 0x468   :  { %v3517_v51 = vpop.f32.mrb[55].mxu1  ;;  %v1373_v38 = vmul.f32 %v3514_v63, %v3514_v63 }
 0x469   :  { %v1333_v61 = vadd.f32 %v1332_v62, %v3517_v51  ;;  %v1372_v32 = vmul.f32 %v3517_v51, %v3517_v51  ;;  %v1402_v20 = vadd.f32 %v1401_v23, %v1371_v10 }
 0x46b   :  { %v1403_v36 = vadd.f32 %v1402_v20, %v1372_v32  ;;  %v3524_v45 = vpop.f32.mrb[56].mxu1  ;;  %v1334_v44 = vadd.f32 %v3514_v63, %v1333_v61 }
 0x46c   :  { %v3527_v4 = vpop.f32.mrb[57].mxu1  ;;  %v1375_v48 = vmul.f32 %v3524_v45, %v3524_v45 }
 0x46d   :  { %v1335_v5 = vadd.f32 %v1334_v44, %v3527_v4  ;;  %v1374_v57 = vmul.f32 %v3527_v4, %v3527_v4  ;;  %v1404_v30 = vadd.f32 %v1403_v36, %v1373_v38 }
 0x46f   :  { %v1405_v1 = vadd.f32 %v1404_v30, %v1374_v57  ;;  %v3534_v2 = vpop.f32.mrb[58].mxu1  ;;  %v1336_v18 = vadd.f32 %v3524_v45, %v1335_v5 }
 0x470   :  { %v3537_v43 = vpop.f32.mrb[59].mxu1  ;;  %v1377_v19 = vmul.f32 %v3534_v2, %v3534_v2 }
 0x471   :  { %v1337_v22 = vadd.f32 %v1336_v18, %v3537_v43  ;;  %v1376_v60 = vmul.f32 %v3537_v43, %v3537_v43  ;;  %v1406_v27 = vadd.f32 %v1405_v1, %v1375_v48 }
 0x473   :  { %v1407_v8 = vadd.f32 %v1406_v27, %v1376_v60  ;;  %v3544_v3 = vpop.f32.mrb[60].mxu1  ;;  %v1338_v26 = vadd.f32 %v3534_v2, %v1337_v22 }
 0x474   :  { %v3547_v33 = vpop.f32.mrb[61].mxu1  ;;  %v1379_v21 = vmul.f32 %v3544_v3, %v3544_v3 }
 0x475   :  { %v1339_v59 = vadd.f32 %v1338_v26, %v3547_v33  ;;  %v1378_v14 = vmul.f32 %v3547_v33, %v3547_v33  ;;  %v1408_v13 = vadd.f32 %v1407_v8, %v1377_v19 }
 0x477   :  { %v1409_v41 = vadd.f32 %v1408_v13, %v1378_v14  ;;  %v3554_v28 = vpop.f32.mrb[62].mxu1  ;;  %v1340_v35 = vadd.f32 %v3544_v3, %v1339_v59  ;;  %v1433_v14 = vsub.s32 4, %v3161_v58 }
 0x478   :  { %v1303_v52 = vpop.f32.mrb[63].mxu1  ;;  %v1381_v10 = vmul.f32 %v3554_v28, %v3554_v28 }
 0x479   :  { %v1341_v54 = vadd.f32 %v1340_v35, %v1303_v52  ;;  %v1380_v55 = vmul.f32 %v1303_v52, %v1303_v52  ;;  %v1410_v50 = vadd.f32 %v1409_v41, %v1379_v21  ;;  %v3564_v21 = vld [vmem:[%s4396_s5] sm:$0xff] }
 0x47b   :  { %v1342_v23 = vadd.f32 %v3554_v28, %v1341_v54  ;;  %v1411_v62 = vadd.f32 %v1410_v50, %v1380_v55  ;;  %v1469_v55 = vsub.s32 5, %v3161_v58 }
 0x47d   :  { %v1343_v61 = vrot.slane %v1342_v23, 4  ;;  %v1412_v32 = vadd.f32 %v1411_v62, %v1381_v10 }
 0x47f   :  { %v1344_v20 = vadd.f32 %v1343_v61, %v1342_v23  ;;  %v1413_v38 = vrot.slane %v1412_v32, 4 }
 0x481   :  { %v1345_v36 = vrot.slane %v1344_v20, 2  ;;  %v1414_v44 = vadd.f32 %v1413_v38, %v1412_v32 }
 0x483   :  { %v1346_v5 = vadd.f32 %v1345_v36, %v1344_v20  ;;  %v1415_v57 = vrot.slane %v1414_v44, 2 }
 0x485   :  { %v1347_v30 = vrot.slane %v1346_v5, 1  ;;  %v1416_v48 = vadd.f32 %v1415_v57, %v1414_v44 }
 0x487   :  { %v1348_v1 = vadd.f32 %v1347_v30, %v1346_v5  ;;  %v1417_v18 = vrot.slane %v1416_v48, 1 }
 0x489   :  { %v1349_v22 = vmul.f32 0.00390625, %v1348_v1  ;;  %v1418_v60 = vadd.f32 %v1417_v18, %v1416_v48 }
 0x48b   :  { %v1419_v27 = vmul.f32 0.00390625, %v1418_v60  ;;  %v1420_v19 = vmul.f32 %v1349_v22, %v1349_v22 }
 0x48d   :  { %v1421_v8 = vsub.f32 %v1419_v27, %v1420_v19 }
 0x48f   :  { %v1422_v26 = vmax.f32 %v1421_v8, 0.0 }
 0x491   :  { %v1423_v59 = vadd.f32 1e-05, %v1422_v26 }
 0x493   :  { %2721 = vrsqrt.f32 %v1423_v59 }
 0x49d   :  { %v2722_v13 = vpop.eup %2721 }
 0x49e   :  { %v1425_v41 = vmul.f32 %v3564_v21, %v2722_v13 }
 0x4a0   :  { %v1426_v35 = vmul.f32 %v1425_v41, %v1349_v22  ;;  %v1434_v54 = vrot.slane %v1425_v41, %v1433_v14 }
 0x4a2   :  { %v1428_v50 = vrot.slane %v1426_v35, 7  ;;  %v3568_v10 = vmul.f32 %v1434_v54, %v1303_v52  ;;  %v1435_v23 = vmul.f32 %v1434_v54, %v3409_v12  ;;  %v1436_v62 = vmul.f32 %v3405_v7, %v1434_v54 }
 0x4a3   :  { %v1437_v61 = vmul.f32 %v1434_v54, %v3417_v24  ;;  %v1438_v32 = vmul.f32 %v3415_v16, %v1434_v54  ;;  %v1439_v20 = vmul.f32 %v1434_v54, %v3427_v6  ;;  %v1440_v38 = vmul.f32 %v3424_v37, %v1434_v54 }
 0x4a4   :  { %v1430_v36 = vsub.f32 %v3564_v21, %v1428_v50  ;;  %v1441_v44 = vmul.f32 %v1434_v54, %v3437_v46  ;;  %v1442_v5 = vmul.f32 %v3434_v53, %v1434_v54  ;;  %v1443_v52 = vmul.f32 %v1434_v54, %v3447_v25 }
 0x4a5   :  { %v1444_v12 = vmul.f32 %v3444_v17, %v1434_v54  ;;  %v1445_v7 = vmul.f32 %v1434_v54, %v3457_v31  ;;  %v1446_v24 = vmul.f32 %v3454_v15, %v1434_v54  ;;  %v1447_v16 = vmul.f32 %v1434_v54, %v3467_v11 }
 0x4a6   :  { %v3584_v57 = vrot.slane %v1430_v36, %v1469_v55  ;;  %v1448_v37 = vmul.f32 %v3464_v49, %v1434_v54  ;;  %v1449_v6 = vmul.f32 %v1434_v54, %v3477_v56  ;;  %v1450_v46 = vmul.f32 %v3474_v40, %v1434_v54 }
 0x4a7   :  { %v1451_v53 = vmul.f32 %v1434_v54, %v3487_v34  ;;  %v1452_v25 = vmul.f32 %v3484_v42, %v1434_v54  ;;  %v1453_v17 = vmul.f32 %v1434_v54, %v3497_v0  ;;  %v1454_v31 = vmul.f32 %v3494_v9, %v1434_v54 }
 0x4a8   :  { %v1455_v15 = vmul.f32 %v1434_v54, %v3507_v47  ;;  %v1456_v11 = vmul.f32 %v3504_v39, %v1434_v54  ;;  %v1457_v30 = vmul.f32 %v1434_v54, %v3517_v51  ;;  %v1458_v49 = vmul.f32 %v3514_v63, %v1434_v54 }
 0x4a9   :  { %v1459_v56 = vmul.f32 %v1434_v54, %v3527_v4  ;;  %v1460_v40 = vmul.f32 %v3524_v45, %v1434_v54  ;;  %v1461_v34 = vmul.f32 %v1434_v54, %v3537_v43  ;;  %v1462_v42 = vmul.f32 %v3534_v2, %v1434_v54 }
 0x4aa   :  { %v1463_v0 = vmul.f32 %v1434_v54, %v3547_v33  ;;  %v1464_v9 = vmul.f32 %v3544_v3, %v1434_v54  ;;  %v1466_v47 = vmul.f32 %v3554_v28, %v1434_v54  ;;  %v1471_v39 = vadd.f32 %v3584_v57, %v1435_v23 }
 0x4ab   :  { %v1483_v51 = vadd.f32 %v3584_v57, %v1447_v16  ;;  %v1472_v63 = vadd.f32 %v3584_v57, %v1436_v62  ;;  %v1484_v4 = vadd.f32 %v3584_v57, %v1448_v37  ;;  %v1473_v45 = vadd.f32 %v3584_v57, %v1437_v61 }
 0x4ac   :  { %v1503_v48 = vmax.f32 %v1471_v39, 0.0  ;;  %v1485_v43 = vadd.f32 %v3584_v57, %v1449_v6  ;;  %v1474_v2 = vadd.f32 %v3584_v57, %v1438_v32  ;;  %v1486_v33 = vadd.f32 %v3584_v57, %v1450_v46 }
 0x4ad   :  { %v1515_v3 = vmax.f32 %v1483_v51, 0.0  ;;  %v1475_v28 = vadd.f32 %v3584_v57, %v1439_v20  ;;  %v1487_v1 = vadd.f32 %v3584_v57, %v1451_v53  ;;  %v1476_v18 = vadd.f32 %v3584_v57, %v1440_v38 }
 0x4ae   :  { %1632 = vmatmul.mubr.f32.vlgmr.msra.gmra.mrb[64].mxu0 %v1503_v48  ;;  %v1488_v22 = vadd.f32 %v3584_v57, %v1452_v25  ;;  %v1504_v60 = vmax.f32 %v1472_v63, 0.0  ;;  %v1477_v27 = vadd.f32 %v3584_v57, %v1441_v44  ;;  %v1489_v19 = vadd.f32 %v3584_v57, %v1453_v17 }
 0x4af   :  { %1704 = vmatmul.mubr.f32.vlgmr.msra.gmra.mrb[64].mxu1 %v1515_v3  ;;  %1637 = vmatprep.mubr.f32.mxu0 %v2878_v29  ;;  %v1478_v8 = vadd.f32 %v3584_v57, %v1442_v5  ;;  %v1516_v26 = vmax.f32 %v1484_v4, 0.0  ;;  %v1490_v59 = vadd.f32 %v3584_v57, %v1454_v31  ;;  %v1479_v14 = vadd.f32 %v3584_v57, %v1443_v52 }
 0x4b0   :  { %1709 = vmatprep.mubr.f32.mxu1 %v2878_v29  ;;  %v1491_v13 = vadd.f32 %v3584_v57, %v1455_v15  ;;  %v1480_v41 = vadd.f32 %v3584_v57, %v1444_v12  ;;  %v1492_v35 = vadd.f32 %v3584_v57, %v1456_v11  ;;  %v1505_v54 = vmax.f32 %v1473_v45, 0.0 }
 0x4b1   :  { %v1481_v55 = vadd.f32 %v3584_v57, %v1445_v7  ;;  %v1493_v50 = vadd.f32 %v3584_v57, %v1457_v30  ;;  %v3631_v23 = vadd.f32 %v3584_v57, %v1446_v24  ;;  %v1517_v62 = vmax.f32 %v1485_v43, 0.0 }
 0x4b2   :  { %1638 = vmatmul.mubr.f32.gmra.mrb[66].mxu0 %v1504_v60  ;;  %v3634_v61 = vadd.f32 %v3584_v57, %v1458_v49  ;;  %v3637_v32 = vadd.f32 %v3584_v57, %v1459_v56  ;;  %v3641_v20 = vadd.f32 %v3584_v57, %v1460_v40  ;;  %v3644_v38 = vadd.f32 %v3584_v57, %v1461_v34 }
 0x4b3   :  { %1710 = vmatmul.mubr.f32.gmra.mrb[66].mxu1 %v1516_v26  ;;  %1643 = vmatprep.mubr.f32.mxu0 %v2878_v29  ;;  %v3647_v36 = vadd.f32 %v3584_v57, %v1462_v42  ;;  %v1506_v44 = vmax.f32 %v1474_v2, 0.0  ;;  %v3651_v5 = vadd.f32 %v3584_v57, %v1463_v0  ;;  %v3654_v52 = vadd.f32 %v3584_v57, %v1464_v9 }
 0x4b4   :  { %1715 = vmatprep.mubr.f32.mxu1 %v2878_v29  ;;  %v3658_v12 = vadd.f32 %v3584_v57, %v3568_v10  ;;  %v1518_v7 = vmax.f32 %v1486_v33, 0.0  ;;  %v3661_v24 = vadd.f32 %v3584_v57, %v1466_v47  ;;  %v1507_v16 = vmax.f32 %v1475_v28, 0.0 }
 0x4b5   :  { %v1519_v37 = vmax.f32 %v1487_v1, 0.0  ;;  %v1508_v10 = vmax.f32 %v1476_v18, 0.0  ;;  %v1520_v6 = vmax.f32 %v1488_v22, 0.0  ;;  %v1509_v57 = vmax.f32 %v1477_v27, 0.0 }
 0x4b6   :  { %1644 = vmatmul.mubr.f32.gmra.mrb[68].mxu0 %v1505_v54  ;;  %v1521_v46 = vmax.f32 %v1489_v19, 0.0  ;;  %v1510_v53 = vmax.f32 %v1478_v8, 0.0  ;;  %v1522_v25 = vmax.f32 %v1490_v59, 0.0  ;;  %v1511_v17 = vmax.f32 %v1479_v14, 0.0 }
 0x4b7   :  { %1716 = vmatmul.mubr.f32.gmra.mrb[68].mxu1 %v1517_v62  ;;  %1649 = vmatprep.mubr.f32.mxu0 %v2878_v29  ;;  %v1523_v31 = vmax.f32 %v1491_v13, 0.0  ;;  %v1512_v15 = vmax.f32 %v1480_v41, 0.0  ;;  %v1524_v11 = vmax.f32 %v1492_v35, 0.0  ;;  %v1513_v30 = vmax.f32 %v1481_v55, 0.0 }
 0x4b8   :  { %1721 = vmatprep.mubr.f32.mxu1 %v2878_v29  ;;  %v1525_v49 = vmax.f32 %v1493_v50, 0.0  ;;  %v1514_v56 = vmax.f32 %v3631_v23, 0.0  ;;  %v1526_v40 = vmax.f32 %v3634_v61, 0.0  ;;  %v1527_v34 = vmax.f32 %v3637_v32, 0.0 }
 0x4b9   :  { %v1528_v42 = vmax.f32 %v3641_v20, 0.0  ;;  %v1529_v0 = vmax.f32 %v3644_v38, 0.0  ;;  %v1530_v9 = vmax.f32 %v3647_v36, 0.0  ;;  %v1531_v47 = vmax.f32 %v3651_v5, 0.0 }
 0x4ba   :  { %1650 = vmatmul.mubr.f32.gmra.mrb[70].mxu0 %v1506_v44  ;;  %v1532_v39 = vmax.f32 %v3654_v52, 0.0  ;;  %v1533_v51 = vmax.f32 %v3658_v12, 0.0  ;;  %v1534_v63 = vmax.f32 %v3661_v24, 0.0 }
 0x4bb   :  { %1722 = vmatmul.mubr.f32.gmra.mrb[70].mxu1 %v1518_v7  ;;  %1655 = vmatprep.mubr.f32.mxu0 %v2878_v29 }
 0x4bc   :  { %1727 = vmatprep.mubr.f32.mxu1 %v2878_v29 }
 0x4be   :  { %1656 = vmatmul.mubr.f32.gmra.mrb[72].mxu0 %v1507_v16 }
 0x4bf   :  { %1728 = vmatmul.mubr.f32.gmra.mrb[72].mxu1 %v1519_v37  ;;  %1661 = vmatprep.mubr.f32.mxu0 %v2878_v29 }
 0x4c0   :  { %1733 = vmatprep.mubr.f32.mxu1 %v2878_v29 }
 0x4c2   :  { %1662 = vmatmul.mubr.f32.gmra.mrb[74].mxu0 %v1508_v10 }
 0x4c3   :  { %1734 = vmatmul.mubr.f32.gmra.mrb[74].mxu1 %v1520_v6  ;;  %1667 = vmatprep.mubr.f32.mxu0 %v2878_v29 }
 0x4c4   :  { %1739 = vmatprep.mubr.f32.mxu1 %v2878_v29 }
 0x4c6   :  { %1668 = vmatmul.mubr.f32.gmra.mrb[76].mxu0 %v1509_v57 }
 0x4c7   :  { %1740 = vmatmul.mubr.f32.gmra.mrb[76].mxu1 %v1521_v46  ;;  %1673 = vmatprep.mubr.f32.mxu0 %v2878_v29 }
 0x4c8   :  { %1745 = vmatprep.mubr.f32.mxu1 %v2878_v29 }
 0x4ca   :  { %1674 = vmatmul.mubr.f32.gmra.mrb[78].mxu0 %v1510_v53 }
 0x4cb   :  { %1746 = vmatmul.mubr.f32.gmra.mrb[78].mxu1 %v1522_v25  ;;  %1679 = vmatprep.mubr.f32.mxu0 %v2878_v29 }
 0x4cc   :  { %1751 = vmatprep.mubr.f32.mxu1 %v2878_v29 }
 0x4ce   :  { %1680 = vmatmul.mubr.f32.gmra.mrb[80].mxu0 %v1511_v17 }
 0x4cf   :  { %1752 = vmatmul.mubr.f32.gmra.mrb[80].mxu1 %v1523_v31  ;;  %1685 = vmatprep.mubr.f32.mxu0 %v2878_v29 }
 0x4d0   :  { %1757 = vmatprep.mubr.f32.mxu1 %v2878_v29 }
 0x4d2   :  { %1686 = vmatmul.mubr.f32.gmra.mrb[82].mxu0 %v1512_v15 }
 0x4d3   :  { %1758 = vmatmul.mubr.f32.gmra.mrb[82].mxu1 %v1524_v11  ;;  %1691 = vmatprep.mubr.f32.mxu0 %v2878_v29 }
 0x4d4   :  { %1763 = vmatprep.mubr.f32.mxu1 %v2878_v29 }
 0x4d6   :  { %1692 = vmatmul.mubr.f32.gmra.mrb[84].mxu0 %v1513_v30 }
 0x4d7   :  { %1764 = vmatmul.mubr.f32.gmra.mrb[84].mxu1 %v1525_v49  ;;  %1697 = vmatprep.mubr.f32.mxu0 %v2878_v29 }
 0x4d8   :  { %1769 = vmatprep.mubr.f32.mxu1 %v2878_v29 }
 0x4da   :  { %1698 = vmatmul.mubr.f32.gmra.mrb[86].mxu0 %v1514_v56 }
 0x4db   :  { %1770 = vmatmul.mubr.f32.gmra.mrb[86].mxu1 %v1526_v40 }
 0x4dc   :  { %1775 = vmatprep.mubr.f32.mxu1 %v2878_v29 }
 0x4df   :  { %1776 = vmatmul.mubr.f32.gmra.mrb[88].mxu1 %v1527_v34 }
 0x4e0   :  { %1781 = vmatprep.mubr.f32.mxu1 %v2878_v29 }
 0x4e3   :  { %1782 = vmatmul.mubr.f32.gmra.mrb[90].mxu1 %v1528_v42 }
 0x4e4   :  { %1787 = vmatprep.mubr.f32.mxu1 %v2878_v29 }
 0x4e7   :  { %1788 = vmatmul.mubr.f32.gmra.mrb[92].mxu1 %v1529_v0 }
 0x4e8   :  { %1793 = vmatprep.mubr.f32.mxu1 %v2878_v29 }
 0x4eb   :  { %1794 = vmatmul.mubr.f32.gmra.mrb[94].mxu1 %v1530_v9 }
 0x4ec   :  { %1799 = vmatprep.mubr.f32.mxu1 %v2878_v29 }
 0x4ef   :  { %1800 = vmatmul.mubr.f32.gmra.mrb[96].mxu1 %v1531_v47 }
 0x4f0   :  { %1805 = vmatprep.mubr.f32.mxu1 %v2878_v29 }
 0x4f3   :  { %1806 = vmatmul.mubr.f32.gmra.mrb[98].mxu1 %v1532_v39 }
 0x4f4   :  { %1811 = vmatprep.mubr.f32.mxu1 %v2878_v29 }
 0x4f7   :  { %1812 = vmatmul.mubr.f32.gmra.mrb[100].mxu1 %v1533_v51 }
 0x4f8   :  { %1817 = vmatprep.mubr.f32.mxu1 %v2878_v29 }
 0x4fb   :  { %1818 = vmatmul.mubr.f32.gmra.mrb[102].mxu1 %v1534_v63 }
 0x581   :  { %v3697_v4 = vpop.f32.mrb[64].mxu0 }
 0x582   :  { %v3699_v45 = vpop.f32.mrb[64].mxu1  ;;  %v3701_v48 = vpop.f32.mrb[65].mxu0  ;;  %v1900_v33 = vmul.f32 %v3697_v4, %v3697_v4 }
 0x583   :  { %v3703_v43 = vpop.f32.mrb[65].mxu1  ;;  %v1901_v18 = vmul.f32 %v3701_v48, %v3701_v48 }
 0x584   :  { %4427 = vst [vmem:[#allocation16_spill] sm:$0xff] %v3703_v43 }
 0x585   :  { %v3705_v2 = vpop.f32.mrb[66].mxu0 }
 0x586   :  { %v1824_v3 = vadd.f32 %v3705_v2, %v3697_v4  ;;  %v1902_v29 = vmul.f32 %v3705_v2, %v3705_v2  ;;  %v3713_v28 = vpop.f32.mrb[66].mxu1  ;;  %v3715_v1 = vpop.f32.mrb[67].mxu0 }
 0x587   :  { %v1861_v22 = vadd.f32 %v3715_v1, %v3701_v48  ;;  %v1903_v60 = vmul.f32 %v3715_v1, %v3715_v1  ;;  %v3723_v27 = vpop.f32.mrb[67].mxu1 }
 0x588   :  { %4428 = vst [vmem:[#allocation17_spill] sm:$0xff] %v3723_v27  ;;  %v1964_v19 = vadd.f32 %v1902_v29, %v1900_v33 }
 0x589   :  { %v2001_v8 = vadd.f32 %v1903_v60, %v1901_v18  ;;  %v3725_v26 = vpop.f32.mrb[68].mxu0 }
 0x58a   :  { %v1825_v59 = vadd.f32 %v1824_v3, %v3725_v26  ;;  %v1904_v14 = vmul.f32 %v3725_v26, %v3725_v26  ;;  %v3730_v13 = vpop.f32.mrb[68].mxu1  ;;  %v3732_v41 = vpop.f32.mrb[69].mxu0 }
 0x58b   :  { %4429 = vst [vmem:[#allocation18_spill] sm:$0xff] %v3732_v41  ;;  %v1862_v35 = vadd.f32 %v1861_v22, %v3732_v41  ;;  %v1905_v54 = vmul.f32 %v3732_v41, %v3732_v41  ;;  %v3737_v55 = vpop.f32.mrb[69].mxu1 }
 0x58c   :  { %4430 = vst [vmem:[#allocation19_spill] sm:$0xff] %v3737_v55  ;;  %v1965_v50 = vadd.f32 %v1964_v19, %v1904_v14 }
 0x58d   :  { %v2002_v23 = vadd.f32 %v2001_v8, %v1905_v54  ;;  %v3739_v62 = vpop.f32.mrb[70].mxu0 }
 0x58e   :  { %v1826_v61 = vadd.f32 %v1825_v59, %v3739_v62  ;;  %v1906_v32 = vmul.f32 %v3739_v62, %v3739_v62  ;;  %v3744_v20 = vpop.f32.mrb[70].mxu1  ;;  %v3746_v38 = vpop.f32.mrb[71].mxu0 }
 0x58f   :  { %4431 = vst [vmem:[#allocation20_spill] sm:$0xff] %v3746_v38  ;;  %v1863_v36 = vadd.f32 %v1862_v35, %v3746_v38  ;;  %v1907_v44 = vmul.f32 %v3746_v38, %v3746_v38  ;;  %v3751_v5 = vpop.f32.mrb[71].mxu1 }
 0x590   :  { %4432 = vst [vmem:[#allocation21_spill] sm:$0xff] %v3751_v5  ;;  %v1966_v52 = vadd.f32 %v1965_v50, %v1906_v32 }
 0x591   :  { %v2003_v12 = vadd.f32 %v2002_v23, %v1907_v44  ;;  %v3753_v7 = vpop.f32.mrb[72].mxu0 }
 0x592   :  { %v1827_v24 = vadd.f32 %v1826_v61, %v3753_v7  ;;  %v1908_v16 = vmul.f32 %v3753_v7, %v3753_v7  ;;  %v3758_v37 = vpop.f32.mrb[72].mxu1  ;;  %v3760_v10 = vpop.f32.mrb[73].mxu0 }
 0x593   :  { %4433 = vst [vmem:[#allocation22_spill] sm:$0xff] %v3760_v10  ;;  %v1864_v6 = vadd.f32 %v1863_v36, %v3760_v10  ;;  %v1909_v57 = vmul.f32 %v3760_v10, %v3760_v10  ;;  %v3765_v46 = vpop.f32.mrb[73].mxu1 }
 0x594   :  { %4434 = vst [vmem:[#allocation23_spill] sm:$0xff] %v3765_v46  ;;  %v1967_v53 = vadd.f32 %v1966_v52, %v1908_v16 }
 0x595   :  { %v2004_v25 = vadd.f32 %v2003_v12, %v1909_v57  ;;  %v3767_v17 = vpop.f32.mrb[74].mxu0 }
 0x596   :  { %v1828_v31 = vadd.f32 %v1827_v24, %v3767_v17  ;;  %v1910_v15 = vmul.f32 %v3767_v17, %v3767_v17  ;;  %v3772_v11 = vpop.f32.mrb[74].mxu1  ;;  %v3774_v30 = vpop.f32.mrb[75].mxu0 }
 0x597   :  { %4435 = vst [vmem:[#allocation24_spill] sm:$0xff] %v3774_v30  ;;  %v1865_v49 = vadd.f32 %v1864_v6, %v3774_v30  ;;  %v1911_v56 = vmul.f32 %v3774_v30, %v3774_v30  ;;  %v3779_v40 = vpop.f32.mrb[75].mxu1 }
 0x598   :  { %4436 = vst [vmem:[#allocation25_spill] sm:$0xff] %v3779_v40  ;;  %v1968_v34 = vadd.f32 %v1967_v53, %v1910_v15 }
 0x599   :  { %v2005_v42 = vadd.f32 %v2004_v25, %v1911_v56  ;;  %v3781_v0 = vpop.f32.mrb[76].mxu0 }
 0x59a   :  { %v1829_v9 = vadd.f32 %v1828_v31, %v3781_v0  ;;  %v1912_v47 = vmul.f32 %v3781_v0, %v3781_v0  ;;  %v3786_v39 = vpop.f32.mrb[76].mxu1  ;;  %v3788_v51 = vpop.f32.mrb[77].mxu0 }
 0x59b   :  { %4437 = vst [vmem:[#allocation26_spill] sm:$0xff] %v3788_v51  ;;  %v1866_v63 = vadd.f32 %v1865_v49, %v3788_v51  ;;  %v1913_v33 = vmul.f32 %v3788_v51, %v3788_v51  ;;  %v3793_v3 = vpop.f32.mrb[77].mxu1 }
 0x59c   :  { %4438 = vst [vmem:[#allocation27_spill] sm:$0xff] %v3793_v3  ;;  %v1969_v29 = vadd.f32 %v1968_v34, %v1912_v47 }
 0x59d   :  { %v2006_v18 = vadd.f32 %v2005_v42, %v1913_v33  ;;  %v3795_v22 = vpop.f32.mrb[78].mxu0 }
 0x59e   :  { %v1830_v60 = vadd.f32 %v1829_v9, %v3795_v22  ;;  %v1914_v19 = vmul.f32 %v3795_v22, %v3795_v22  ;;  %v3800_v8 = vpop.f32.mrb[78].mxu1  ;;  %v3802_v59 = vpop.f32.mrb[79].mxu0 }
 0x59f   :  { %4439 = vst [vmem:[#allocation28_spill] sm:$0xff] %v3802_v59  ;;  %v1867_v14 = vadd.f32 %v1866_v63, %v3802_v59  ;;  %v1915_v35 = vmul.f32 %v3802_v59, %v3802_v59  ;;  %v3807_v54 = vpop.f32.mrb[79].mxu1 }
 0x5a0   :  { %4440 = vst [vmem:[#allocation29_spill] sm:$0xff] %v3807_v54  ;;  %v1970_v50 = vadd.f32 %v1969_v29, %v1914_v19 }
 0x5a1   :  { %v2007_v23 = vadd.f32 %v2006_v18, %v1915_v35  ;;  %v3809_v61 = vpop.f32.mrb[80].mxu0 }
 0x5a2   :  { %v1831_v32 = vadd.f32 %v1830_v60, %v3809_v61  ;;  %v1916_v36 = vmul.f32 %v3809_v61, %v3809_v61  ;;  %v3814_v44 = vpop.f32.mrb[80].mxu1  ;;  %v3816_v52 = vpop.f32.mrb[81].mxu0 }
 0x5a3   :  { %4441 = vst [vmem:[#allocation30_spill] sm:$0xff] %v3816_v52  ;;  %v1868_v12 = vadd.f32 %v1867_v14, %v3816_v52  ;;  %v1917_v24 = vmul.f32 %v3816_v52, %v3816_v52  ;;  %v3821_v16 = vpop.f32.mrb[81].mxu1 }
 0x5a4   :  { %4442 = vst [vmem:[#allocation31_spill] sm:$0xff] %v3821_v16  ;;  %v1971_v6 = vadd.f32 %v1970_v50, %v1916_v36 }
 0x5a5   :  { %v2008_v57 = vadd.f32 %v2007_v23, %v1917_v24  ;;  %v3823_v53 = vpop.f32.mrb[82].mxu0 }
 0x5a6   :  { %v1832_v25 = vadd.f32 %v1831_v32, %v3823_v53  ;;  %v1918_v31 = vmul.f32 %v3823_v53, %v3823_v53  ;;  %v3828_v15 = vpop.f32.mrb[82].mxu1  ;;  %v3830_v49 = vpop.f32.mrb[83].mxu0 }
 0x5a7   :  { %4443 = vst [vmem:[#allocation32_spill] sm:$0xff] %v3830_v49  ;;  %v1869_v56 = vadd.f32 %v1868_v12, %v3830_v49  ;;  %v1919_v34 = vmul.f32 %v3830_v49, %v3830_v49  ;;  %v3835_v42 = vpop.f32.mrb[83].mxu1  ;;  %v1927_v49 = vmul.f32 %v3723_v27, %v3723_v27 }
 0x5a8   :  { %4444 = vst [vmem:[#allocation33_spill] sm:$0xff] %v3835_v42  ;;  %v1972_v9 = vadd.f32 %v1971_v6, %v1918_v31 }
 0x5a9   :  { %v2009_v47 = vadd.f32 %v2008_v57, %v1919_v34  ;;  %v3837_v63 = vpop.f32.mrb[84].mxu0 }
 0x5aa   :  { %v1833_v33 = vadd.f32 %v1832_v25, %v3837_v63  ;;  %v1920_v29 = vmul.f32 %v3837_v63, %v3837_v63  ;;  %v3842_v18 = vpop.f32.mrb[84].mxu1  ;;  %v3844_v60 = vpop.f32.mrb[85].mxu0 }
 0x5ab   :  { %4445 = vst [vmem:[#allocation34_spill] sm:$0xff] %v3844_v60  ;;  %v1870_v19 = vadd.f32 %v1869_v56, %v3844_v60  ;;  %v1921_v14 = vmul.f32 %v3844_v60, %v3844_v60  ;;  %v3849_v35 = vpop.f32.mrb[85].mxu1  ;;  %v1924_v56 = vmul.f32 %v3699_v45, %v3699_v45 }
 0x5ac   :  { %4446 = vst [vmem:[#allocation35_spill] sm:$0xff] %v3849_v35  ;;  %v1973_v50 = vadd.f32 %v1972_v9, %v1920_v29 }
 0x5ad   :  { %v2010_v23 = vadd.f32 %v2009_v47, %v1921_v14  ;;  %v3851_v32 = vpop.f32.mrb[86].mxu0  ;;  %v1925_v47 = vmul.f32 %v3703_v43, %v3703_v43 }
 0x5ae   :  { %v1834_v36 = vadd.f32 %v1833_v33, %v3851_v32  ;;  %v1922_v12 = vmul.f32 %v3851_v32, %v3851_v32  ;;  %v3856_v24 = vpop.f32.mrb[86].mxu1  ;;  %v3858_v6 = vpop.f32.mrb[87].mxu0 }
 0x5af   :  { %4447 = vst [vmem:[#allocation36_spill] sm:$0xff] %v3858_v6  ;;  %v1871_v57 = vadd.f32 %v1870_v19, %v3858_v6  ;;  %v1923_v25 = vmul.f32 %v3858_v6, %v3858_v6  ;;  %v3863_v31 = vpop.f32.mrb[87].mxu1  ;;  %v1926_v19 = vmul.f32 %v3713_v28, %v3713_v28 }
 0x5b0   :  { %4448 = vst [vmem:[#allocation37_spill] sm:$0xff] %v3863_v31  ;;  %v1835_v34 = vadd.f32 %v1834_v36, %v3699_v45  ;;  %v1974_v9 = vadd.f32 %v1973_v50, %v1922_v12 }
 0x5b1   :  { %v1872_v33 = vadd.f32 %v1871_v57, %v3703_v43  ;;  %v2011_v29 = vadd.f32 %v2010_v23, %v1923_v25  ;;  %v1928_v57 = vmul.f32 %v3730_v13, %v3730_v13  ;;  %v1930_v43 = vmul.f32 %v3744_v20, %v3744_v20 }
 0x5b2   :  { %v1836_v14 = vadd.f32 %v1835_v34, %v3713_v28  ;;  %v1975_v6 = vadd.f32 %v1974_v9, %v1924_v56  ;;  %v3874_v60 = vpop.f32.mrb[88].mxu1  ;;  %v1929_v34 = vmul.f32 %v3737_v55, %v3737_v55 }
 0x5b3   :  { %v1873_v36 = vadd.f32 %v1872_v33, %v3723_v27  ;;  %v2012_v50 = vadd.f32 %v2011_v29, %v1925_v47  ;;  %v3879_v12 = vpop.f32.mrb[89].mxu1  ;;  %v1931_v27 = vmul.f32 %v3751_v5, %v3751_v5 }
 0x5b4   :  { %4449 = vst [vmem:[#allocation38_spill] sm:$0xff] %v3879_v12  ;;  %v1837_v23 = vadd.f32 %v1836_v14, %v3730_v13  ;;  %v1976_v25 = vadd.f32 %v1975_v6, %v1926_v19 }
 0x5b5   :  { %v1874_v56 = vadd.f32 %v1873_v36, %v3737_v55  ;;  %v2013_v9 = vadd.f32 %v2012_v50, %v1927_v49  ;;  %v1932_v36 = vmul.f32 %v3758_v37, %v3758_v37  ;;  %v1934_v55 = vmul.f32 %v3772_v11, %v3772_v11 }
 0x5b6   :  { %v1838_v33 = vadd.f32 %v1837_v23, %v3744_v20  ;;  %v1977_v47 = vadd.f32 %v1976_v25, %v1928_v57  ;;  %v3890_v29 = vpop.f32.mrb[90].mxu1  ;;  %v1933_v23 = vmul.f32 %v3765_v46, %v3765_v46 }
 0x5b7   :  { %v1875_v14 = vadd.f32 %v1874_v56, %v3751_v5  ;;  %v2014_v6 = vadd.f32 %v2013_v9, %v1929_v34  ;;  %v3895_v19 = vpop.f32.mrb[91].mxu1  ;;  %v1935_v9 = vmul.f32 %v3779_v40, %v3779_v40 }
 0x5b8   :  { %4450 = vst [vmem:[#allocation39_spill] sm:$0xff] %v3895_v19  ;;  %v1839_v49 = vadd.f32 %v1838_v33, %v3758_v37  ;;  %v1978_v50 = vadd.f32 %v1977_v47, %v1930_v43 }
 0x5b9   :  { %v1876_v57 = vadd.f32 %v1875_v14, %v3765_v46  ;;  %v2015_v25 = vadd.f32 %v2014_v6, %v1931_v27  ;;  %v1936_v14 = vmul.f32 %v3786_v39, %v3786_v39  ;;  %v1938_v46 = vmul.f32 %v3800_v8, %v3800_v8 }
 0x5ba   :  { %v1979_v52 = vadd.f32 %v1978_v50, %v1932_v36  ;;  %v1840_v34 = vadd.f32 %v1839_v49, %v3772_v11  ;;  %v3906_v56 = vpop.f32.mrb[92].mxu1  ;;  %v1937_v36 = vmul.f32 %v3793_v3, %v3793_v3 }
 0x5bb   :  { %v1877_v33 = vadd.f32 %v1876_v57, %v3779_v40  ;;  %v2016_v43 = vadd.f32 %v2015_v25, %v1933_v23  ;;  %v3911_v47 = vpop.f32.mrb[93].mxu1  ;;  %v1939_v40 = vmul.f32 %v3807_v54, %v3807_v54 }
 0x5bc   :  { %4451 = vst [vmem:[#allocation40_spill] sm:$0xff] %v3911_v47  ;;  %v1841_v27 = vadd.f32 %v1840_v34, %v3786_v39  ;;  %v1980_v6 = vadd.f32 %v1979_v52, %v1934_v55 }
 0x5bd   :  { %v2017_v49 = vadd.f32 %v2016_v43, %v1935_v9  ;;  %v1878_v50 = vadd.f32 %v1877_v33, %v3793_v3  ;;  %v1940_v9 = vmul.f32 %v3814_v44, %v3814_v44  ;;  %v1942_v3 = vmul.f32 %v3828_v15, %v3828_v15 }
 0x5be   :  { %v1842_v57 = vadd.f32 %v1841_v27, %v3800_v8  ;;  %v1981_v23 = vadd.f32 %v1980_v6, %v1936_v14  ;;  %v3922_v25 = vpop.f32.mrb[94].mxu1  ;;  %v1941_v27 = vmul.f32 %v3821_v16, %v3821_v16 }
 0x5bf   :  { %v1879_v34 = vadd.f32 %v1878_v50, %v3807_v54  ;;  %v2018_v55 = vadd.f32 %v2017_v49, %v1937_v36  ;;  %v3927_v52 = vpop.f32.mrb[95].mxu1  ;;  %v1943_v54 = vmul.f32 %v3835_v42, %v3835_v42 }
 0x5c0   :  { %4452 = vst [vmem:[#allocation41_spill] sm:$0xff] %v3927_v52  ;;  %v1843_v33 = vadd.f32 %v1842_v57, %v3814_v44  ;;  %v1982_v43 = vadd.f32 %v1981_v23, %v1938_v46 }
 0x5c1   :  { %v1880_v14 = vadd.f32 %v1879_v34, %v3821_v16  ;;  %v2019_v6 = vadd.f32 %v2018_v55, %v1939_v40  ;;  %v1944_v34 = vmul.f32 %v3842_v18, %v3842_v18 }
 0x5c2   :  { %v1844_v50 = vadd.f32 %v1843_v33, %v3828_v15  ;;  %v1983_v36 = vadd.f32 %v1982_v43, %v1940_v9  ;;  %v3938_v49 = vpop.f32.mrb[96].mxu1  ;;  %v1945_v33 = vmul.f32 %v3849_v35, %v3849_v35 }
 0x5c3   :  { %v1881_v57 = vadd.f32 %v1880_v14, %v3835_v42  ;;  %v2020_v46 = vadd.f32 %v2019_v6, %v1941_v27  ;;  %v3943_v23 = vpop.f32.mrb[97].mxu1  ;;  %v1946_v14 = vmul.f32 %v3856_v24, %v3856_v24 }
 0x5c4   :  { %4453 = vst [vmem:[#allocation42_spill] sm:$0xff] %v3943_v23  ;;  %v1845_v40 = vadd.f32 %v1844_v50, %v3842_v18  ;;  %v1984_v55 = vadd.f32 %v1983_v36, %v1942_v3  ;;  %v1947_v50 = vmul.f32 %v3863_v31, %v3863_v31 }
 0x5c5   :  { %v1882_v9 = vadd.f32 %v1881_v57, %v3849_v35  ;;  %v2021_v43 = vadd.f32 %v2020_v46, %v1943_v54  ;;  %v1948_v54 = vmul.f32 %v3874_v60, %v3874_v60 }
 0x5c6   :  { %v1846_v16 = vadd.f32 %v1845_v40, %v3856_v24  ;;  %v1985_v27 = vadd.f32 %v1984_v55, %v1944_v34  ;;  %v3954_v6 = vpop.f32.mrb[98].mxu1  ;;  %v1949_v34 = vmul.f32 %v3879_v12, %v3879_v12 }
 0x5c7   :  { %v1883_v42 = vadd.f32 %v1882_v9, %v3863_v31  ;;  %v2022_v3 = vadd.f32 %v2021_v43, %v1945_v33  ;;  %v3959_v36 = vpop.f32.mrb[99].mxu1  ;;  %v1950_v33 = vmul.f32 %v3890_v29, %v3890_v29 }
 0x5c8   :  { %4454 = vst [vmem:[#allocation43_spill] sm:$0xff] %v3959_v36  ;;  %v1986_v5 = vadd.f32 %v1985_v27, %v1946_v14  ;;  %v1847_v57 = vadd.f32 %v1846_v16, %v3874_v60  ;;  %v1951_v27 = vmul.f32 %v3895_v19, %v3895_v19 }
 0x5c9   :  { %v2023_v46 = vadd.f32 %v2022_v3, %v1947_v50  ;;  %v1884_v40 = vadd.f32 %v1883_v42, %v3879_v12  ;;  %v1953_v12 = vmul.f32 %v3911_v47, %v3911_v47 }
 0x5ca   :  { %v1987_v55 = vadd.f32 %v1986_v5, %v1948_v54  ;;  %v1848_v9 = vadd.f32 %v1847_v57, %v3890_v29  ;;  %v3970_v43 = vpop.f32.mrb[100].mxu1  ;;  %v1952_v5 = vmul.f32 %v3906_v56, %v3906_v56 }
 0x5cb   :  { %v2024_v14 = vadd.f32 %v2023_v46, %v1949_v34  ;;  %v1885_v16 = vadd.f32 %v1884_v40, %v3895_v19  ;;  %v3975_v50 = vpop.f32.mrb[101].mxu1  ;;  %v1954_v34 = vmul.f32 %v3922_v25, %v3922_v25 }
 0x5cc   :  { %4455 = vst [vmem:[#allocation44_spill] sm:$0xff] %v3975_v50  ;;  %v1988_v42 = vadd.f32 %v1987_v55, %v1950_v33  ;;  %v1849_v3 = vadd.f32 %v1848_v9, %v3906_v56  ;;  %v1955_v33 = vmul.f32 %v3927_v52, %v3927_v52 }
 0x5cd   :  { %v2025_v57 = vadd.f32 %v2024_v14, %v1951_v27  ;;  %v1886_v54 = vadd.f32 %v1885_v16, %v3911_v47  ;;  %v1957_v47 = vmul.f32 %v3943_v23, %v3943_v23 }
 0x5ce   :  { %v1989_v46 = vadd.f32 %v1988_v42, %v1952_v5  ;;  %v1850_v40 = vadd.f32 %v1849_v3, %v3922_v25  ;;  %v3986_v19 = vpop.f32.mrb[102].mxu1  ;;  %v1956_v42 = vmul.f32 %v3938_v49, %v3938_v49 }
 0x5cf   :  { %v2026_v55 = vadd.f32 %v2025_v57, %v1953_v12  ;;  %v1887_v9 = vadd.f32 %v1886_v54, %v3927_v52  ;;  %v3991_v14 = vpop.f32.mrb[103].mxu1  ;;  %v1958_v54 = vmul.f32 %v3954_v6, %v3954_v6 }
 0x5d0   :  { %v1990_v16 = vadd.f32 %v1989_v46, %v1954_v34  ;;  %v1851_v27 = vadd.f32 %v1850_v40, %v3938_v49  ;;  %v1959_v40 = vmul.f32 %v3959_v36, %v3959_v36 }
 0x5d1   :  { %v2027_v3 = vadd.f32 %v2026_v55, %v1955_v33  ;;  %v1888_v5 = vadd.f32 %v1887_v9, %v3943_v23  ;;  %v1960_v9 = vmul.f32 %v3970_v43, %v3970_v43 }
 0x5d2   :  { %v1991_v12 = vadd.f32 %v1990_v16, %v1956_v42  ;;  %v1852_v57 = vadd.f32 %v1851_v27, %v3954_v6  ;;  %v1961_v27 = vmul.f32 %v3975_v50, %v3975_v50 }
 0x5d3   :  { %v2028_v52 = vadd.f32 %v2027_v3, %v1957_v47  ;;  %v1889_v46 = vadd.f32 %v1888_v5, %v3959_v36  ;;  %v1962_v3 = vmul.f32 %v3986_v19, %v3986_v19 }
 0x5d4   :  { %v1992_v34 = vadd.f32 %v1991_v12, %v1958_v54  ;;  %v1853_v55 = vadd.f32 %v1852_v57, %v3970_v43  ;;  %v1963_v57 = vmul.f32 %v3991_v14, %v3991_v14 }
 0x5d5   :  { %v2029_v33 = vadd.f32 %v2028_v52, %v1959_v40  ;;  %v1890_v16 = vadd.f32 %v1889_v46, %v3975_v50 }
 0x5d6   :  { %v1993_v42 = vadd.f32 %v1992_v34, %v1960_v9  ;;  %v1854_v47 = vadd.f32 %v1853_v55, %v3986_v19 }
 0x5d7   :  { %v2030_v5 = vadd.f32 %v2029_v33, %v1961_v27  ;;  %v1891_v12 = vadd.f32 %v1890_v16, %v3991_v14 }
 0x5d8   :  { %v1855_v54 = vrot.slane %v1854_v47, 4  ;;  %v1994_v36 = vadd.f32 %v1993_v42, %v1962_v3 }
 0x5d9   :  { %v1892_v52 = vrot.slane %v1891_v12, 4  ;;  %v2031_v40 = vadd.f32 %v2030_v5, %v1963_v57 }
 0x5da   :  { %v1856_v46 = vadd.f32 %v1855_v54, %v1854_v47  ;;  %v1995_v23 = vrot.slane %v1994_v36, 4 }
 0x5db   :  { %v1893_v31 = vadd.f32 %v1892_v52, %v1891_v12  ;;  %v2032_v50 = vrot.slane %v2031_v40, 4 }
 0x5dc   :  { %v1857_v34 = vrot.slane %v1856_v46, 2  ;;  %v1996_v9 = vadd.f32 %v1995_v23, %v1994_v36 }
 0x5dd   :  { %v1894_v55 = vrot.slane %v1893_v31, 2  ;;  %v2033_v35 = vadd.f32 %v2032_v50, %v2031_v40 }
 0x5de   :  { %v1858_v59 = vadd.f32 %v1857_v34, %v1856_v46  ;;  %v1997_v51 = vrot.slane %v1996_v9, 2 }
 0x5df   :  { %v1895_v33 = vadd.f32 %v1894_v55, %v1893_v31  ;;  %v2034_v27 = vrot.slane %v2033_v35, 2 }
 0x5e0   :  { %v1859_v16 = vrot.slane %v1858_v59, 1  ;;  %v1998_v30 = vadd.f32 %v1997_v51, %v1996_v9 }
 0x5e1   :  { %v1896_v10 = vrot.slane %v1895_v33, 1  ;;  %v2035_v38 = vadd.f32 %v2034_v27, %v2033_v35  ;;  %v2136_v27 = vsub.s32 7, %v3161_v58 }
 0x5e2   :  { %v1860_v41 = vadd.f32 %v1859_v16, %v1858_v59  ;;  %v1999_v42 = vrot.slane %v1998_v30, 1  ;;  %v2064_v59 = vsub.s32 6, %v3161_v58 }
 0x5e3   :  { %v1897_v3 = vadd.f32 %v1896_v10, %v1895_v33  ;;  %v2036_v5 = vrot.slane %v2035_v38, 1 }
 0x5e4   :  { %v1898_v47 = vmul.f32 0.00390625, %v1860_v41  ;;  %v2000_v57 = vadd.f32 %v1999_v42, %v1998_v30  ;;  %v157_v41 = vld [vmem:[%s4396_s5 + $0x8] sm:$0xff]  ;;  %s2879_s5 = smov [#allocation11]  }
 0x5e5   :  { %v1899_v12 = vmul.f32 0.00390625, %v1897_v3  ;;  %v2037_v54 = vadd.f32 %v2036_v5, %v2035_v38  ;;  %s2275_s17 = sshll.u32 %s2879_s5, 4  ;;  %s2276_s17 = int_to_ptr.vmem [resolvable:$true] %s2275_s17 }
 0x5e6   :  { %v2038_v52 = vmul.f32 0.00390625, %v2000_v57  ;;  %v2040_v23 = vmul.f32 %v1898_v47, %v1898_v47  ;;  %s2838_s18 = scalar_lea.vmem %s2276_s17, 8192  ;;  %p2843_p13 = scmp.lt.s32.totalorder %s2276_s17, %s2276_s17 }
 0x5e7   :  { %v2039_v36 = vmul.f32 0.00390625, %v2037_v54  ;;  %v2041_v50 = vmul.f32 %v1899_v12, %v1899_v12  ;;  %p2839_p12 = scmp.ne.s32.totalorder %s2276_s17, %s2838_s18  ;;  %p2844_p0 = scmp.lt.s32.totalorder %s2838_s18, %s2838_s18 }
 0x5e8   :  { %v2042_v40 = vsub.f32 %v2038_v52, %v2040_v23 }
 0x5e9   :  { %v2043_v46 = vsub.f32 %v2039_v36, %v2041_v50  ;;  %p2845_p1 = por %p2844_p0, %p2843_p13 }
 0x5ea   :  { %v2044_v31 = vmax.f32 %v2042_v40, 0.0  ;;  %v4458_v40 = vld [vmem:[#allocation22_spill] sm:$0xff] }
 0x5eb   :  { %v2045_v34 = vmax.f32 %v2043_v46, 0.0  ;;  %p2846_p2 = pnand %p2845_p1, %p2839_p12 }
 0x5ec   :  { %v2046_v55 = vadd.f32 1e-05, %v2044_v31 }
 0x5ed   :  { %v2047_v51 = vadd.f32 1e-05, %v2045_v34  ;;  %v4460_v34 = vld [vmem:[#allocation26_spill] sm:$0xff] }
 0x5ee   :  { %2723 = vrsqrt.f32 %v2046_v55  ;;  %v4461_v55 = vld [vmem:[#allocation28_spill] sm:$0xff] }
 0x5ef   :  { %2725 = vrsqrt.f32 %v2047_v51 }
 0x5f8   :  { %v2724_v10 = vpop.eup %2723 }
 0x5f9   :  { %v2726_v38 = vpop.eup %2725  ;;  %v2050_v30 = vmul.f32 %v3564_v21, %v2724_v10 }
 0x5fa   :  { %v2051_v35 = vmul.f32 %v2726_v38, %v157_v41  ;;  %v4463_v38 = vld [vmem:[#allocation32_spill] sm:$0xff] }
 0x5fb   :  { %v2052_v9 = vmul.f32 %v2050_v30, %v1898_v47  ;;  %v2065_v33 = vrot.slane %v2050_v30, %v2064_v59 }
 0x5fc   :  { %v2053_v16 = vmul.f32 %v2051_v35, %v1899_v12  ;;  %v4023_v42 = vrot.slane %v2051_v35, %v2064_v59  ;;  %v4462_v59 = vld [vmem:[#allocation30_spill] sm:$0xff] }
 0x5fd   :  { %v2056_v3 = vrot.slane %v2052_v9, 7  ;;  %v2132_v5 = vmul.f32 %v2065_v33, %v3986_v19  ;;  %v4027_v57 = vmul.f32 %v2065_v33, %v3697_v4  ;;  %v4030_v54 = vmul.f32 %v2065_v33, %v3705_v2  ;;  %v4464_v35 = vld [vmem:[#allocation34_spill] sm:$0xff] }
 0x5fe   :  { %v4033_v52 = vmul.f32 %v2065_v33, %v3725_v26  ;;  %v4036_v47 = vmul.f32 %v2065_v33, %v3739_v62  ;;  %v4039_v58 = vmul.f32 %v2065_v33, %v3753_v7  ;;  %v4042_v12 = vmul.f32 %v2065_v33, %v3767_v17 }
 0x5ff   :  { %v2060_v19 = vsub.f32 %v3564_v21, %v2056_v3  ;;  %v4046_v4 = vmul.f32 %v2065_v33, %v3781_v0  ;;  %v4049_v2 = vmul.f32 %v2065_v33, %v3795_v22  ;;  %v4052_v26 = vmul.f32 %v2065_v33, %v3809_v61 }
 0x600   :  { %v4055_v62 = vmul.f32 %v2065_v33, %v3823_v53  ;;  %v4058_v7 = vmul.f32 %v2065_v33, %v3837_v63  ;;  %v4061_v17 = vmul.f32 %v2065_v33, %v3851_v32  ;;  %v4064_v21 = vmul.f32 %v2065_v33, %v3699_v45 }
 0x601   :  { %v4066_v0 = vrot.slane %v2060_v19, %v2136_v27  ;;  %v4069_v22 = vmul.f32 %v2065_v33, %v3713_v28  ;;  %v4072_v61 = vmul.f32 %v2065_v33, %v3730_v13  ;;  %v4075_v53 = vmul.f32 %v2065_v33, %v3744_v20  ;;  %v4467_v19 = vld [vmem:[#allocation17_spill] sm:$0xff] }
 0x602   :  { %v4078_v63 = vmul.f32 %v2065_v33, %v3758_v37  ;;  %v4081_v32 = vmul.f32 %v2065_v33, %v3772_v11  ;;  %v4084_v45 = vmul.f32 %v2065_v33, %v3786_v39  ;;  %v4087_v23 = vmul.f32 %v2065_v33, %v3800_v8 }
 0x603   :  { %v2204_v28 = vadd.f32 %v4066_v0, %v2132_v5  ;;  %v4091_v13 = vmul.f32 %v2065_v33, %v3814_v44  ;;  %v4094_v20 = vmul.f32 %v2065_v33, %v3828_v15  ;;  %v4097_v37 = vmul.f32 %v2065_v33, %v3842_v18 }
 0x604   :  { %v4100_v11 = vmul.f32 %v2065_v33, %v3856_v24  ;;  %v4103_v39 = vmul.f32 %v2065_v33, %v3874_v60  ;;  %v4106_v8 = vmul.f32 %v2065_v33, %v3890_v29  ;;  %v4109_v36 = vmul.f32 %v2065_v33, %v3906_v56 }
 0x605   :  { %2268 = vst [vmem:[#allocation11 + $0x1f0] sm:$0xff] %v2204_v28  ;;  %v4112_v44 = vmul.f32 %v2065_v33, %v3922_v25  ;;  %v4115_v15 = vmul.f32 %v2065_v33, %v3938_v49  ;;  %v4118_v18 = vmul.f32 %v2065_v33, %v3954_v6  ;;  %v4121_v24 = vmul.f32 %v2065_v33, %v3970_v43  ;;  %v4456_v49 = vld [vmem:[#allocation18_spill] sm:$0xff]  ;;  %v4457_v6 = vld [vmem:[#allocation20_spill] sm:$0xff] }
 0x606   :  { %v2057_v60 = vrot.slane %v2053_v16, 7  ;;  %v2133_v29 = vmul.f32 %v4023_v42, %v3991_v14  ;;  %v4127_v56 = vmul.f32 %v4023_v42, %v3701_v48  ;;  %v4131_v25 = vmul.f32 %v4023_v42, %v3715_v1  ;;  %v4459_v14 = vld [vmem:[#allocation24_spill] sm:$0xff] }
 0x607   :  { %v4135_v50 = vmul.f32 %v4023_v42, %v4456_v49  ;;  %v4139_v43 = vmul.f32 %v4023_v42, %v4457_v6  ;;  %v4143_v46 = vmul.f32 %v4023_v42, %v4458_v40  ;;  %v4147_v48 = vmul.f32 %v4023_v42, %v4459_v14  ;;  %v4466_v16 = vld [vmem:[#allocation16_spill] sm:$0xff]  ;;  %v4469_v6 = vld [vmem:[#allocation21_spill] sm:$0xff]  ;;  %v4470_v14 = vld [vmem:[#allocation23_spill] sm:$0xff] }
 0x608   :  { %v2061_v31 = vsub.f32 %v157_v41, %v2057_v60  ;;  %v4151_v1 = vmul.f32 %v4023_v42, %v4460_v34  ;;  %v4155_v51 = vmul.f32 %v4023_v42, %v4461_v55  ;;  %v4159_v10 = vmul.f32 %v4023_v42, %v4462_v59  ;;  %v4465_v41 = vld [vmem:[#allocation36_spill] sm:$0xff]  ;;  %v4468_v60 = vld [vmem:[#allocation19_spill] sm:$0xff]  ;;  %v4471_v55 = vld [vmem:[#allocation25_spill] sm:$0xff] }
 0x609   :  { %v4163_v30 = vmul.f32 %v4023_v42, %v4463_v38  ;;  %v4167_v9 = vmul.f32 %v4023_v42, %v4464_v35  ;;  %v4171_v33 = vmul.f32 %v4023_v42, %v4465_v41  ;;  %v4175_v3 = vmul.f32 %v4023_v42, %v4466_v16  ;;  %v4474_v38 = vld [vmem:[#allocation29_spill] sm:$0xff]  ;;  %v4476_v16 = vld [vmem:[#allocation31_spill] sm:$0xff] }
 0x60a   :  { %v4177_v5 = vrot.slane %v2061_v31, %v2136_v27  ;;  %v4181_v28 = vmul.f32 %v4023_v42, %v4467_v19  ;;  %v4185_v49 = vmul.f32 %v4023_v42, %v4468_v60  ;;  %v4189_v40 = vmul.f32 %v4023_v42, %v4469_v6  ;;  %v4472_v31 = vld [vmem:[#allocation27_spill] sm:$0xff]  ;;  %v4478_v60 = vld [vmem:[#allocation33_spill] sm:$0xff] }
 0x60b   :  { %v4193_v34 = vmul.f32 %v4023_v42, %v4470_v14  ;;  %v4197_v27 = vmul.f32 %v4023_v42, %v4471_v55  ;;  %v4201_v59 = vmul.f32 %v4023_v42, %v4472_v31  ;;  %v4205_v35 = vmul.f32 %v4023_v42, %v4474_v38  ;;  %v4480_v14 = vld [vmem:[#allocation35_spill] sm:$0xff]  ;;  %v4482_v31 = vld [vmem:[#allocation37_spill] sm:$0xff]  ;;  %v4484_v38 = vld [vmem:[#allocation38_spill] sm:$0xff] }
 0x60c   :  { %v2205_v41 = vadd.f32 %v4177_v5, %v2133_v29  ;;  %v4210_v19 = vmul.f32 %v4023_v42, %v4476_v16  ;;  %v4214_v6 = vmul.f32 %v4023_v42, %v4478_v60  ;;  %v4218_v55 = vmul.f32 %v4023_v42, %v4480_v14  ;;  %v4486_v29 = vld [vmem:[#allocation39_spill] sm:$0xff] }
 0x60d   :  { %4473 = vst [vmem:[#allocation18_spill] sm:$0xff] %v4201_v59  ;;  %4475 = vst [vmem:[#allocation20_spill] sm:$0xff] %v4205_v35  ;;  %v4222_v59 = vmul.f32 %v4023_v42, %v4482_v31  ;;  %v4226_v35 = vmul.f32 %v4023_v42, %v4484_v38  ;;  %v4230_v16 = vmul.f32 %v4023_v42, %v4486_v29 }
 0x60e   :  { %4477 = vst [vmem:[#allocation22_spill] sm:$0xff] %v4210_v19  ;;  %4479 = vst [vmem:[#allocation24_spill] sm:$0xff] %v4214_v6  ;;  %v4487_v19 = vld [vmem:[#allocation40_spill] sm:$0xff]  ;;  %v4488_v6 = vld [vmem:[#allocation41_spill] sm:$0xff] }
 0x60f   :  { %4481 = vst [vmem:[#allocation26_spill] sm:$0xff] %v4218_v55  ;;  %4483 = vst [vmem:[#allocation28_spill] sm:$0xff] %v4222_v59  ;;  %v4234_v60 = vmul.f32 %v4023_v42, %v4487_v19  ;;  %v4238_v14 = vmul.f32 %v4023_v42, %v4488_v6  ;;  %v4489_v55 = vld [vmem:[#allocation42_spill] sm:$0xff]  ;;  %v4490_v59 = vld [vmem:[#allocation43_spill] sm:$0xff]  ;;  %v2142_v19 = vadd.f32 %v4066_v0, %v4027_v57 }
 0x610   :  { %4485 = vst [vmem:[#allocation30_spill] sm:$0xff] %v4226_v35  ;;  %2269 = vst [vmem:[#allocation11 + $0x1f8] sm:$0xff] %v2205_v41  ;;  %v4242_v31 = vmul.f32 %v4023_v42, %v4489_v55  ;;  %v4246_v38 = vmul.f32 %v4023_v42, %v4490_v59  ;;  %v4492_v35 = vld [vmem:[#allocation44_spill] sm:$0xff]  ;;  %v2144_v41 = vadd.f32 %v4066_v0, %v4030_v54 }
 0x611   :  { %v4250_v29 = vmul.f32 %v4023_v42, %v4492_v35  ;;  %v2146_v6 = vadd.f32 %v4066_v0, %v4033_v52  ;;  %v2148_v55 = vadd.f32 %v4066_v0, %v4036_v47  ;;  %v2150_v59 = vadd.f32 %v4066_v0, %v4039_v58  ;;  %2206 = vst [vmem:[#allocation11] sm:$0xff] %v2142_v19 }
 0x612   :  { %4491 = vst [vmem:[#allocation32_spill] sm:$0xff] %v4246_v38  ;;  %v2152_v38 = vadd.f32 %v4066_v0, %v4042_v12  ;;  %v2154_v42 = vadd.f32 %v4066_v0, %v4046_v4  ;;  %v2156_v57 = vadd.f32 %v4066_v0, %v4049_v2  ;;  %v2158_v54 = vadd.f32 %v4066_v0, %v4052_v26 }
 0x613   :  { %v2160_v52 = vadd.f32 %v4066_v0, %v4055_v62  ;;  %v2162_v47 = vadd.f32 %v4066_v0, %v4058_v7  ;;  %v2164_v58 = vadd.f32 %v4066_v0, %v4061_v17  ;;  %2208 = vst [vmem:[#allocation11 + $0x10] sm:$0xff] %v2144_v41  ;;  %2210 = vst [vmem:[#allocation11 + $0x20] sm:$0xff] %v2146_v6 }
 0x614   :  { %2212 = vst [vmem:[#allocation11 + $0x30] sm:$0xff] %v2148_v55  ;;  %v2166_v12 = vadd.f32 %v4066_v0, %v4064_v21  ;;  %v2168_v4 = vadd.f32 %v4066_v0, %v4069_v22  ;;  %v2170_v2 = vadd.f32 %v4066_v0, %v4072_v61  ;;  %v2172_v26 = vadd.f32 %v4066_v0, %v4075_v53 }
 0x615   :  { %2214 = vst [vmem:[#allocation11 + $0x40] sm:$0xff] %v2150_v59  ;;  %2216 = vst [vmem:[#allocation11 + $0x50] sm:$0xff] %v2152_v38  ;;  %v2174_v62 = vadd.f32 %v4066_v0, %v4078_v63  ;;  %v2176_v7 = vadd.f32 %v4066_v0, %v4081_v32  ;;  %v2178_v17 = vadd.f32 %v4066_v0, %v4084_v45 }
 0x616   :  { %2218 = vst [vmem:[#allocation11 + $0x60] sm:$0xff] %v2154_v42  ;;  %2220 = vst [vmem:[#allocation11 + $0x70] sm:$0xff] %v2156_v57  ;;  %v2180_v21 = vadd.f32 %v4066_v0, %v4087_v23  ;;  %v2182_v22 = vadd.f32 %v4066_v0, %v4091_v13  ;;  %v2184_v61 = vadd.f32 %v4066_v0, %v4094_v20  ;;  %v4497_v38 = vld [vmem:[#allocation26_spill] sm:$0xff]  ;;  %v4498_v19 = vld [vmem:[#allocation28_spill] sm:$0xff] }
 0x617   :  { %2222 = vst [vmem:[#allocation11 + $0x80] sm:$0xff] %v2158_v54  ;;  %2224 = vst [vmem:[#allocation11 + $0x90] sm:$0xff] %v2160_v52  ;;  %v2186_v53 = vadd.f32 %v4066_v0, %v4097_v37  ;;  %v2188_v63 = vadd.f32 %v4066_v0, %v4100_v11  ;;  %v2190_v32 = vadd.f32 %v4066_v0, %v4103_v39  ;;  %v4499_v6 = vld [vmem:[#allocation30_spill] sm:$0xff] }
 0x618   :  { %2226 = vst [vmem:[#allocation11 + $0xa0] sm:$0xff] %v2162_v47  ;;  %2228 = vst [vmem:[#allocation11 + $0xb0] sm:$0xff] %v2164_v58  ;;  %v2192_v45 = vadd.f32 %v4066_v0, %v4106_v8  ;;  %v2194_v23 = vadd.f32 %v4066_v0, %v4109_v36  ;;  %v2196_v13 = vadd.f32 %v4066_v0, %v4112_v44 }
 0x619   :  { %2230 = vst [vmem:[#allocation11 + $0xc0] sm:$0xff] %v2166_v12  ;;  %2232 = vst [vmem:[#allocation11 + $0xd0] sm:$0xff] %v2168_v4  ;;  %v2198_v20 = vadd.f32 %v4066_v0, %v4115_v15  ;;  %v2200_v37 = vadd.f32 %v4066_v0, %v4118_v18  ;;  %v2202_v11 = vadd.f32 %v4066_v0, %v4121_v24  ;;  %v4500_v52 = vld [vmem:[#allocation32_spill] sm:$0xff] }
 0x61a   :  { %2234 = vst [vmem:[#allocation11 + $0xe0] sm:$0xff] %v2170_v2  ;;  %2236 = vst [vmem:[#allocation11 + $0xf0] sm:$0xff] %v2172_v26  ;;  %v2143_v39 = vadd.f32 %v4177_v5, %v4127_v56  ;;  %v2145_v8 = vadd.f32 %v4177_v5, %v4131_v25  ;;  %v2147_v36 = vadd.f32 %v4177_v5, %v4135_v50 }
 0x61b   :  { %2238 = vst [vmem:[#allocation11 + $0x100] sm:$0xff] %v2174_v62  ;;  %2240 = vst [vmem:[#allocation11 + $0x110] sm:$0xff] %v2176_v7  ;;  %v2149_v44 = vadd.f32 %v4177_v5, %v4139_v43  ;;  %v2151_v15 = vadd.f32 %v4177_v5, %v4143_v46  ;;  %v2153_v0 = vadd.f32 %v4177_v5, %v4147_v48 }
 0x61c   :  { %2242 = vst [vmem:[#allocation11 + $0x120] sm:$0xff] %v2178_v17  ;;  %2244 = vst [vmem:[#allocation11 + $0x130] sm:$0xff] %v2180_v21  ;;  %v2155_v18 = vadd.f32 %v4177_v5, %v4151_v1  ;;  %v2157_v24 = vadd.f32 %v4177_v5, %v4155_v51  ;;  %v2159_v56 = vadd.f32 %v4177_v5, %v4159_v10 }
 0x61d   :  { %2246 = vst [vmem:[#allocation11 + $0x140] sm:$0xff] %v2182_v22  ;;  %2248 = vst [vmem:[#allocation11 + $0x150] sm:$0xff] %v2184_v61  ;;  %v2161_v25 = vadd.f32 %v4177_v5, %v4163_v30  ;;  %v2163_v50 = vadd.f32 %v4177_v5, %v4167_v9  ;;  %v2165_v43 = vadd.f32 %v4177_v5, %v4171_v33  ;;  %v4493_v9 = vld [vmem:[#allocation18_spill] sm:$0xff] }
 0x61e   :  { %2250 = vst [vmem:[#allocation11 + $0x160] sm:$0xff] %v2186_v53  ;;  %2252 = vst [vmem:[#allocation11 + $0x170] sm:$0xff] %v2188_v63  ;;  %v2167_v46 = vadd.f32 %v4177_v5, %v4175_v3  ;;  %v2169_v48 = vadd.f32 %v4177_v5, %v4181_v28  ;;  %v2171_v1 = vadd.f32 %v4177_v5, %v4185_v49  ;;  %v4494_v3 = vld [vmem:[#allocation20_spill] sm:$0xff]  ;;  %v4495_v49 = vld [vmem:[#allocation22_spill] sm:$0xff] }
 0x61f   :  { %2254 = vst [vmem:[#allocation11 + $0x180] sm:$0xff] %v2190_v32  ;;  %2256 = vst [vmem:[#allocation11 + $0x190] sm:$0xff] %v2192_v45  ;;  %v2173_v51 = vadd.f32 %v4177_v5, %v4189_v40  ;;  %v2175_v10 = vadd.f32 %v4177_v5, %v4193_v34  ;;  %v2177_v30 = vadd.f32 %v4177_v5, %v4197_v27  ;;  %v4496_v40 = vld [vmem:[#allocation24_spill] sm:$0xff] }
 0x620   :  { %2258 = vst [vmem:[#allocation11 + $0x1a0] sm:$0xff] %v2194_v23  ;;  %2260 = vst [vmem:[#allocation11 + $0x1b0] sm:$0xff] %v2196_v13  ;;  %v2179_v33 = vadd.f32 %v4177_v5, %v4493_v9  ;;  %v2181_v28 = vadd.f32 %v4177_v5, %v4494_v3  ;;  %v2183_v35 = vadd.f32 %v4177_v5, %v4495_v49 }
 0x621   :  { %2207 = vst [vmem:[#allocation11 + $0x8] sm:$0xff] %v2143_v39  ;;  %2262 = vst [vmem:[#allocation11 + $0x1c0] sm:$0xff] %v2198_v20  ;;  %v2185_v34 = vadd.f32 %v4177_v5, %v4496_v40  ;;  %v2187_v27 = vadd.f32 %v4177_v5, %v4497_v38  ;;  %v2189_v41 = vadd.f32 %v4177_v5, %v4498_v19 }
 0x622   :  { %2264 = vst [vmem:[#allocation11 + $0x1d0] sm:$0xff] %v2200_v37  ;;  %2266 = vst [vmem:[#allocation11 + $0x1e0] sm:$0xff] %v2202_v11  ;;  %v2191_v55 = vadd.f32 %v4177_v5, %v4499_v6  ;;  %v2193_v59 = vadd.f32 %v4177_v5, %v4230_v16  ;;  %v2195_v42 = vadd.f32 %v4177_v5, %v4234_v60 }
 0x623   :  { %2209 = vst [vmem:[#allocation11 + $0x18] sm:$0xff] %v2145_v8  ;;  %2211 = vst [vmem:[#allocation11 + $0x28] sm:$0xff] %v2147_v36  ;;  %v2197_v57 = vadd.f32 %v4177_v5, %v4238_v14  ;;  %v2199_v54 = vadd.f32 %v4177_v5, %v4242_v31  ;;  %v2201_v47 = vadd.f32 %v4177_v5, %v4500_v52 }
 0x624   :  { %2213 = vst [vmem:[#allocation11 + $0x38] sm:$0xff] %v2149_v44  ;;  %2215 = vst [vmem:[#allocation11 + $0x48] sm:$0xff] %v2151_v15  ;;  %v2203_v58 = vadd.f32 %v4177_v5, %v4250_v29 }
 0x625   :  { %2217 = vst [vmem:[#allocation11 + $0x58] sm:$0xff] %v2153_v0  ;;  %2219 = vst [vmem:[#allocation11 + $0x68] sm:$0xff] %v2155_v18 }
 0x626   :  { %2221 = vst [vmem:[#allocation11 + $0x78] sm:$0xff] %v2157_v24  ;;  %2223 = vst [vmem:[#allocation11 + $0x88] sm:$0xff] %v2159_v56 }
 0x627   :  { %2225 = vst [vmem:[#allocation11 + $0x98] sm:$0xff] %v2161_v25  ;;  %2227 = vst [vmem:[#allocation11 + $0xa8] sm:$0xff] %v2163_v50 }
 0x628   :  { %2229 = vst [vmem:[#allocation11 + $0xb8] sm:$0xff] %v2165_v43  ;;  %2231 = vst [vmem:[#allocation11 + $0xc8] sm:$0xff] %v2167_v46 }
 0x629   :  { %2233 = vst [vmem:[#allocation11 + $0xd8] sm:$0xff] %v2169_v48  ;;  %2235 = vst [vmem:[#allocation11 + $0xe8] sm:$0xff] %v2171_v1 }
 0x62a   :  { %2237 = vst [vmem:[#allocation11 + $0xf8] sm:$0xff] %v2173_v51  ;;  %2239 = vst [vmem:[#allocation11 + $0x108] sm:$0xff] %v2175_v10 }
 0x62b   :  { %2241 = vst [vmem:[#allocation11 + $0x118] sm:$0xff] %v2177_v30  ;;  %2243 = vst [vmem:[#allocation11 + $0x128] sm:$0xff] %v2179_v33 }
 0x62c   :  { %2245 = vst [vmem:[#allocation11 + $0x138] sm:$0xff] %v2181_v28  ;;  %2247 = vst [vmem:[#allocation11 + $0x148] sm:$0xff] %v2183_v35 }
 0x62d   :  { %2249 = vst [vmem:[#allocation11 + $0x158] sm:$0xff] %v2185_v34  ;;  %2251 = vst [vmem:[#allocation11 + $0x168] sm:$0xff] %v2187_v27 }
 0x62e   :  { %2253 = vst [vmem:[#allocation11 + $0x178] sm:$0xff] %v2189_v41  ;;  %2255 = vst [vmem:[#allocation11 + $0x188] sm:$0xff] %v2191_v55 }
 0x62f   :  { %2257 = vst [vmem:[#allocation11 + $0x198] sm:$0xff] %v2193_v59  ;;  %2259 = vst [vmem:[#allocation11 + $0x1a8] sm:$0xff] %v2195_v42 }
 0x630   :  { %2261 = vst [vmem:[#allocation11 + $0x1b8] sm:$0xff] %v2197_v57  ;;  %2263 = vst [vmem:[#allocation11 + $0x1c8] sm:$0xff] %v2199_v54 }
 0x631   :  { %2265 = vst [vmem:[#allocation11 + $0x1d8] sm:$0xff] %v2201_v47  ;;  %2267 = vst [vmem:[#allocation11 + $0x1e8] sm:$0xff] %v2203_v58 }
 0x632   :  { %2849 = shalt.err (!%p2846_p2)
}
 0x633   :  { %s2850_s21 = scalar_lea.hbm %s4397_s6, 8192 }
 0x634   :  { %p2851_p3 = scmp.ne.s32.totalorder %s4397_s6, %s2850_s21  ;;  %p2854_p4 = scmp.lt.u32.totalorder %s2850_s21, %s4397_s6 }
 0x636   :  { %p2856_p5 = pnand %p2854_p4, %p2851_p3 }
 0x638   :  { %2859 = shalt.err (!%p2856_p5)
}
 0x639   :  { %2281 = dma.vmem_to_hbm [thread:$0]  %s2276_s17, 8192, %s4397_s6, [#allocation4], %s2873_s3, %s2873_s3, %s2874_s10  }
 0x63a   :  { %2866 = dma.done.wait [#allocation4], 8192  }
 0x63b   :  { %2867 = vsyncadd [#allocation4], 4294959104 }
 0x63c   :  { %2285 = vsyncpa [#allocation3], 1 }
 0x63d   :  { %2286 = vsyncpa [#allocation6], 1 }
 0x63e   :  { %2287 = vsyncpa [#allocation9], 1 }
 0x63f   :  { %2288 = vsyncpa [#allocation4], 1 }

</bundles_post_ra>
